<compile_context>
chip_gen: v7x
topology: tpu7x:2x2x1
jax: 0.10.0
libtpu: 0.0.40
codegen_flags: <defaults>
</compile_context>

<pallas_src>
import functools

import numpy as np
import jax
import jax.numpy as jnp
from jax import lax
from jax.experimental import pallas as pl
from jax.experimental.pallas import tpu as pltpu

# ---- hyperparameters (consistent with the hardcoded reshape(-1, 3, 300)) ----
VOCAB = 50
INPUT_SIZE = 300            # embedding dim == LSTM input size (forward hardcodes 300)
HIDDEN = 64
OUTPUT = 4
NUM_LAYERS = 1              # TODO(synk): only num_layers=1 LSTM is implemented
KERNEL_NUM = 300
KERNEL_SIZES = (3, 4, 5)    # kernel_num * len(kernel_sizes) == 900 == 3 * 300
BATCH = 2
SEQ = 8

# ---- lane-aligned padded sizes (zero-filled once in prepare_weights) ----
DP = 384                    # embedding dim 300 -> 3 lane tiles
CP = 384                    # conv channels / LSTM input 300 -> 3 lane tiles
HP = 128                    # LSTM hidden 64 -> one full vreg (gate slices lane-aligned)
ATT_PAD = 128               # attention hidden 32 -> one lane tile
OUT_PAD = 128               # output 4 -> lane-dense store
VOCAB_PAD = 128             # vocab 50 -> one lane tile (one-hot contraction dim)
N_TAPS = sum(KERNEL_SIZES)  # 12 conv taps fused into a single matmul

_PREP_ORDER = ('emb_tab', 'w_conv', 'b_conv', 'w_ih', 'w_hh', 'b_lstm',
               'w1', 'b1', 'w2', 'b2', 'w_out', 'b_out')


# ----------------------------- fused Pallas kernel -------------------------------------

def _clstm_kernel(tok_ref, emb_tab_ref, wconv_ref, bconv_ref,
                  wih_ref, whh_ref, blstm_ref,
                  w1_ref, b1_ref, w2_ref, b2_ref, wo_ref, bo_ref,
                  out_ref, emb_out_ref, *, B, L):
    """Single grid step == the whole batch (batch folded into matmul rows)."""
    R = B * L
    T = len(KERNEL_SIZES)

    # -- embedding: exact one-hot gather as ONE bf16 MXU matmul for all B*L tokens --
    tok = tok_ref[...]                                                 # (R, 1) int32
    pos = lax.broadcasted_iota(jnp.int32, (R, VOCAB_PAD), 1)           # (R, Vp)
    onehot = (tok == pos).astype(jnp.bfloat16)                         # (R, Vp)
    x_emb = jnp.dot(onehot, emb_tab_ref[...],
                    preferred_element_type=jnp.float32)                # (R, DP) f32, exact
    x_emb = x_emb.astype(jnp.bfloat16)

    # -- convs: ONE fused (R, DP) x (DP, 12*CP) bf16 matmul; per kernel size the output
    #    is K shifted-row column blocks summed on the VPU, bias+ReLU, mask, time-max --
    y = jnp.dot(x_emb, wconv_ref[...],
                preferred_element_type=jnp.float32)                    # (R, N_TAPS*CP)
    bconv = bconv_ref[...]                                             # (3, CP)
    feats = []                                                         # per size: (B, CP)
    g = 0
    for j, K in enumerate(KERNEL_SIZES):
        t_out = L - K + 1
        acc = y[:, g * CP:(g + 1) * CP]                                # tap k=0 (lane-aligned)
        for k in range(1, K):
            blk = y[:, (g + k) * CP:(g + k + 1) * CP]                  # (R, CP)
            # rows shifted up by k (wrapped rows only land in masked positions)
            acc = acc + jnp.concatenate([blk[k:, :], blk[:k, :]], axis=0)
        g += K
        acc = jnp.maximum(acc + bconv[j:j + 1, :], 0.0)                # bias + ReLU, (R, CP)
        lmask = lax.broadcasted_iota(jnp.int32, (L, 1), 0) < t_out     # valid time positions
        pooled = [jnp.max(jnp.where(lmask, acc[b * L:(b + 1) * L, :], 0.0),
                          axis=0, keepdims=True) for b in range(B)]    # (1, CP) each
        feats.append(jnp.concatenate(pooled, axis=0))                  # (B, CP)

    # -- LSTM over T=3 steps, batch folded into rows; gates padded/lane-aligned i|f|g|o --
    x3 = jnp.concatenate(feats, axis=0).astype(jnp.bfloat16)           # (T*B, CP), t-major
    xw = jnp.dot(x3, wih_ref[...],
                 preferred_element_type=jnp.float32) + blstm_ref[...]  # (T*B, 4*HP)
    h = jnp.zeros((B, HP), jnp.float32)
    c = jnp.zeros((B, HP), jnp.float32)
    hs = []
    for t in range(T):                                                 # T == 3, static unroll
        gates = xw[t * B:(t + 1) * B, :] + jnp.dot(
            h.astype(jnp.bfloat16), whh_ref[...], preferred_element_type=jnp.float32)
        i_g = jax.nn.sigmoid(gates[:, 0 * HP:1 * HP])                  # lane-aligned slices
        f_g = jax.nn.sigmoid(gates[:, 1 * HP:2 * HP])
        g_g = jnp.tanh(gates[:, 2 * HP:3 * HP])
        o_g = jax.nn.sigmoid(gates[:, 3 * HP:4 * HP])
        c = f_g * c + i_g * g_g
        h = o_g * jnp.tanh(c)
        hs.append(h)                                                   # (B, HP) f32

    # -- self-attention: projection batched over all B*T rows, energy as a lane reduce --
    r_rows = jnp.concatenate(hs, axis=0)                               # (T*B, HP), t-major
    hid = jnp.maximum(
        jnp.dot(r_rows.astype(jnp.bfloat16), w1_ref[...],
                preferred_element_type=jnp.float32) + b1_ref[...], 0.0)     # (T*B, ATT_PAD)
    e = jnp.sum(hid * w2_ref[...], axis=-1, keepdims=True) + b2_ref[...]    # (T*B, 1)
    e_t = [e[t * B:(t + 1) * B, :] for t in range(T)]                  # each (B, 1)
    m = functools.reduce(jnp.maximum, e_t)                             # (B, 1)
    p_t = [jnp.exp(et - m) for et in e_t]
    inv = pl.reciprocal(functools.reduce(lambda a, b: a + b, p_t), approx=True)
    emb = functools.reduce(lambda a, b: a + b,
                           [hs[t] * (p_t[t] * inv) for t in range(T)])      # (B, HP)

    # -- output linear (lane-dense padded stores) --
    out = jnp.dot(emb.astype(jnp.bfloat16), wo_ref[...],
                  preferred_element_type=jnp.float32) + bo_ref[...]    # (B, OUT_PAD)
    out_ref[...] = out
    emb_out_ref[...] = emb


def clstm_forward_pallas(prep, x_tokens):
    B, L = x_tokens.shape
    tok = x_tokens.astype(jnp.int32).reshape(B * L, 1)

    kernel = functools.partial(_clstm_kernel, B=B, L=L)
    full2d = lambda i: (0, 0)                                          # everything resident
    in_specs = [pl.BlockSpec((B * L, 1), full2d)] + \
               [pl.BlockSpec(prep[name].shape, full2d) for name in _PREP_ORDER]
    out_specs = (pl.BlockSpec((B, OUT_PAD), full2d),
                 pl.BlockSpec((B, HP), full2d))
    out_shape = (jax.ShapeDtypeStruct((B, OUT_PAD), jnp.float32),
                 jax.ShapeDtypeStruct((B, HP), jnp.float32))

    out_pad, emb_pad = pl.pallas_call(
        kernel,
        grid=(1,),                       # whole batch in one step: the model is
        in_specs=in_specs,               # latency-bound, so grid parallelism buys nothing
        out_specs=out_specs,
        out_shape=out_shape,
        compiler_params=pltpu.CompilerParams(
            dimension_semantics=("arbitrary",),
            vmem_limit_bytes=32 * 1024 * 1024),
    )(tok, *[prep[name] for name in _PREP_ORDER])

    return out_pad[:, :OUTPUT], emb_pad[:, :HIDDEN]


forward = jax.jit(clstm_forward_pallas)


# ----------------------------- parameters & one-time weight prep -----------------------

def init_params(key):
    ks = jax.random.split(key, 16)
    p = {}
    p['embedding'] = jax.random.normal(ks[0], (VOCAB, INPUT_SIZE), jnp.float32) * 0.1
    p['conv_w'], p['conv_b'] = [], []
    for i, K in enumerate(KERNEL_SIZES):
        p['conv_w'].append(
            jax.random.normal(ks[1 + i], (KERNEL_NUM, 1, K, INPUT_SIZE), jnp.float32) * 0.05)
        p['conv_b'].append(
            jax.random.normal(ks[4 + i], (KERNEL_NUM,), jnp.float32) * 0.05)
    p['w_ih'] = jax.random.normal(ks[7], (4 * HIDDEN, INPUT_SIZE), jnp.float32) * 0.05
    p['w_hh'] = jax.random.normal(ks[8], (4 * HIDDEN, HIDDEN), jnp.float32) * 0.05
    p['b_ih'] = jax.random.normal(ks[9], (4 * HIDDEN,), jnp.float32) * 0.05
    p['b_hh'] = jax.random.normal(ks[10], (4 * HIDDEN,), jnp.float32) * 0.05
    p['attn_w1'] = jax.random.normal(ks[11], (HIDDEN // 2, HIDDEN), jnp.float32) * 0.05
    p['attn_b1'] = jax.random.normal(ks[12], (HIDDEN // 2,), jnp.float32) * 0.05
    p['attn_w2'] = jax.random.normal(ks[13], (1, HIDDEN // 2), jnp.float32) * 0.05
    p['attn_b2'] = jax.random.normal(ks[14], (1,), jnp.float32) * 0.05
    p['out_w'] = jax.random.normal(ks[15], (OUTPUT, HIDDEN), jnp.float32) * 0.05
    p['out_b'] = jnp.zeros((OUTPUT,), jnp.float32)
    return p


def prepare_weights(params):
    """All transposes / bias fusions / paddings / bf16 casts done ONCE (not per forward)."""
    D, C, H, Hp = INPUT_SIZE, KERNEL_NUM, HIDDEN, HP

    # embedding table: vocab rows -> VOCAB_PAD, dim -> DP, bf16 (one-hot select is exact)
    emb_tab = (jnp.zeros((VOCAB_PAD, DP), jnp.float32)
               .at[:VOCAB, :D].set(params['embedding'])).astype(jnp.bfloat16)

    # convs: all 12 taps fused along the output axis -> (DP, N_TAPS*CP), bf16
    w_all = jnp.zeros((DP, N_TAPS * CP), jnp.float32)
    g = 0
    for j, K in enumerate(KERNEL_SIZES):
        w = params['conv_w'][j]                                       # (C, 1, K, D)
        for k in range(K):
            w_all = w_all.at[:D, g * CP:g * CP + C].set(jnp.transpose(w[:, 0, k, :]))
            g += 1
    w_conv = w_all.astype(jnp.bfloat16)
    b_conv = jnp.zeros((len(KERNEL_SIZES), CP), jnp.float32)
    for j in range(len(KERNEL_SIZES)):
        b_conv = b_conv.at[j, :C].set(params['conv_b'][j])

    # LSTM: transpose + fuse b_ih+b_hh once, pad each gate (i|f|g|o) to a 128-lane block.
    # Zero-padded rows/cols keep the padded hidden/cell lanes exactly 0 through recurrence.
    bias = params['b_ih'] + params['b_hh']
    w_ih = jnp.zeros((CP, 4 * Hp), jnp.float32)
    w_hh = jnp.zeros((Hp, 4 * Hp), jnp.float32)
    b_l = jnp.zeros((1, 4 * Hp), jnp.float32)
    for q in range(4):
        w_ih = w_ih.at[:D, q * Hp:q * Hp + H].set(params['w_ih'][q * H:(q + 1) * H, :].T)
        w_hh = w_hh.at[:H, q * Hp:q * Hp + H].set(params['w_hh'][q * H:(q + 1) * H, :].T)
        b_l = b_l.at[0, q * Hp:q * Hp + H].set(bias[q * H:(q + 1) * H])
    w_ih = w_ih.astype(jnp.bfloat16)
    w_hh = w_hh.astype(jnp.bfloat16)

    # attention: w1 padded to (HP, ATT_PAD) bf16; w2 kept as an f32 row for a VPU reduce
    w1 = (jnp.zeros((Hp, ATT_PAD), jnp.float32)
          .at[:H, :H // 2].set(params['attn_w1'].T)).astype(jnp.bfloat16)
    b1 = jnp.zeros((1, ATT_PAD), jnp.float32).at[0, :H // 2].set(params['attn_b1'])
    w2 = jnp.zeros((1, ATT_PAD), jnp.float32).at[0, :H // 2].set(params['attn_w2'][0])
    b2 = params['attn_b2'].reshape(1, 1)

    w_out = (jnp.zeros((Hp, OUT_PAD), jnp.float32)
             .at[:H, :OUTPUT].set(params['out_w'].T)).astype(jnp.bfloat16)
    b_out = jnp.zeros((1, OUT_PAD), jnp.float32).at[0, :OUTPUT].set(params['out_b'])

    return {'emb_tab': emb_tab, 'w_conv': w_conv, 'b_conv': b_conv,
            'w_ih': w_ih, 'w_hh': w_hh, 'b_lstm': b_l,
            'w1': w1, 'b1': b1, 'w2': w2, 'b2': b2,
            'w_out': w_out, 'b_out': b_out}


# ----------------------------- pure-JAX reference (for validation) ---------------------

def _im2col(x_emb, K):
    B, L, D = x_emb.shape
    T_out = L - K + 1
    patches = jnp.stack([x_emb[:, k:k + T_out, :] for k in range(K)], axis=2)
    return patches.reshape(B, T_out, K * D)


def forward_ref(params, x_tokens):
    x_emb = jnp.take(params['embedding'], x_tokens, axis=0)
    feats = []
    for K, w, b in zip(KERNEL_SIZES, params['conv_w'], params['conv_b']):
        patches = _im2col(x_emb, K)
        acts = jnp.einsum('btk,ck->btc', patches,
                          w.reshape(KERNEL_NUM, K * INPUT_SIZE)) + b
        feats.append(jnp.max(jnp.maximum(acts, 0.0), axis=1))
    feats = jnp.concatenate(feats, axis=1)
    rnn_in = feats.reshape(-1, 3, 300)
    Bp, T, _ = rnn_in.shape
    h = jnp.zeros((Bp, HIDDEN)); c = jnp.zeros((Bp, HIDDEN))
    bias = params['b_ih'] + params['b_hh']
    outs = []
    for t in range(T):
        gates = rnn_in[:, t, :] @ params['w_ih'].T + h @ params['w_hh'].T + bias
        i, f, g, o = jnp.split(gates, 4, axis=1)
        i = jax.nn.sigmoid(i); f = jax.nn.sigmoid(f)
        g = jnp.tanh(g); o = jax.nn.sigmoid(o)
        c = f * c + i * g
        h = o * jnp.tanh(c)
        outs.append(h)
    r_out = jnp.stack(outs, axis=1)
    hid = jnp.maximum(jnp.einsum('bth,kh->btk', r_out, params['attn_w1'])
                      + params['attn_b1'], 0.0)
    energy = jnp.einsum('btk,ok->bto', hid, params['attn_w2']) + params['attn_b2']
    wts = jax.nn.softmax(energy[..., 0], axis=1)
    emb = jnp.sum(r_out * wts[..., None], axis=1)
    out = emb @ params['out_w'].T + params['out_b']
    return out, emb


# ----------------------------------------------------------------------------------------

if __name__ == "__main__":
    key = jax.random.PRNGKey(0)
    pkey, xkey = jax.random.split(key)
    params = init_params(pkey)
    prep = prepare_weights(params)
    x = jax.random.randint(xkey, (BATCH, SEQ), 0, VOCAB, dtype=jnp.int32)

    out, emb = forward(prep, x)
    jax.block_until_ready((out, emb))

    out_ref, emb_ref = forward_ref(params, x)
    assert out.shape == (BATCH, OUTPUT) and emb.shape == (BATCH, HIDDEN)
    # bf16 operands (f32 accumulation) everywhere -> slightly relaxed vs pure-f32 reference
    np.testing.assert_allclose(np.asarray(out), np.asarray(out_ref), rtol=3e-2, atol=5e-3)
    np.testing.assert_allclose(np.asarray(emb), np.asarray(emb_ref), rtol=3e-2, atol=5e-3)

    print("KERNEL_OK")
</pallas_src>

<mosaic_0001>
module attributes {stable_mosaic.version = 11 : i64} {
  func.func @_clstm_kernel(%arg0: i32, %arg1: memref<16x1xi32, #tpu.memory_space<vmem>>, %arg2: memref<128x384xbf16, #tpu.memory_space<vmem>>, %arg3: memref<384x4608xbf16, #tpu.memory_space<vmem>>, %arg4: memref<3x384xf32, #tpu.memory_space<vmem>>, %arg5: memref<384x512xbf16, #tpu.memory_space<vmem>>, %arg6: memref<128x512xbf16, #tpu.memory_space<vmem>>, %arg7: memref<1x512xf32, #tpu.memory_space<vmem>>, %arg8: memref<128x128xbf16, #tpu.memory_space<vmem>>, %arg9: memref<1x128xf32, #tpu.memory_space<vmem>>, %arg10: memref<1x128xf32, #tpu.memory_space<vmem>>, %arg11: memref<1x1xf32, #tpu.memory_space<vmem>>, %arg12: memref<128x128xbf16, #tpu.memory_space<vmem>>, %arg13: memref<1x128xf32, #tpu.memory_space<vmem>>, %arg14: memref<2x128xf32, #tpu.memory_space<vmem>>, %arg15: memref<2x128xf32, #tpu.memory_space<vmem>>) attributes {dimension_semantics = [#tpu.dimension_semantics<arbitrary>], iteration_bounds = array<i64: 1>, scalar_prefetch = 0 : i64, scratch_operands = 0 : i64, tpu.core_type = #tpu.core_type<tc>, window_params = [{pipeline_mode = #tpu.pipeline_mode<synchronous>, transform_indices = @transform_0, window_bounds = array<i64: 16, 1>}, {pipeline_mode = #tpu.pipeline_mode<synchronous>, transform_indices = @transform_1, window_bounds = array<i64: 128, 384>}, {pipeline_mode = #tpu.pipeline_mode<synchronous>, transform_indices = @transform_2, window_bounds = array<i64: 384, 4608>}, {pipeline_mode = #tpu.pipeline_mode<synchronous>, transform_indices = @transform_3, window_bounds = array<i64: 3, 384>}, {pipeline_mode = #tpu.pipeline_mode<synchronous>, transform_indices = @transform_4, window_bounds = array<i64: 384, 512>}, {pipeline_mode = #tpu.pipeline_mode<synchronous>, transform_indices = @transform_5, window_bounds = array<i64: 128, 512>}, {pipeline_mode = #tpu.pipeline_mode<synchronous>, transform_indices = @transform_6, window_bounds = array<i64: 1, 512>}, {pipeline_mode = #tpu.pipeline_mode<synchronous>, transform_indices = @transform_7, window_bounds = array<i64: 128, 128>}, {pipeline_mode = #tpu.pipeline_mode<synchronous>, transform_indices = @transform_8, window_bounds = array<i64: 1, 128>}, {pipeline_mode = #tpu.pipeline_mode<synchronous>, transform_indices = @transform_9, window_bounds = array<i64: 1, 128>}, {pipeline_mode = #tpu.pipeline_mode<synchronous>, transform_indices = @transform_10, window_bounds = array<i64: 1, 1>}, {pipeline_mode = #tpu.pipeline_mode<synchronous>, transform_indices = @transform_11, window_bounds = array<i64: 128, 128>}, {pipeline_mode = #tpu.pipeline_mode<synchronous>, transform_indices = @transform_12, window_bounds = array<i64: 1, 128>}, {pipeline_mode = #tpu.pipeline_mode<synchronous>, transform_indices = @transform_13, window_bounds = array<i64: 2, 128>}, {pipeline_mode = #tpu.pipeline_mode<synchronous>, transform_indices = @transform_14, window_bounds = array<i64: 2, 128>}]} {
    %c0 = arith.constant 0 : index
    %c0_0 = arith.constant 0 : index
    %0 = vector.load %arg1[%c0, %c0_0] : memref<16x1xi32, #tpu.memory_space<vmem>>, vector<16x1xi32>
    %1 = tpu.iota {dimensions = array<i32: 1>} : vector<16x128xi32>
    %2 = vector.broadcast %0 : vector<16x1xi32> to vector<16x128xi32>
    %3 = arith.cmpi eq, %2, %1 : vector<16x128xi32>
    %4 = arith.extui %3 : vector<16x128xi1> to vector<16x128xi32>
    %5 = arith.sitofp %4 : vector<16x128xi32> to vector<16x128xf32>
    %6 = arith.truncf %5 : vector<16x128xf32> to vector<16x128xbf16>
    %c0_1 = arith.constant 0 : index
    %c0_2 = arith.constant 0 : index
    %7 = vector.load %arg2[%c0_1, %c0_2] : memref<128x384xbf16, #tpu.memory_space<vmem>>, vector<128x384xbf16>
    %cst = arith.constant dense<0.000000e+00> : vector<16x384xf32>
    %8 = tpu.matmul %6, %7, %cst {dimension_numbers = #tpu.dot_dimension_numbers<[1], [0], [0], [1], [0, 0, 1, 1], [], []>} : vector<16x128xbf16>, vector<128x384xbf16>, vector<16x384xf32> -> vector<16x384xf32>
    %9 = arith.truncf %8 : vector<16x384xf32> to vector<16x384xbf16>
    %c0_3 = arith.constant 0 : index
    %c0_4 = arith.constant 0 : index
    %10 = vector.load %arg3[%c0_3, %c0_4] : memref<384x4608xbf16, #tpu.memory_space<vmem>>, vector<384x4608xbf16>
    %cst_5 = arith.constant dense<0.000000e+00> : vector<16x4608xf32>
    %11 = tpu.matmul %9, %10, %cst_5 {dimension_numbers = #tpu.dot_dimension_numbers<[1], [0], [0], [1], [0, 0, 1, 1], [], []>} : vector<16x384xbf16>, vector<384x4608xbf16>, vector<16x4608xf32> -> vector<16x4608xf32>
    %c0_6 = arith.constant 0 : index
    %c0_7 = arith.constant 0 : index
    %12 = vector.load %arg4[%c0_6, %c0_7] : memref<3x384xf32, #tpu.memory_space<vmem>>, vector<3x384xf32>
    %13 = vector.extract_strided_slice %11 {offsets = [0, 0], sizes = [16, 384], strides = [1, 1]} : vector<16x4608xf32> to vector<16x384xf32>
    %14 = vector.extract_strided_slice %11 {offsets = [0, 384], sizes = [16, 384], strides = [1, 1]} : vector<16x4608xf32> to vector<16x384xf32>
    %15 = vector.extract_strided_slice %14 {offsets = [1, 0], sizes = [15, 384], strides = [1, 1]} : vector<16x384xf32> to vector<15x384xf32>
    %16 = vector.extract_strided_slice %14 {offsets = [0, 0], sizes = [1, 384], strides = [1, 1]} : vector<16x384xf32> to vector<1x384xf32>
    %17 = tpu.concatenate %15, %16 in 0 : vector<15x384xf32>, vector<1x384xf32> -> vector<16x384xf32>
    %18 = arith.addf %13, %17 : vector<16x384xf32>
    %19 = vector.extract_strided_slice %11 {offsets = [0, 768], sizes = [16, 384], strides = [1, 1]} : vector<16x4608xf32> to vector<16x384xf32>
    %20 = vector.extract_strided_slice %19 {offsets = [2, 0], sizes = [14, 384], strides = [1, 1]} : vector<16x384xf32> to vector<14x384xf32>
    %21 = vector.extract_strided_slice %19 {offsets = [0, 0], sizes = [2, 384], strides = [1, 1]} : vector<16x384xf32> to vector<2x384xf32>
    %22 = tpu.concatenate %20, %21 in 0 : vector<14x384xf32>, vector<2x384xf32> -> vector<16x384xf32>
    %23 = arith.addf %18, %22 : vector<16x384xf32>
    %24 = vector.extract_strided_slice %12 {offsets = [0, 0], sizes = [1, 384], strides = [1, 1]} : vector<3x384xf32> to vector<1x384xf32>
    %25 = vector.broadcast %24 : vector<1x384xf32> to vector<16x384xf32>
    %26 = arith.addf %23, %25 : vector<16x384xf32>
    %cst_8 = arith.constant 0.000000e+00 : f32
    %27 = vector.broadcast %cst_8 : f32 to vector<16x384xf32>
    %28 = arith.maximumf %26, %27 : vector<16x384xf32>
    %29 = tpu.iota {dimensions = array<i32: 0>} : vector<8x1xi32>
    %c6_i32 = arith.constant 6 : i32
    %30 = vector.broadcast %c6_i32 : i32 to vector<8x1xi32>
    %31 = arith.cmpi slt, %29, %30 : vector<8x1xi32>
    %32 = vector.extract_strided_slice %28 {offsets = [0, 0], sizes = [8, 384], strides = [1, 1]} : vector<16x384xf32> to vector<8x384xf32>
    %cst_9 = arith.constant 0.000000e+00 : f32
    %33 = vector.shape_cast %31 : vector<8x1xi1> to vector<8x1xi1>
    %34 = vector.broadcast %33 : vector<8x1xi1> to vector<8x384xi1>
    %35 = vector.broadcast %cst_9 : f32 to vector<8x384xf32>
    %36 = arith.select %34, %32, %35 : vector<8x384xi1>, vector<8x384xf32>
    %cst_10 = arith.constant dense<0xFF800000> : vector<384xf32>
    %37 = vector.multi_reduction <maximumf>, %36, %cst_10 [0] : vector<8x384xf32> to vector<384xf32>
    %38 = vector.shape_cast %37 : vector<384xf32> to vector<1x384xf32>
    %39 = vector.extract_strided_slice %28 {offsets = [8, 0], sizes = [8, 384], strides = [1, 1]} : vector<16x384xf32> to vector<8x384xf32>
    %cst_11 = arith.constant 0.000000e+00 : f32
    %40 = vector.shape_cast %31 : vector<8x1xi1> to vector<8x1xi1>
    %41 = vector.broadcast %40 : vector<8x1xi1> to vector<8x384xi1>
    %42 = vector.broadcast %cst_11 : f32 to vector<8x384xf32>
    %43 = arith.select %41, %39, %42 : vector<8x384xi1>, vector<8x384xf32>
    %cst_12 = arith.constant dense<0xFF800000> : vector<384xf32>
    %44 = vector.multi_reduction <maximumf>, %43, %cst_12 [0] : vector<8x384xf32> to vector<384xf32>
    %45 = vector.shape_cast %44 : vector<384xf32> to vector<1x384xf32>
    %46 = tpu.concatenate %38, %45 in 0 : vector<1x384xf32>, vector<1x384xf32> -> vector<2x384xf32>
    %47 = vector.extract_strided_slice %11 {offsets = [0, 1152], sizes = [16, 384], strides = [1, 1]} : vector<16x4608xf32> to vector<16x384xf32>
    %48 = vector.extract_strided_slice %11 {offsets = [0, 1536], sizes = [16, 384], strides = [1, 1]} : vector<16x4608xf32> to vector<16x384xf32>
    %49 = vector.extract_strided_slice %48 {offsets = [1, 0], sizes = [15, 384], strides = [1, 1]} : vector<16x384xf32> to vector<15x384xf32>
    %50 = vector.extract_strided_slice %48 {offsets = [0, 0], sizes = [1, 384], strides = [1, 1]} : vector<16x384xf32> to vector<1x384xf32>
    %51 = tpu.concatenate %49, %50 in 0 : vector<15x384xf32>, vector<1x384xf32> -> vector<16x384xf32>
    %52 = arith.addf %47, %51 : vector<16x384xf32>
    %53 = vector.extract_strided_slice %11 {offsets = [0, 1920], sizes = [16, 384], strides = [1, 1]} : vector<16x4608xf32> to vector<16x384xf32>
    %54 = vector.extract_strided_slice %53 {offsets = [2, 0], sizes = [14, 384], strides = [1, 1]} : vector<16x384xf32> to vector<14x384xf32>
    %55 = vector.extract_strided_slice %53 {offsets = [0, 0], sizes = [2, 384], strides = [1, 1]} : vector<16x384xf32> to vector<2x384xf32>
    %56 = tpu.concatenate %54, %55 in 0 : vector<14x384xf32>, vector<2x384xf32> -> vector<16x384xf32>
    %57 = arith.addf %52, %56 : vector<16x384xf32>
    %58 = vector.extract_strided_slice %11 {offsets = [0, 2304], sizes = [16, 384], strides = [1, 1]} : vector<16x4608xf32> to vector<16x384xf32>
    %59 = vector.extract_strided_slice %58 {offsets = [3, 0], sizes = [13, 384], strides = [1, 1]} : vector<16x384xf32> to vector<13x384xf32>
    %60 = vector.extract_strided_slice %58 {offsets = [0, 0], sizes = [3, 384], strides = [1, 1]} : vector<16x384xf32> to vector<3x384xf32>
    %61 = tpu.concatenate %59, %60 in 0 : vector<13x384xf32>, vector<3x384xf32> -> vector<16x384xf32>
    %62 = arith.addf %57, %61 : vector<16x384xf32>
    %63 = vector.extract_strided_slice %12 {offsets = [1, 0], sizes = [1, 384], strides = [1, 1]} : vector<3x384xf32> to vector<1x384xf32>
    %64 = vector.broadcast %63 : vector<1x384xf32> to vector<16x384xf32>
    %65 = arith.addf %62, %64 : vector<16x384xf32>
    %cst_13 = arith.constant 0.000000e+00 : f32
    %66 = vector.broadcast %cst_13 : f32 to vector<16x384xf32>
    %67 = arith.maximumf %65, %66 : vector<16x384xf32>
    %68 = tpu.iota {dimensions = array<i32: 0>} : vector<8x1xi32>
    %c5_i32 = arith.constant 5 : i32
    %69 = vector.broadcast %c5_i32 : i32 to vector<8x1xi32>
    %70 = arith.cmpi slt, %68, %69 : vector<8x1xi32>
    %71 = vector.extract_strided_slice %67 {offsets = [0, 0], sizes = [8, 384], strides = [1, 1]} : vector<16x384xf32> to vector<8x384xf32>
    %cst_14 = arith.constant 0.000000e+00 : f32
    %72 = vector.shape_cast %70 : vector<8x1xi1> to vector<8x1xi1>
    %73 = vector.broadcast %72 : vector<8x1xi1> to vector<8x384xi1>
    %74 = vector.broadcast %cst_14 : f32 to vector<8x384xf32>
    %75 = arith.select %73, %71, %74 : vector<8x384xi1>, vector<8x384xf32>
    %cst_15 = arith.constant dense<0xFF800000> : vector<384xf32>
    %76 = vector.multi_reduction <maximumf>, %75, %cst_15 [0] : vector<8x384xf32> to vector<384xf32>
    %77 = vector.shape_cast %76 : vector<384xf32> to vector<1x384xf32>
    %78 = vector.extract_strided_slice %67 {offsets = [8, 0], sizes = [8, 384], strides = [1, 1]} : vector<16x384xf32> to vector<8x384xf32>
    %cst_16 = arith.constant 0.000000e+00 : f32
    %79 = vector.shape_cast %70 : vector<8x1xi1> to vector<8x1xi1>
    %80 = vector.broadcast %79 : vector<8x1xi1> to vector<8x384xi1>
    %81 = vector.broadcast %cst_16 : f32 to vector<8x384xf32>
    %82 = arith.select %80, %78, %81 : vector<8x384xi1>, vector<8x384xf32>
    %cst_17 = arith.constant dense<0xFF800000> : vector<384xf32>
    %83 = vector.multi_reduction <maximumf>, %82, %cst_17 [0] : vector<8x384xf32> to vector<384xf32>
    %84 = vector.shape_cast %83 : vector<384xf32> to vector<1x384xf32>
    %85 = tpu.concatenate %77, %84 in 0 : vector<1x384xf32>, vector<1x384xf32> -> vector<2x384xf32>
    %86 = vector.extract_strided_slice %11 {offsets = [0, 2688], sizes = [16, 384], strides = [1, 1]} : vector<16x4608xf32> to vector<16x384xf32>
    %87 = vector.extract_strided_slice %11 {offsets = [0, 3072], sizes = [16, 384], strides = [1, 1]} : vector<16x4608xf32> to vector<16x384xf32>
    %88 = vector.extract_strided_slice %87 {offsets = [1, 0], sizes = [15, 384], strides = [1, 1]} : vector<16x384xf32> to vector<15x384xf32>
    %89 = vector.extract_strided_slice %87 {offsets = [0, 0], sizes = [1, 384], strides = [1, 1]} : vector<16x384xf32> to vector<1x384xf32>
    %90 = tpu.concatenate %88, %89 in 0 : vector<15x384xf32>, vector<1x384xf32> -> vector<16x384xf32>
    %91 = arith.addf %86, %90 : vector<16x384xf32>
    %92 = vector.extract_strided_slice %11 {offsets = [0, 3456], sizes = [16, 384], strides = [1, 1]} : vector<16x4608xf32> to vector<16x384xf32>
    %93 = vector.extract_strided_slice %92 {offsets = [2, 0], sizes = [14, 384], strides = [1, 1]} : vector<16x384xf32> to vector<14x384xf32>
    %94 = vector.extract_strided_slice %92 {offsets = [0, 0], sizes = [2, 384], strides = [1, 1]} : vector<16x384xf32> to vector<2x384xf32>
    %95 = tpu.concatenate %93, %94 in 0 : vector<14x384xf32>, vector<2x384xf32> -> vector<16x384xf32>
    %96 = arith.addf %91, %95 : vector<16x384xf32>
    %97 = vector.extract_strided_slice %11 {offsets = [0, 3840], sizes = [16, 384], strides = [1, 1]} : vector<16x4608xf32> to vector<16x384xf32>
    %98 = vector.extract_strided_slice %97 {offsets = [3, 0], sizes = [13, 384], strides = [1, 1]} : vector<16x384xf32> to vector<13x384xf32>
    %99 = vector.extract_strided_slice %97 {offsets = [0, 0], sizes = [3, 384], strides = [1, 1]} : vector<16x384xf32> to vector<3x384xf32>
    %100 = tpu.concatenate %98, %99 in 0 : vector<13x384xf32>, vector<3x384xf32> -> vector<16x384xf32>
    %101 = arith.addf %96, %100 : vector<16x384xf32>
    %102 = vector.extract_strided_slice %11 {offsets = [0, 4224], sizes = [16, 384], strides = [1, 1]} : vector<16x4608xf32> to vector<16x384xf32>
    %103 = vector.extract_strided_slice %102 {offsets = [4, 0], sizes = [12, 384], strides = [1, 1]} : vector<16x384xf32> to vector<12x384xf32>
    %104 = vector.extract_strided_slice %102 {offsets = [0, 0], sizes = [4, 384], strides = [1, 1]} : vector<16x384xf32> to vector<4x384xf32>
    %105 = tpu.concatenate %103, %104 in 0 : vector<12x384xf32>, vector<4x384xf32> -> vector<16x384xf32>
    %106 = arith.addf %101, %105 : vector<16x384xf32>
    %107 = vector.extract_strided_slice %12 {offsets = [2, 0], sizes = [1, 384], strides = [1, 1]} : vector<3x384xf32> to vector<1x384xf32>
    %108 = vector.broadcast %107 : vector<1x384xf32> to vector<16x384xf32>
    %109 = arith.addf %106, %108 : vector<16x384xf32>
    %cst_18 = arith.constant 0.000000e+00 : f32
    %110 = vector.broadcast %cst_18 : f32 to vector<16x384xf32>
    %111 = arith.maximumf %109, %110 : vector<16x384xf32>
    %112 = tpu.iota {dimensions = array<i32: 0>} : vector<8x1xi32>
    %c4_i32 = arith.constant 4 : i32
    %113 = vector.broadcast %c4_i32 : i32 to vector<8x1xi32>
    %114 = arith.cmpi slt, %112, %113 : vector<8x1xi32>
    %115 = vector.extract_strided_slice %111 {offsets = [0, 0], sizes = [8, 384], strides = [1, 1]} : vector<16x384xf32> to vector<8x384xf32>
    %cst_19 = arith.constant 0.000000e+00 : f32
    %116 = vector.shape_cast %114 : vector<8x1xi1> to vector<8x1xi1>
    %117 = vector.broadcast %116 : vector<8x1xi1> to vector<8x384xi1>
    %118 = vector.broadcast %cst_19 : f32 to vector<8x384xf32>
    %119 = arith.select %117, %115, %118 : vector<8x384xi1>, vector<8x384xf32>
    %cst_20 = arith.constant dense<0xFF800000> : vector<384xf32>
    %120 = vector.multi_reduction <maximumf>, %119, %cst_20 [0] : vector<8x384xf32> to vector<384xf32>
    %121 = vector.shape_cast %120 : vector<384xf32> to vector<1x384xf32>
    %122 = vector.extract_strided_slice %111 {offsets = [8, 0], sizes = [8, 384], strides = [1, 1]} : vector<16x384xf32> to vector<8x384xf32>
    %cst_21 = arith.constant 0.000000e+00 : f32
    %123 = vector.shape_cast %114 : vector<8x1xi1> to vector<8x1xi1>
    %124 = vector.broadcast %123 : vector<8x1xi1> to vector<8x384xi1>
    %125 = vector.broadcast %cst_21 : f32 to vector<8x384xf32>
    %126 = arith.select %124, %122, %125 : vector<8x384xi1>, vector<8x384xf32>
    %cst_22 = arith.constant dense<0xFF800000> : vector<384xf32>
    %127 = vector.multi_reduction <maximumf>, %126, %cst_22 [0] : vector<8x384xf32> to vector<384xf32>
    %128 = vector.shape_cast %127 : vector<384xf32> to vector<1x384xf32>
    %129 = tpu.concatenate %121, %128 in 0 : vector<1x384xf32>, vector<1x384xf32> -> vector<2x384xf32>
    %130 = tpu.concatenate %46, %85, %129 in 0 : vector<2x384xf32>, vector<2x384xf32>, vector<2x384xf32> -> vector<6x384xf32>
    %131 = arith.truncf %130 : vector<6x384xf32> to vector<6x384xbf16>
    %c0_23 = arith.constant 0 : index
    %c0_24 = arith.constant 0 : index
    %132 = vector.load %arg5[%c0_23, %c0_24] : memref<384x512xbf16, #tpu.memory_space<vmem>>, vector<384x512xbf16>
    %cst_25 = arith.constant dense<0.000000e+00> : vector<6x512xf32>
    %133 = tpu.matmul %131, %132, %cst_25 {dimension_numbers = #tpu.dot_dimension_numbers<[1], [0], [0], [1], [0, 0, 1, 1], [], []>} : vector<6x384xbf16>, vector<384x512xbf16>, vector<6x512xf32> -> vector<6x512xf32>
    %c0_26 = arith.constant 0 : index
    %c0_27 = arith.constant 0 : index
    %134 = vector.load %arg7[%c0_26, %c0_27] : memref<1x512xf32, #tpu.memory_space<vmem>>, vector<1x512xf32>
    %135 = vector.broadcast %134 : vector<1x512xf32> to vector<6x512xf32>
    %136 = arith.addf %133, %135 : vector<6x512xf32>
    %cst_28 = arith.constant 0.000000e+00 : f32
    %137 = vector.broadcast %cst_28 : f32 to vector<2x128xf32>
    %cst_29 = arith.constant 0.000000e+00 : f32
    %138 = vector.broadcast %cst_29 : f32 to vector<2x128xf32>
    %139 = vector.extract_strided_slice %136 {offsets = [0, 0], sizes = [2, 512], strides = [1, 1]} : vector<6x512xf32> to vector<2x512xf32>
    %140 = arith.truncf %137 : vector<2x128xf32> to vector<2x128xbf16>
    %c0_30 = arith.constant 0 : index
    %c0_31 = arith.constant 0 : index
    %141 = vector.load %arg6[%c0_30, %c0_31] : memref<128x512xbf16, #tpu.memory_space<vmem>>, vector<128x512xbf16>
    %cst_32 = arith.constant dense<0.000000e+00> : vector<2x512xf32>
    %142 = tpu.matmul %140, %141, %cst_32 {dimension_numbers = #tpu.dot_dimension_numbers<[1], [0], [0], [1], [0, 0, 1, 1], [], []>} : vector<2x128xbf16>, vector<128x512xbf16>, vector<2x512xf32> -> vector<2x512xf32>
    %143 = arith.addf %139, %142 : vector<2x512xf32>
    %144 = vector.extract_strided_slice %143 {offsets = [0, 0], sizes = [2, 128], strides = [1, 1]} : vector<2x512xf32> to vector<2x128xf32>
    %145 = arith.negf %144 : vector<2x128xf32>
    %146 = math.exp %145 : vector<2x128xf32>
    %cst_33 = arith.constant 1.000000e+00 : f32
    %147 = vector.broadcast %cst_33 : f32 to vector<2x128xf32>
    %148 = arith.addf %147, %146 : vector<2x128xf32>
    %149 = arith.divf %147, %148 : vector<2x128xf32>
    %150 = vector.extract_strided_slice %143 {offsets = [0, 128], sizes = [2, 128], strides = [1, 1]} : vector<2x512xf32> to vector<2x128xf32>
    %151 = arith.negf %150 : vector<2x128xf32>
    %152 = math.exp %151 : vector<2x128xf32>
    %cst_34 = arith.constant 1.000000e+00 : f32
    %153 = vector.broadcast %cst_34 : f32 to vector<2x128xf32>
    %154 = arith.addf %153, %152 : vector<2x128xf32>
    %155 = arith.divf %153, %154 : vector<2x128xf32>
    %156 = vector.extract_strided_slice %143 {offsets = [0, 256], sizes = [2, 128], strides = [1, 1]} : vector<2x512xf32> to vector<2x128xf32>
    %157 = math.tanh %156 : vector<2x128xf32>
    %158 = vector.extract_strided_slice %143 {offsets = [0, 384], sizes = [2, 128], strides = [1, 1]} : vector<2x512xf32> to vector<2x128xf32>
    %159 = arith.negf %158 : vector<2x128xf32>
    %160 = math.exp %159 : vector<2x128xf32>
    %cst_35 = arith.constant 1.000000e+00 : f32
    %161 = vector.broadcast %cst_35 : f32 to vector<2x128xf32>
    %162 = arith.addf %161, %160 : vector<2x128xf32>
    %163 = arith.divf %161, %162 : vector<2x128xf32>
    %164 = arith.mulf %155, %138 : vector<2x128xf32>
    %165 = arith.mulf %149, %157 : vector<2x128xf32>
    %166 = arith.addf %164, %165 : vector<2x128xf32>
    %167 = math.tanh %166 : vector<2x128xf32>
    %168 = arith.mulf %163, %167 : vector<2x128xf32>
    %169 = vector.extract_strided_slice %136 {offsets = [2, 0], sizes = [2, 512], strides = [1, 1]} : vector<6x512xf32> to vector<2x512xf32>
    %170 = arith.truncf %168 : vector<2x128xf32> to vector<2x128xbf16>
    %c0_36 = arith.constant 0 : index
    %c0_37 = arith.constant 0 : index
    %171 = vector.load %arg6[%c0_36, %c0_37] : memref<128x512xbf16, #tpu.memory_space<vmem>>, vector<128x512xbf16>
    %cst_38 = arith.constant dense<0.000000e+00> : vector<2x512xf32>
    %172 = tpu.matmul %170, %171, %cst_38 {dimension_numbers = #tpu.dot_dimension_numbers<[1], [0], [0], [1], [0, 0, 1, 1], [], []>} : vector<2x128xbf16>, vector<128x512xbf16>, vector<2x512xf32> -> vector<2x512xf32>
    %173 = arith.addf %169, %172 : vector<2x512xf32>
    %174 = vector.extract_strided_slice %173 {offsets = [0, 0], sizes = [2, 128], strides = [1, 1]} : vector<2x512xf32> to vector<2x128xf32>
    %175 = arith.negf %174 : vector<2x128xf32>
    %176 = math.exp %175 : vector<2x128xf32>
    %cst_39 = arith.constant 1.000000e+00 : f32
    %177 = vector.broadcast %cst_39 : f32 to vector<2x128xf32>
    %178 = arith.addf %177, %176 : vector<2x128xf32>
    %179 = arith.divf %177, %178 : vector<2x128xf32>
    %180 = vector.extract_strided_slice %173 {offsets = [0, 128], sizes = [2, 128], strides = [1, 1]} : vector<2x512xf32> to vector<2x128xf32>
    %181 = arith.negf %180 : vector<2x128xf32>
    %182 = math.exp %181 : vector<2x128xf32>
    %cst_40 = arith.constant 1.000000e+00 : f32
    %183 = vector.broadcast %cst_40 : f32 to vector<2x128xf32>
    %184 = arith.addf %183, %182 : vector<2x128xf32>
    %185 = arith.divf %183, %184 : vector<2x128xf32>
    %186 = vector.extract_strided_slice %173 {offsets = [0, 256], sizes = [2, 128], strides = [1, 1]} : vector<2x512xf32> to vector<2x128xf32>
    %187 = math.tanh %186 : vector<2x128xf32>
    %188 = vector.extract_strided_slice %173 {offsets = [0, 384], sizes = [2, 128], strides = [1, 1]} : vector<2x512xf32> to vector<2x128xf32>
    %189 = arith.negf %188 : vector<2x128xf32>
    %190 = math.exp %189 : vector<2x128xf32>
    %cst_41 = arith.constant 1.000000e+00 : f32
    %191 = vector.broadcast %cst_41 : f32 to vector<2x128xf32>
    %192 = arith.addf %191, %190 : vector<2x128xf32>
    %193 = arith.divf %191, %192 : vector<2x128xf32>
    %194 = arith.mulf %185, %166 : vector<2x128xf32>
    %195 = arith.mulf %179, %187 : vector<2x128xf32>
    %196 = arith.addf %194, %195 : vector<2x128xf32>
    %197 = math.tanh %196 : vector<2x128xf32>
    %198 = arith.mulf %193, %197 : vector<2x128xf32>
    %199 = vector.extract_strided_slice %136 {offsets = [4, 0], sizes = [2, 512], strides = [1, 1]} : vector<6x512xf32> to vector<2x512xf32>
    %200 = arith.truncf %198 : vector<2x128xf32> to vector<2x128xbf16>
    %c0_42 = arith.constant 0 : index
    %c0_43 = arith.constant 0 : index
    %201 = vector.load %arg6[%c0_42, %c0_43] : memref<128x512xbf16, #tpu.memory_space<vmem>>, vector<128x512xbf16>
    %cst_44 = arith.constant dense<0.000000e+00> : vector<2x512xf32>
    %202 = tpu.matmul %200, %201, %cst_44 {dimension_numbers = #tpu.dot_dimension_numbers<[1], [0], [0], [1], [0, 0, 1, 1], [], []>} : vector<2x128xbf16>, vector<128x512xbf16>, vector<2x512xf32> -> vector<2x512xf32>
    %203 = arith.addf %199, %202 : vector<2x512xf32>
    %204 = vector.extract_strided_slice %203 {offsets = [0, 0], sizes = [2, 128], strides = [1, 1]} : vector<2x512xf32> to vector<2x128xf32>
    %205 = arith.negf %204 : vector<2x128xf32>
    %206 = math.exp %205 : vector<2x128xf32>
    %cst_45 = arith.constant 1.000000e+00 : f32
    %207 = vector.broadcast %cst_45 : f32 to vector<2x128xf32>
    %208 = arith.addf %207, %206 : vector<2x128xf32>
    %209 = arith.divf %207, %208 : vector<2x128xf32>
    %210 = vector.extract_strided_slice %203 {offsets = [0, 128], sizes = [2, 128], strides = [1, 1]} : vector<2x512xf32> to vector<2x128xf32>
    %211 = arith.negf %210 : vector<2x128xf32>
    %212 = math.exp %211 : vector<2x128xf32>
    %cst_46 = arith.constant 1.000000e+00 : f32
    %213 = vector.broadcast %cst_46 : f32 to vector<2x128xf32>
    %214 = arith.addf %213, %212 : vector<2x128xf32>
    %215 = arith.divf %213, %214 : vector<2x128xf32>
    %216 = vector.extract_strided_slice %203 {offsets = [0, 256], sizes = [2, 128], strides = [1, 1]} : vector<2x512xf32> to vector<2x128xf32>
    %217 = math.tanh %216 : vector<2x128xf32>
    %218 = vector.extract_strided_slice %203 {offsets = [0, 384], sizes = [2, 128], strides = [1, 1]} : vector<2x512xf32> to vector<2x128xf32>
    %219 = arith.negf %218 : vector<2x128xf32>
    %220 = math.exp %219 : vector<2x128xf32>
    %cst_47 = arith.constant 1.000000e+00 : f32
    %221 = vector.broadcast %cst_47 : f32 to vector<2x128xf32>
    %222 = arith.addf %221, %220 : vector<2x128xf32>
    %223 = arith.divf %221, %222 : vector<2x128xf32>
    %224 = arith.mulf %215, %196 : vector<2x128xf32>
    %225 = arith.mulf %209, %217 : vector<2x128xf32>
    %226 = arith.addf %224, %225 : vector<2x128xf32>
    %227 = math.tanh %226 : vector<2x128xf32>
    %228 = arith.mulf %223, %227 : vector<2x128xf32>
    %229 = tpu.concatenate %168, %198, %228 in 0 : vector<2x128xf32>, vector<2x128xf32>, vector<2x128xf32> -> vector<6x128xf32>
    %230 = arith.truncf %229 : vector<6x128xf32> to vector<6x128xbf16>
    %c0_48 = arith.constant 0 : index
    %c0_49 = arith.constant 0 : index
    %231 = vector.load %arg8[%c0_48, %c0_49] : memref<128x128xbf16, #tpu.memory_space<vmem>>, vector<128x128xbf16>
    %cst_50 = arith.constant dense<0.000000e+00> : vector<6x128xf32>
    %232 = tpu.matmul %230, %231, %cst_50 {dimension_numbers = #tpu.dot_dimension_numbers<[1], [0], [0], [1], [0, 0, 1, 1], [], []>} : vector<6x128xbf16>, vector<128x128xbf16>, vector<6x128xf32> -> vector<6x128xf32>
    %c0_51 = arith.constant 0 : index
    %c0_52 = arith.constant 0 : index
    %233 = vector.load %arg9[%c0_51, %c0_52] : memref<1x128xf32, #tpu.memory_space<vmem>>, vector<1x128xf32>
    %234 = vector.broadcast %233 : vector<1x128xf32> to vector<6x128xf32>
    %235 = arith.addf %232, %234 : vector<6x128xf32>
    %cst_53 = arith.constant 0.000000e+00 : f32
    %236 = vector.broadcast %cst_53 : f32 to vector<6x128xf32>
    %237 = arith.maximumf %235, %236 : vector<6x128xf32>
    %c0_54 = arith.constant 0 : index
    %c0_55 = arith.constant 0 : index
    %238 = vector.load %arg10[%c0_54, %c0_55] : memref<1x128xf32, #tpu.memory_space<vmem>>, vector<1x128xf32>
    %239 = vector.broadcast %238 : vector<1x128xf32> to vector<6x128xf32>
    %240 = arith.mulf %237, %239 : vector<6x128xf32>
    %cst_56 = arith.constant dense<0.000000e+00> : vector<6xf32>
    %241 = vector.multi_reduction <add>, %240, %cst_56 [1] : vector<6x128xf32> to vector<6xf32>
    %242 = vector.shape_cast %241 : vector<6xf32> to vector<6x1xf32>
    %c0_57 = arith.constant 0 : index
    %c0_58 = arith.constant 0 : index
    %243 = vector.load %arg11[%c0_57, %c0_58] : memref<1x1xf32, #tpu.memory_space<vmem>>, vector<1x1xf32>
    %244 = vector.broadcast %243 : vector<1x1xf32> to vector<6x1xf32>
    %245 = arith.addf %242, %244 : vector<6x1xf32>
    %246 = vector.extract_strided_slice %245 {offsets = [0, 0], sizes = [2, 1], strides = [1, 1]} : vector<6x1xf32> to vector<2x1xf32>
    %247 = vector.extract_strided_slice %245 {offsets = [2, 0], sizes = [2, 1], strides = [1, 1]} : vector<6x1xf32> to vector<2x1xf32>
    %248 = vector.extract_strided_slice %245 {offsets = [4, 0], sizes = [2, 1], strides = [1, 1]} : vector<6x1xf32> to vector<2x1xf32>
    %249 = arith.maximumf %246, %247 : vector<2x1xf32>
    %250 = arith.maximumf %249, %248 : vector<2x1xf32>
    %251 = arith.subf %246, %250 : vector<2x1xf32>
    %252 = math.exp %251 : vector<2x1xf32>
    %253 = arith.subf %247, %250 : vector<2x1xf32>
    %254 = math.exp %253 : vector<2x1xf32>
    %255 = arith.subf %248, %250 : vector<2x1xf32>
    %256 = math.exp %255 : vector<2x1xf32>
    %257 = arith.addf %252, %254 : vector<2x1xf32>
    %258 = arith.addf %257, %256 : vector<2x1xf32>
    %259 = tpu.reciprocal %258 {approx = true} : vector<2x1xf32> -> vector<2x1xf32>
    %260 = arith.mulf %252, %259 : vector<2x1xf32>
    %261 = vector.broadcast %260 : vector<2x1xf32> to vector<2x128xf32>
    %262 = arith.mulf %168, %261 : vector<2x128xf32>
    %263 = arith.mulf %254, %259 : vector<2x1xf32>
    %264 = vector.broadcast %263 : vector<2x1xf32> to vector<2x128xf32>
    %265 = arith.mulf %198, %264 : vector<2x128xf32>
    %266 = arith.mulf %256, %259 : vector<2x1xf32>
    %267 = vector.broadcast %266 : vector<2x1xf32> to vector<2x128xf32>
    %268 = arith.mulf %228, %267 : vector<2x128xf32>
    %269 = arith.addf %262, %265 : vector<2x128xf32>
    %270 = arith.addf %269, %268 : vector<2x128xf32>
    %271 = arith.truncf %270 : vector<2x128xf32> to vector<2x128xbf16>
    %c0_59 = arith.constant 0 : index
    %c0_60 = arith.constant 0 : index
    %272 = vector.load %arg12[%c0_59, %c0_60] : memref<128x128xbf16, #tpu.memory_space<vmem>>, vector<128x128xbf16>
    %cst_61 = arith.constant dense<0.000000e+00> : vector<2x128xf32>
    %273 = tpu.matmul %271, %272, %cst_61 {dimension_numbers = #tpu.dot_dimension_numbers<[1], [0], [0], [1], [0, 0, 1, 1], [], []>} : vector<2x128xbf16>, vector<128x128xbf16>, vector<2x128xf32> -> vector<2x128xf32>
    %c0_62 = arith.constant 0 : index
    %c0_63 = arith.constant 0 : index
    %274 = vector.load %arg13[%c0_62, %c0_63] : memref<1x128xf32, #tpu.memory_space<vmem>>, vector<1x128xf32>
    %275 = vector.broadcast %274 : vector<1x128xf32> to vector<2x128xf32>
    %276 = arith.addf %273, %275 : vector<2x128xf32>
    %c0_64 = arith.constant 0 : index
    %c0_65 = arith.constant 0 : index
    %277 = vector.load %arg14[%c0_64, %c0_65] : memref<2x128xf32, #tpu.memory_space<vmem>>, vector<2x128xf32>
    tpu.vector_store %arg14[%c0_64, %c0_65], %276 {strides = array<i32>} : memref<2x128xf32, #tpu.memory_space<vmem>>, vector<2x128xf32>,
    %c0_66 = arith.constant 0 : index
    %c0_67 = arith.constant 0 : index
    %278 = vector.load %arg15[%c0_66, %c0_67] : memref<2x128xf32, #tpu.memory_space<vmem>>, vector<2x128xf32>
    tpu.vector_store %arg15[%c0_66, %c0_67], %270 {strides = array<i32>} : memref<2x128xf32, #tpu.memory_space<vmem>>, vector<2x128xf32>,
    return
  }
  func.func @transform_0(%arg0: i32) -> (i32, i32) {
    %c0_i32 = arith.constant 0 : i32
    %c0_i32_0 = arith.constant 0 : i32
    %c0_i32_1 = arith.constant 0 : i32
    return %c0_i32, %c0_i32_0 : i32, i32
  }
  func.func @transform_1(%arg0: i32) -> (i32, i32) {
    %c0_i32 = arith.constant 0 : i32
    %c0_i32_0 = arith.constant 0 : i32
    %c0_i32_1 = arith.constant 0 : i32
    return %c0_i32, %c0_i32_0 : i32, i32
  }
  func.func @transform_2(%arg0: i32) -> (i32, i32) {
    %c0_i32 = arith.constant 0 : i32
    %c0_i32_0 = arith.constant 0 : i32
    %c0_i32_1 = arith.constant 0 : i32
    return %c0_i32, %c0_i32_0 : i32, i32
  }
  func.func @transform_3(%arg0: i32) -> (i32, i32) {
    %c0_i32 = arith.constant 0 : i32
    %c0_i32_0 = arith.constant 0 : i32
    %c0_i32_1 = arith.constant 0 : i32
    return %c0_i32, %c0_i32_0 : i32, i32
  }
  func.func @transform_4(%arg0: i32) -> (i32, i32) {
    %c0_i32 = arith.constant 0 : i32
    %c0_i32_0 = arith.constant 0 : i32
    %c0_i32_1 = arith.constant 0 : i32
    return %c0_i32, %c0_i32_0 : i32, i32
  }
  func.func @transform_5(%arg0: i32) -> (i32, i32) {
    %c0_i32 = arith.constant 0 : i32
    %c0_i32_0 = arith.constant 0 : i32
    %c0_i32_1 = arith.constant 0 : i32
    return %c0_i32, %c0_i32_0 : i32, i32
  }
  func.func @transform_6(%arg0: i32) -> (i32, i32) {
    %c0_i32 = arith.constant 0 : i32
    %c0_i32_0 = arith.constant 0 : i32
    %c0_i32_1 = arith.constant 0 : i32
    return %c0_i32, %c0_i32_0 : i32, i32
  }
  func.func @transform_7(%arg0: i32) -> (i32, i32) {
    %c0_i32 = arith.constant 0 : i32
    %c0_i32_0 = arith.constant 0 : i32
    %c0_i32_1 = arith.constant 0 : i32
    return %c0_i32, %c0_i32_0 : i32, i32
  }
  func.func @transform_8(%arg0: i32) -> (i32, i32) {
    %c0_i32 = arith.constant 0 : i32
    %c0_i32_0 = arith.constant 0 : i32
    %c0_i32_1 = arith.constant 0 : i32
    return %c0_i32, %c0_i32_0 : i32, i32
  }
  func.func @transform_9(%arg0: i32) -> (i32, i32) {
    %c0_i32 = arith.constant 0 : i32
    %c0_i32_0 = arith.constant 0 : i32
    %c0_i32_1 = arith.constant 0 : i32
    return %c0_i32, %c0_i32_0 : i32, i32
  }
  func.func @transform_10(%arg0: i32) -> (i32, i32) {
    %c0_i32 = arith.constant 0 : i32
    %c0_i32_0 = arith.constant 0 : i32
    %c0_i32_1 = arith.constant 0 : i32
    return %c0_i32, %c0_i32_0 : i32, i32
  }
  func.func @transform_11(%arg0: i32) -> (i32, i32) {
    %c0_i32 = arith.constant 0 : i32
    %c0_i32_0 = arith.constant 0 : i32
    %c0_i32_1 = arith.constant 0 : i32
    return %c0_i32, %c0_i32_0 : i32, i32
  }
  func.func @transform_12(%arg0: i32) -> (i32, i32) {
    %c0_i32 = arith.constant 0 : i32
    %c0_i32_0 = arith.constant 0 : i32
    %c0_i32_1 = arith.constant 0 : i32
    return %c0_i32, %c0_i32_0 : i32, i32
  }
  func.func @transform_13(%arg0: i32) -> (i32, i32) {
    %c0_i32 = arith.constant 0 : i32
    %c0_i32_0 = arith.constant 0 : i32
    %c0_i32_1 = arith.constant 0 : i32
    return %c0_i32, %c0_i32_0 : i32, i32
  }
  func.func @transform_14(%arg0: i32) -> (i32, i32) {
    %c0_i32 = arith.constant 0 : i32
    %c0_i32_0 = arith.constant 0 : i32
    %c0_i32_1 = arith.constant 0 : i32
    return %c0_i32, %c0_i32_0 : i32, i32
  }
}

</mosaic_0001>

<bundles_post_ra>
// kernel: clstm_forward_pallas.1
= control target key start
LH: loop header
LB: loop body
LE: loop exit
PB: predicated region body
PF: predicated region fallthrough
CT: control target
= control target key end

     0   :  { %s13484_s0 = inlined_call_operand.vmem [shape: s32[16,1], index: 0, kind: input, shape index: {}]   ;;  %s13485_s1 = inlined_call_operand.hbm [shape: bf16[128,384], index: 1, kind: input, shape index: {}]   ;;  %s13486_s2 = inlined_call_operand.hbm [shape: bf16[384,4608], index: 2, kind: input, shape index: {}]   ;;  %s13487_s3 = inlined_call_operand.hbm [shape: f32[3,384], index: 3, kind: input, shape index: {}]   ;;  %s13488_s4 = inlined_call_operand.hbm [shape: bf16[384,512], index: 4, kind: input, shape index: {}]   ;;  %s13489_s5 = inlined_call_operand.hbm [shape: bf16[128,512], index: 5, kind: input, shape index: {}]   ;;  %s13490_s6 = inlined_call_operand.hbm [shape: f32[1,512], index: 6, kind: input, shape index: {}]   ;;  %s13491_s7 = inlined_call_operand.hbm [shape: bf16[128,128], index: 7, kind: input, shape index: {}]   ;;  %s13492_s8 = inlined_call_operand.hbm [shape: f32[1,128], index: 8, kind: input, shape index: {}]   ;;  %s13493_s9 = inlined_call_operand.hbm [shape: f32[1,128], index: 9, kind: input, shape index: {}]   ;;  %s13494_s10 = inlined_call_operand.<no memory space> [shape: f32[1,1], index: 10, kind: input, shape index: {}]   ;;  %s13495_s11 = inlined_call_operand.hbm [shape: bf16[128,128], index: 11, kind: input, shape index: {}]   ;;  %s13496_s12 = inlined_call_operand.hbm [shape: f32[1,128], index: 12, kind: input, shape index: {}]   ;;  %s13497_s13 = inlined_call_operand.hbm [shape: f32[2,128], index: 13, kind: output, shape index: {0}]   ;;  %s13498_s14 = inlined_call_operand.hbm [shape: f32[2,128], index: 14, kind: output, shape index: {1}]  }
   0x1   :  { %v20_v0 = vstv %s13494_s10 }
   0x2   :  { %21 = vst [vmem:[#allocation2] sm:$0x1] %v20_v0 }
   0x3   :  { %22 = vsyncpa [#allocation4], 0 }
   0x4   :  { %23 = vsyncpa [#allocation7], 0 }
   0x5   :  { %24 = vsyncpa [#allocation10], 0 }
   0x6   :  { %25 = vsyncpa [#allocation13], 0 }
   0x7   :  { %26 = vsyncpa [#allocation16], 0 }
   0x8   :  { %27 = vsyncpa [#allocation19], 0 }
   0x9   :  { %28 = vsyncpa [#allocation5], 0 }
   0xa   :  { %29 = vsyncpa [#allocation23], 0  ;;  %s12594_s15 = smov [#allocation6]   ;;  %s12292_s19 = scalar_lea.hbm %s13486_s2, 110592 }
   0xb   :  { %s49_s16 = sshll.u32 %s12594_s15, 4  ;;  %p12293_p0 = scmp.ne.s32.totalorder %s13486_s2, %s12292_s19  ;;  %s50_s16 = int_to_ptr.vmem [resolvable:$true] %s49_s16 }
   0xc   :  { %p12296_p1 = scmp.lt.u32.totalorder %s12292_s19, %s13486_s2 }
   0xe   :  { %p12298_p2 = pnand %p12296_p1, %p12293_p0 }
  0x10   :  { %12301 = shalt.err (!%p12298_p2)
}
  0x11   :  { %s12302_s23 = scalar_lea.vmem %s50_s16, 110592  ;;  %p12307_p4 = scmp.lt.s32.totalorder %s50_s16, %s50_s16 }
  0x12   :  { %p12303_p3 = scmp.ne.s32.totalorder %s50_s16, %s12302_s23  ;;  %p12308_p5 = scmp.lt.s32.totalorder %s12302_s23, %s12302_s23 }
  0x14   :  { %p12309_p6 = por %p12308_p5, %p12307_p4 }
  0x16   :  { %p12310_p7 = pnand %p12309_p6, %p12303_p3 }
  0x18   :  { %12313 = shalt.err (!%p12310_p7)
}
  0x19   :  { %s12595_s24 = smov 2304   ;;  %s12596_s25 = smov 144  }
  0x1a   :  { %55 = dma.hbm_to_vmem [thread:$0]  %s13486_s2, 110592, %s50_s16, [#allocation7], %s12595_s24, %s12595_s24, %s12596_s25  }
  0x1b   :  { %s12597_s28 = smov [#allocation9]   ;;  %s12314_s17 = scalar_lea.hbm %s13488_s4, 12288 }
  0x1c   :  { %s71_s29 = sshll.u32 %s12597_s28, 4  ;;  %p12315_p8 = scmp.ne.s32.totalorder %s13488_s4, %s12314_s17  ;;  %s72_s29 = int_to_ptr.vmem [resolvable:$true] %s71_s29 }
  0x1d   :  { %p12318_p9 = scmp.lt.u32.totalorder %s12314_s17, %s13488_s4 }
  0x1f   :  { %p12320_p10 = pnand %p12318_p9, %p12315_p8 }
  0x21   :  { %12323 = shalt.err (!%p12320_p10)
}
  0x22   :  { %s12324_s10 = scalar_lea.vmem %s72_s29, 12288  ;;  %p12329_p12 = scmp.lt.s32.totalorder %s72_s29, %s72_s29 }
  0x23   :  { %p12325_p11 = scmp.ne.s32.totalorder %s72_s29, %s12324_s10  ;;  %p12330_p13 = scmp.lt.s32.totalorder %s12324_s10, %s12324_s10 }
  0x25   :  { %p12331_p0 = por %p12330_p13, %p12329_p12 }
  0x27   :  { %p12332_p1 = pnand %p12331_p0, %p12325_p11 }
  0x29   :  { %12335 = shalt.err (!%p12332_p1)
}
  0x2a   :  { %s12598_s2 = smov 256   ;;  %s12599_s16 = smov 16  }
  0x2b   :  { %77 = dma.hbm_to_vmem [thread:$0]  %s13488_s4, 12288, %s72_s29, [#allocation10], %s12598_s2, %s12598_s2, %s12599_s16  }
  0x2c   :  { %s12600_s24 = smov [#allocation12]   ;;  %s12601_s26 = smov [#allocation15]  }
  0x2d   :  { %s96_s25 = sshll.u32 %s12600_s24, 4  ;;  %s118_s27 = sshll.u32 %s12601_s26, 4  ;;  %s97_s25 = int_to_ptr.vmem [resolvable:$true] %s96_s25  ;;  %s119_s27 = int_to_ptr.vmem [resolvable:$true] %s118_s27 }
  0x2e   :  { %s12336_s15 = scalar_lea.hbm %s13490_s6, 64 }
  0x2f   :  { %p12337_p2 = scmp.ne.s32.totalorder %s13490_s6, %s12336_s15  ;;  %p12340_p3 = scmp.lt.u32.totalorder %s12336_s15, %s13490_s6 }
  0x31   :  { %p12342_p4 = pnand %p12340_p3, %p12337_p2 }
  0x33   :  { %12345 = shalt.err (!%p12342_p4)
}
  0x34   :  { %s12346_s4 = scalar_lea.vmem %s97_s25, 64  ;;  %p12351_p6 = scmp.lt.s32.totalorder %s97_s25, %s97_s25 }
  0x35   :  { %p12347_p5 = scmp.ne.s32.totalorder %s97_s25, %s12346_s4  ;;  %p12352_p7 = scmp.lt.s32.totalorder %s12346_s4, %s12346_s4 }
  0x37   :  { %p12353_p8 = por %p12352_p7, %p12351_p6 }
  0x39   :  { %p12354_p9 = pnand %p12353_p8, %p12347_p5 }
  0x3b   :  { %12357 = shalt.err (!%p12354_p9)
}
  0x3c   :  { %99 = dma.hbm_to_vmem [thread:$0]  %s13490_s6, 64, %s97_s25, [#allocation13]  }
  0x3d   :  { %s12358_s23 = scalar_lea.hbm %s13492_s8, 16 }
  0x3e   :  { %p12359_p10 = scmp.ne.s32.totalorder %s13492_s8, %s12358_s23  ;;  %p12362_p11 = scmp.lt.u32.totalorder %s12358_s23, %s13492_s8 }
  0x40   :  { %p12364_p12 = pnand %p12362_p11, %p12359_p10 }
  0x42   :  { %12367 = shalt.err (!%p12364_p12)
}
  0x43   :  { %s12368_s15 = scalar_lea.vmem %s119_s27, 16  ;;  %s12372_s17 = scalar_lea.vmem %s119_s27, 32 }
  0x44   :  { %p12369_p13 = scmp.ne.s32.totalorder %s119_s27, %s12368_s15  ;;  %p12373_p0 = scmp.lt.s32.totalorder %s119_s27, %s119_s27 }
  0x45   :  { %p12374_p1 = scmp.lt.s32.totalorder %s12372_s17, %s12368_s15 }
  0x47   :  { %p12375_p2 = por %p12374_p1, %p12373_p0 }
  0x49   :  { %p12376_p3 = pnand %p12375_p2, %p12369_p13 }
  0x4b   :  { %12379 = shalt.err (!%p12376_p3)
}
  0x4c   :  { %121 = dma.hbm_to_vmem [thread:$0]  %s13492_s8, 16, %s119_s27, [#allocation16]  }
  0x4d   :  { %s12602_s18 = smov [#allocation18]   ;;  %s12603_s20 = smov [#allocation3]  }
  0x4e   :  { %s139_s19 = sshll.u32 %s12602_s18, 4  ;;  %s37_s4 = sshll.u32 %s12603_s20, 4  ;;  %s140_s19 = int_to_ptr.vmem [resolvable:$true] %s139_s19  ;;  %s12748_s4 = int_to_ptr.vmem [resolvable:$true] %s37_s4 }
  0x4f   :  { %s12380_s10 = scalar_lea.hbm %s13495_s11, 1024 }
  0x50   :  { %p12381_p4 = scmp.ne.s32.totalorder %s13495_s11, %s12380_s10  ;;  %p12384_p5 = scmp.lt.u32.totalorder %s12380_s10, %s13495_s11 }
  0x52   :  { %p12386_p6 = pnand %p12384_p5, %p12381_p4 }
  0x54   :  { %12389 = shalt.err (!%p12386_p6)
}
  0x55   :  { %s12390_s8 = scalar_lea.vmem %s140_s19, 1024  ;;  %p12395_p8 = scmp.lt.s32.totalorder %s140_s19, %s140_s19 }
  0x56   :  { %p12391_p7 = scmp.ne.s32.totalorder %s140_s19, %s12390_s8  ;;  %p12396_p9 = scmp.lt.s32.totalorder %s12390_s8, %s12390_s8 }
  0x58   :  { %p12397_p10 = por %p12396_p9, %p12395_p8 }
  0x5a   :  { %p12398_p11 = pnand %p12397_p10, %p12391_p7 }
  0x5c   :  { %12401 = shalt.err (!%p12398_p11)
}
  0x5d   :  { %s12604_s27 = smov 64   ;;  %s12605_s28 = smov 4  }
  0x5e   :  { %145 = dma.hbm_to_vmem [thread:$0]  %s13495_s11, 1024, %s140_s19, [#allocation19], %s12604_s27, %s12604_s27, %s12605_s28  }
  0x5f   :  { %s12402_s25 = scalar_lea.hbm %s13485_s1, 3072 }
  0x60   :  { %p12403_p12 = scmp.ne.s32.totalorder %s13485_s1, %s12402_s25  ;;  %p12406_p13 = scmp.lt.u32.totalorder %s12402_s25, %s13485_s1 }
  0x62   :  { %p12408_p0 = pnand %p12406_p13, %p12403_p12 }
  0x64   :  { %12411 = shalt.err (!%p12408_p0)
}
  0x65   :  { %s12412_s10 = scalar_lea.vmem %s12748_s4, 3072  ;;  %p12417_p2 = scmp.lt.s32.totalorder %s12748_s4, %s12748_s4 }
  0x66   :  { %p12413_p1 = scmp.ne.s32.totalorder %s12748_s4, %s12412_s10  ;;  %p12418_p3 = scmp.lt.s32.totalorder %s12412_s10, %s12412_s10 }
  0x68   :  { %p12419_p4 = por %p12418_p3, %p12417_p2 }
  0x6a   :  { %p12420_p5 = pnand %p12419_p4, %p12413_p1 }
  0x6c   :  { %12423 = shalt.err (!%p12420_p5)
}
  0x6d   :  { %s12606_s11 = smov 192   ;;  %s12607_s19 = smov 12  }
  0x6e   :  { %43 = dma.hbm_to_vmem [thread:$0]  %s13485_s1, 3072, %s12748_s4, [#allocation4], %s12606_s11, %s12606_s11, %s12607_s19  }
  0x6f   :  { %s12608_s24 = smov [#allocation8]   ;;  %s12609_s8 = smov [#allocation11]  }
  0x70   :  { %s62_s26 = sshll.u32 %s12608_s24, 4  ;;  %s83_s30 = sshll.u32 %s12609_s8, 4  ;;  %s63_s26 = int_to_ptr.vmem [resolvable:$true] %s62_s26  ;;  %s12782_s30 = int_to_ptr.vmem [resolvable:$true] %s83_s30 }
  0x71   :  { %s12424_s6 = scalar_lea.hbm %s13487_s3, 192 }
  0x72   :  { %p12425_p6 = scmp.ne.s32.totalorder %s13487_s3, %s12424_s6  ;;  %p12428_p7 = scmp.lt.u32.totalorder %s12424_s6, %s13487_s3 }
  0x74   :  { %p12430_p8 = pnand %p12428_p7, %p12425_p6 }
  0x76   :  { %12433 = shalt.err (!%p12430_p8)
}
  0x77   :  { %s12434_s1 = scalar_lea.vmem %s63_s26, 192  ;;  %p12439_p10 = scmp.lt.s32.totalorder %s63_s26, %s63_s26 }
  0x78   :  { %p12435_p9 = scmp.ne.s32.totalorder %s63_s26, %s12434_s1  ;;  %p12440_p11 = scmp.lt.s32.totalorder %s12434_s1, %s12434_s1 }
  0x7a   :  { %p12441_p12 = por %p12440_p11, %p12439_p10 }
  0x7c   :  { %p12442_p13 = pnand %p12441_p12, %p12435_p9 }
  0x7e   :  { %12445 = shalt.err (!%p12442_p13)
}
  0x7f   :  { %65 = dma.hbm_to_vmem [thread:$0]  %s13487_s3, 192, %s63_s26, [#allocation7]  }
  0x80   :  { %s12446_s19 = scalar_lea.hbm %s13489_s5, 4096 }
  0x81   :  { %p12447_p0 = scmp.ne.s32.totalorder %s13489_s5, %s12446_s19  ;;  %p12450_p1 = scmp.lt.u32.totalorder %s12446_s19, %s13489_s5 }
  0x83   :  { %p12452_p2 = pnand %p12450_p1, %p12447_p0 }
  0x85   :  { %12455 = shalt.err (!%p12452_p2)
}
  0x86   :  { %s12456_s15 = scalar_lea.vmem %s12782_s30, 4096  ;;  %p12461_p4 = scmp.lt.s32.totalorder %s12782_s30, %s12782_s30 }
  0x87   :  { %p12457_p3 = scmp.ne.s32.totalorder %s12782_s30, %s12456_s15  ;;  %p12462_p5 = scmp.lt.s32.totalorder %s12456_s15, %s12456_s15 }
  0x89   :  { %p12463_p6 = por %p12462_p5, %p12461_p4 }
  0x8b   :  { %p12464_p7 = pnand %p12463_p6, %p12457_p3 }
  0x8d   :  { %12467 = shalt.err (!%p12464_p7)
}
  0x8e   :  { %89 = dma.hbm_to_vmem [thread:$0]  %s13489_s5, 4096, %s12782_s30, [#allocation10], %s12598_s2, %s12598_s2, %s12599_s16  }
  0x8f   :  { %s12610_s17 = smov [#allocation14]   ;;  %s12611_s25 = smov [#allocation17]  }
  0x90   :  { %s105_s6 = sshll.u32 %s12610_s17, 4  ;;  %s128_s18 = sshll.u32 %s12611_s25, 4  ;;  %s106_s6 = int_to_ptr.vmem [resolvable:$true] %s105_s6  ;;  %s129_s18 = int_to_ptr.vmem [resolvable:$true] %s128_s18 }
  0x91   :  { %s12468_s1 = scalar_lea.hbm %s13491_s7, 1024 }
  0x92   :  { %p12469_p8 = scmp.ne.s32.totalorder %s13491_s7, %s12468_s1  ;;  %p12472_p9 = scmp.lt.u32.totalorder %s12468_s1, %s13491_s7 }
  0x94   :  { %p12474_p10 = pnand %p12472_p9, %p12469_p8 }
  0x96   :  { %12477 = shalt.err (!%p12474_p10)
}
  0x97   :  { %s12478_s5 = scalar_lea.vmem %s106_s6, 1024  ;;  %p12483_p12 = scmp.lt.s32.totalorder %s106_s6, %s106_s6 }
  0x98   :  { %p12479_p11 = scmp.ne.s32.totalorder %s106_s6, %s12478_s5  ;;  %p12484_p13 = scmp.lt.s32.totalorder %s12478_s5, %s12478_s5 }
  0x9a   :  { %p12485_p0 = por %p12484_p13, %p12483_p12 }
  0x9c   :  { %p12486_p1 = pnand %p12485_p0, %p12479_p11 }
  0x9e   :  { %12489 = shalt.err (!%p12486_p1)
}
  0x9f   :  { %111 = dma.hbm_to_vmem [thread:$0]  %s13491_s7, 1024, %s106_s6, [#allocation13], %s12604_s27, %s12604_s27, %s12605_s28  }
  0xa0   :  { %s12490_s22 = scalar_lea.hbm %s13493_s9, 16 }
  0xa1   :  { %p12491_p2 = scmp.ne.s32.totalorder %s13493_s9, %s12490_s22  ;;  %p12494_p3 = scmp.lt.u32.totalorder %s12490_s22, %s13493_s9 }
  0xa3   :  { %p12496_p4 = pnand %p12494_p3, %p12491_p2 }
  0xa5   :  { %12499 = shalt.err (!%p12496_p4)
}
  0xa6   :  { %s12500_s3 = scalar_lea.vmem %s129_s18, 16  ;;  %s12504_s26 = scalar_lea.vmem %s129_s18, 32 }
  0xa7   :  { %p12501_p5 = scmp.ne.s32.totalorder %s129_s18, %s12500_s3  ;;  %p12505_p6 = scmp.lt.s32.totalorder %s129_s18, %s129_s18 }
  0xa8   :  { %p12506_p7 = scmp.lt.s32.totalorder %s12504_s26, %s12500_s3 }
  0xaa   :  { %p12507_p8 = por %p12506_p7, %p12505_p6 }
  0xac   :  { %p12508_p9 = pnand %p12507_p8, %p12501_p5 }
  0xae   :  { %12511 = shalt.err (!%p12508_p9)
}
  0xaf   :  { %131 = dma.hbm_to_vmem [thread:$0]  %s13493_s9, 16, %s129_s18, [#allocation16]  }
  0xb0   :  { %s12612_s28 = smov [#allocation20]   ;;  %s12512_s20 = scalar_lea.hbm %s13496_s12, 16 }
  0xb1   :  { %s152_s17 = sshll.u32 %s12612_s28, 4  ;;  %p12513_p10 = scmp.ne.s32.totalorder %s13496_s12, %s12512_s20  ;;  %s153_s17 = int_to_ptr.vmem [resolvable:$true] %s152_s17 }
  0xb2   :  { %p12516_p11 = scmp.lt.u32.totalorder %s12512_s20, %s13496_s12 }
  0xb4   :  { %p12518_p12 = pnand %p12516_p11, %p12513_p10 }
  0xb6   :  { %12521 = shalt.err (!%p12518_p12)
}
  0xb7   :  { %s12522_s10 = scalar_lea.vmem %s153_s17, 16  ;;  %s12526_s9 = scalar_lea.vmem %s153_s17, 32 }
  0xb8   :  { %p12523_p13 = scmp.ne.s32.totalorder %s153_s17, %s12522_s10  ;;  %p12527_p0 = scmp.lt.s32.totalorder %s153_s17, %s153_s17 }
  0xb9   :  { %p12528_p1 = scmp.lt.s32.totalorder %s12526_s9, %s12522_s10 }
  0xbb   :  { %p12529_p2 = por %p12528_p1, %p12527_p0 }
  0xbd   :  { %p12530_p3 = pnand %p12529_p2, %p12523_p13 }
  0xbf   :  { %12533 = shalt.err (!%p12530_p3)
}
  0xc0   :  { %155 = dma.hbm_to_vmem [thread:$0]  %s13496_s12, 16, %s153_s17, [#allocation19]  }
  0xc1   :  { %12578 = dma.done.wait [#allocation4], 3072  }
  0xc2   :  { %12579 = vsyncadd [#allocation4], 4294964224 }
  0xc3   :  { %12580 = dma.done.wait [#allocation7], 110784  }
  0xc4   :  { %12581 = vsyncadd [#allocation7], 4294856512 }
  0xc5   :  { %12582 = dma.done.wait [#allocation10], 16384  }
  0xc6   :  { %12583 = vsyncadd [#allocation10], 4294950912 }
  0xc7   :  { %12584 = dma.done.wait [#allocation13], 1088  }
  0xc8   :  { %12585 = vsyncadd [#allocation13], 4294966208 }
  0xc9   :  { %12586 = dma.done.wait [#allocation16], 32  }
  0xca   :  { %12587 = vsyncadd [#allocation16], 4294967264 }
  0xcb   :  { %12588 = dma.done.wait [#allocation19], 1040  }
  0xcc   :  { %12589 = vsyncadd [#allocation19], 4294966256  ;;  %v12613_v1 = vmov 0   ;;  %v12614_v2 = vmov 0.0   ;;  %v190_v3 = vld [vmem:[%s13484_s0] sm:$0xff]  ;;  %v191_v4 = vld [vmem:[%s13484_s0 + $0x8] sm:$0xff]  ;;  %v192_v31 = vlaneseq }
  0xcd   :  { %10695 = vset.pattern.permute.xlu0 %v12613_v1  ;;  %10526 = vmatprep.subr.bf16.mxu1 %v12614_v2  ;;  %v10697_v5 = vld [vmem:[#allocation3 + $0x4] ss:$12 sps:$4 sm:$0xff]   ;;  %v10699_v6 = vld [vmem:[#allocation3] ss:$12 sps:$4 sm:$0xff]   ;;  %v10700_v7 = vld [vmem:[#allocation3 + $0x8] ss:$12 sps:$4 sm:$0xff]  }
  0xce   :  { %399 = vmatprep.mubr.bf16.mxu0 %v12613_v1  ;;  %10696 = vset.pattern.permute.xlu1 %v12613_v1  ;;  %v10701_v8 = vld [vmem:[#allocation3 + $0x1c] ss:$12 sps:$4 sm:$0xff]   ;;  %v10703_v9 = vld [vmem:[#allocation3 + $0x18] ss:$12 sps:$4 sm:$0xff]   ;;  %v10704_v10 = vld [vmem:[#allocation3 + $0x20] ss:$12 sps:$4 sm:$0xff]  }
  0xcf   :  { %195 = vperm.xlu0 %10695, %v190_v3   ;;  %367 = vmatprep.subr.bf16.mxu0 %v10697_v5  ;;  %v10705_v11 = vld [vmem:[#allocation3 + $0x34] ss:$12 sps:$4 sm:$0xff]   ;;  %vm12615_vm0 = vmmov 0   ;;  %v10707_v12 = vld [vmem:[#allocation3 + $0x30] ss:$12 sps:$4 sm:$0xff]   ;;  %v193_v33 = vand.u32 127, %v192_v31 }
  0xd0   :  { %368 = vmatpush1.bf16.msra.mxu0 %v10699_v6  ;;  %10527 = vmatpush3.bf16.msra.mxu1 %v10700_v7  ;;  %v10708_v13 = vld [vmem:[#allocation3 + $0x38] ss:$12 sps:$4 sm:$0xff]   ;;  %v10711_v15 = vld [vmem:[#allocation3 + $0x48] ss:$12 sps:$4 sm:$0xff]   ;;  %v10712_v16 = vld [vmem:[#allocation3 + $0x50] ss:$12 sps:$4 sm:$0xff]  }
  0xd1   :  { %369 = vmatprep.subr.bf16.mxu0 %v10701_v8  ;;  %10528 = vmatprep.subr.bf16.mxu1 %v12614_v2  ;;  %v10709_v14 = vld [vmem:[#allocation3 + $0x4c] ss:$12 sps:$4 sm:$0xff]   ;;  %v10713_v17 = vld [vmem:[#allocation3 + $0x64] ss:$12 sps:$4 sm:$0xff]   ;;  %v10716_v19 = vld [vmem:[#allocation3 + $0x68] ss:$12 sps:$4 sm:$0xff]  }
  0xd2   :  { %10542 = vmatprep.mubr.msk.bf16.mxu1 %vm12615_vm0, %v12614_v2  ;;  %v10715_v18 = vld [vmem:[#allocation3 + $0x60] ss:$12 sps:$4 sm:$0xff]   ;;  %v10717_v20 = vld [vmem:[#allocation3 + $0x7c] ss:$12 sps:$4 sm:$0xff]   ;;  %v10719_v21 = vld [vmem:[#allocation3 + $0x78] ss:$12 sps:$4 sm:$0xff]  }
  0xd3   :  { %198 = vperm.xlu0 %10695, %v191_v4   ;;  %v10720_v22 = vld [vmem:[#allocation3 + $0x80] ss:$12 sps:$4 sm:$0xff]   ;;  %v10723_v24 = vld [vmem:[#allocation3 + $0x90] ss:$12 sps:$4 sm:$0xff]   ;;  %v10724_v25 = vld [vmem:[#allocation3 + $0x98] ss:$12 sps:$4 sm:$0xff]  }
  0xd4   :  { %370 = vmatpush1.bf16.msra.mxu0 %v10703_v9  ;;  %10529 = vmatpush3.bf16.msra.mxu1 %v10704_v10  ;;  %v10721_v23 = vld [vmem:[#allocation3 + $0x94] ss:$12 sps:$4 sm:$0xff]   ;;  %v10725_v26 = vld [vmem:[#allocation3 + $0xac] ss:$12 sps:$4 sm:$0xff]   ;;  %v10728_v28 = vld [vmem:[#allocation3 + $0xb0] ss:$12 sps:$4 sm:$0xff]  }
  0xd5   :  { %371 = vmatprep.subr.bf16.mxu0 %v10705_v11  ;;  %10530 = vmatprep.subr.bf16.mxu1 %v12614_v2  ;;  %v10727_v27 = vld [vmem:[#allocation3 + $0xa8] ss:$12 sps:$4 sm:$0xff]   ;;  %v10734_v30 = vld [vmem:[#allocation6 + $0xc] ss:$144 sps:$4 sm:$0xff]   ;;  %v10729_v34 = vld [vmem:[#allocation6] ss:$144 sps:$4 sm:$0xff]  }
  0xd6   :  { %v10731_v29 = vld [vmem:[#allocation6 + $0x4] ss:$144 sps:$4 sm:$0xff]   ;;  %v10732_v35 = vld [vmem:[#allocation6 + $0x8] ss:$144 sps:$4 sm:$0xff]   ;;  %v10740_v37 = vld [vmem:[#allocation6 + $0x12c] ss:$144 sps:$4 sm:$0xff]  }
  0xd7   :  { %v10737_v36 = vld [vmem:[#allocation6 + $0x124] ss:$144 sps:$4 sm:$0xff]   ;;  %v10735_v39 = vld [vmem:[#allocation6 + $0x120] ss:$144 sps:$4 sm:$0xff]   ;;  %v10738_v40 = vld [vmem:[#allocation6 + $0x128] ss:$144 sps:$4 sm:$0xff]  }
  0xd8   :  { %372 = vmatpush1.bf16.msra.mxu0 %v10707_v12  ;;  %10531 = vmatpush3.bf16.msra.mxu1 %v10708_v13  ;;  %v12616_v41 = vmov 1.0|1.0   ;;  %v10743_v42 = vld [vmem:[#allocation6 + $0x244] ss:$144 sps:$4 sm:$0xff]   ;;  %v10746_v43 = vld [vmem:[#allocation6 + $0x24c] ss:$144 sps:$4 sm:$0xff]  }
  0xd9   :  { %373 = vmatprep.subr.bf16.mxu0 %v10709_v14  ;;  %10532 = vmatprep.subr.bf16.mxu1 %v12614_v2  ;;  %v10741_v44 = vld [vmem:[#allocation6 + $0x240] ss:$144 sps:$4 sm:$0xff]   ;;  %v10744_v45 = vld [vmem:[#allocation6 + $0x248] ss:$144 sps:$4 sm:$0xff]   ;;  %v10749_v46 = vld [vmem:[#allocation6 + $0x364] ss:$144 sps:$4 sm:$0xff]  }
  0xda   :  { %v10752_v47 = vld [vmem:[#allocation6 + $0x36c] ss:$144 sps:$4 sm:$0xff]   ;;  %v10747_v48 = vld [vmem:[#allocation6 + $0x360] ss:$144 sps:$4 sm:$0xff]   ;;  %v10750_v49 = vld [vmem:[#allocation6 + $0x368] ss:$144 sps:$4 sm:$0xff]  }
  0xdb   :  { %v10755_v50 = vld [vmem:[#allocation6 + $0x484] ss:$144 sps:$4 sm:$0xff]   ;;  %v10758_v51 = vld [vmem:[#allocation6 + $0x48c] ss:$144 sps:$4 sm:$0xff]   ;;  %v10753_v52 = vld [vmem:[#allocation6 + $0x480] ss:$144 sps:$4 sm:$0xff]  }
  0xdc   :  { %374 = vmatpush1.bf16.msra.mxu0 %v10711_v15  ;;  %10533 = vmatpush3.bf16.msra.mxu1 %v10712_v16  ;;  %v10756_v53 = vld [vmem:[#allocation6 + $0x488] ss:$144 sps:$4 sm:$0xff]   ;;  %v10761_v54 = vld [vmem:[#allocation6 + $0x5a4] ss:$144 sps:$4 sm:$0xff]   ;;  %v10764_v55 = vld [vmem:[#allocation6 + $0x5ac] ss:$144 sps:$4 sm:$0xff]  }
  0xdd   :  { %375 = vmatprep.subr.bf16.mxu0 %v10713_v17  ;;  %10534 = vmatprep.subr.bf16.mxu1 %v12614_v2  ;;  %v10759_v56 = vld [vmem:[#allocation6 + $0x5a0] ss:$144 sps:$4 sm:$0xff]   ;;  %v10762_v57 = vld [vmem:[#allocation6 + $0x5a8] ss:$144 sps:$4 sm:$0xff]   ;;  %v10767_v58 = vld [vmem:[#allocation6 + $0x6c4] ss:$144 sps:$4 sm:$0xff]  }
  0xde   :  { %v10770_v59 = vld [vmem:[#allocation6 + $0x6cc] ss:$144 sps:$4 sm:$0xff]   ;;  %v10765_v60 = vld [vmem:[#allocation6 + $0x6c0] ss:$144 sps:$4 sm:$0xff]   ;;  %v10768_v61 = vld [vmem:[#allocation6 + $0x6c8] ss:$144 sps:$4 sm:$0xff]  }
  0xdf   :  { %v10773_v62 = vld [vmem:[#allocation6 + $0x7e4] ss:$144 sps:$4 sm:$0xff]   ;;  %v10776_v63 = vld [vmem:[#allocation6 + $0x7ec] ss:$144 sps:$4 sm:$0xff]   ;;  %v10771_v0 = vld [vmem:[#allocation6 + $0x7e0] ss:$144 sps:$4 sm:$0xff]  }
  0xe0   :  { %376 = vmatpush1.bf16.msra.mxu0 %v10715_v18  ;;  %10535 = vmatpush3.bf16.msra.mxu1 %v10716_v19  ;;  %v10774_v3 = vld [vmem:[#allocation6 + $0x7e8] ss:$144 sps:$4 sm:$0xff]   ;;  %v10779_v4 = vld [vmem:[#allocation6 + $0x904] ss:$144 sps:$4 sm:$0xff]   ;;  %v10782_v5 = vld [vmem:[#allocation6 + $0x90c] ss:$144 sps:$4 sm:$0xff]  }
  0xe1   :  { %377 = vmatprep.subr.bf16.mxu0 %v10717_v20  ;;  %10536 = vmatprep.subr.bf16.mxu1 %v12614_v2  ;;  %v10777_v6 = vld [vmem:[#allocation6 + $0x900] ss:$144 sps:$4 sm:$0xff]   ;;  %v10780_v7 = vld [vmem:[#allocation6 + $0x908] ss:$144 sps:$4 sm:$0xff]   ;;  %v10785_v8 = vld [vmem:[#allocation6 + $0xa24] ss:$144 sps:$4 sm:$0xff]  }
  0xe2   :  { %v10788_v9 = vld [vmem:[#allocation6 + $0xa2c] ss:$144 sps:$4 sm:$0xff]   ;;  %v10783_v10 = vld [vmem:[#allocation6 + $0xa20] ss:$144 sps:$4 sm:$0xff]   ;;  %v10786_v11 = vld [vmem:[#allocation6 + $0xa28] ss:$144 sps:$4 sm:$0xff]  }
  0xe3   :  { %v10791_v12 = vld [vmem:[#allocation6 + $0xb44] ss:$144 sps:$4 sm:$0xff]   ;;  %v10794_v13 = vld [vmem:[#allocation6 + $0xb4c] ss:$144 sps:$4 sm:$0xff]   ;;  %v10789_v14 = vld [vmem:[#allocation6 + $0xb40] ss:$144 sps:$4 sm:$0xff]  }
  0xe4   :  { %378 = vmatpush1.bf16.msra.mxu0 %v10719_v21  ;;  %10537 = vmatpush3.bf16.msra.mxu1 %v10720_v22  ;;  %v10792_v15 = vld [vmem:[#allocation6 + $0xb48] ss:$144 sps:$4 sm:$0xff]   ;;  %v10797_v16 = vld [vmem:[#allocation6 + $0xc64] ss:$144 sps:$4 sm:$0xff]   ;;  %v10800_v17 = vld [vmem:[#allocation6 + $0xc6c] ss:$144 sps:$4 sm:$0xff]  }
  0xe5   :  { %379 = vmatprep.subr.bf16.mxu0 %v10721_v23  ;;  %10538 = vmatprep.subr.bf16.mxu1 %v12614_v2  ;;  %v10795_v18 = vld [vmem:[#allocation6 + $0xc60] ss:$144 sps:$4 sm:$0xff]   ;;  %v10798_v19 = vld [vmem:[#allocation6 + $0xc68] ss:$144 sps:$4 sm:$0xff]   ;;  %v10803_v20 = vld [vmem:[#allocation6 + $0xd84] ss:$144 sps:$4 sm:$0xff]  }
  0xe6   :  { %v10806_v21 = vld [vmem:[#allocation6 + $0xd8c] ss:$144 sps:$4 sm:$0xff]   ;;  %v10801_v22 = vld [vmem:[#allocation6 + $0xd80] ss:$144 sps:$4 sm:$0xff]   ;;  %v10804_v23 = vld [vmem:[#allocation6 + $0xd88] ss:$144 sps:$4 sm:$0xff]  }
  0xe7   :  { %vm7194_vm4 = vcmask 1046528   ;;  %vm7228_vm5 = vcmask 1045504   ;;  %vm7344_vm7 = vcmask 1040384   ;;  %vm7420_vm8 = vcmask 1044480   ;;  %s12617_s0 = smov [#allocation22]  }
  0xe8   :  { %380 = vmatpush1.bf16.msra.mxu0 %v10723_v24  ;;  %10539 = vmatpush3.bf16.msra.mxu1 %v10724_v25  ;;  %v10809_v24 = vld [vmem:[#allocation6 + $0xea4] ss:$144 sps:$4 sm:$0xff]   ;;  %v10812_v25 = vld [vmem:[#allocation6 + $0xeac] ss:$144 sps:$4 sm:$0xff]   ;;  %vm7773_vm10 = vcmask 1041408   ;;  %vm7640_vm11 = vcmask 1043456  }
  0xe9   :  { %381 = vmatprep.subr.bf16.mxu0 %v10725_v26  ;;  %10540 = vmatprep.subr.bf16.mxu1 %v12614_v2  ;;  %v10807_v26 = vld [vmem:[#allocation6 + $0xea0] ss:$144 sps:$4 sm:$0xff]   ;;  %s9430_s30 = sshll.u32 %s12617_s0, 4  ;;  %s9431_s30 = int_to_ptr.vmem [resolvable:$true] %s9430_s30 }
  0xea   :  { %s12534_s19 = scalar_lea.vmem %s9431_s30, 32  ;;  %p12539_p5 = scmp.lt.s32.totalorder %s9431_s30, %s9431_s30 }
  0xeb   :  { %p12535_p4 = scmp.ne.s32.totalorder %s9431_s30, %s12534_s19  ;;  %p12540_p6 = scmp.lt.s32.totalorder %s12534_s19, %s12534_s19 }
  0xec   :  { %382 = vmatpush1.bf16.msra.mxu0 %v10727_v27  ;;  %10541 = vmatpush3.bf16.msra.mxu1 %v10728_v28  ;;  %v10810_v27 = vld [vmem:[#allocation6 + $0xea8] ss:$144 sps:$4 sm:$0xff]   ;;  %v10815_v28 = vld [vmem:[#allocation6 + $0xfc4] ss:$144 sps:$4 sm:$0xff]  }
  0xed   :  { %5638 = vmatprep.subr.bf16.mxu0 %v10731_v29  ;;  %5724 = vmatprep.subr.bf16.mxu1 %v10734_v30  ;;  %v10818_v29 = vld [vmem:[#allocation6 + $0xfcc] ss:$144 sps:$4 sm:$0xff]   ;;  %v10813_v30 = vld [vmem:[#allocation6 + $0xfc0] ss:$144 sps:$4 sm:$0xff]   ;;  %p12541_p7 = por %p12540_p6, %p12539_p5 }
  0xef   :  { %p12542_p8 = pnand %p12541_p7, %p12535_p4 }
 0x14e   :  { %v196_v32 = vpop.permute.xlu0 %195 }
 0x14f   :  { %vm200_vm1 = vcmp.eq.s32.totalorder %v196_v32, %v193_v33  ;;  %v10816_v32 = vld [vmem:[#allocation6 + $0xfc8] ss:$144 sps:$4 sm:$0xff]  }
 0x152   :  { %v199_v38 = vpop.permute.xlu0 %198 }
 0x153   :  { %vm201_vm2 = vcmp.eq.s32.totalorder %v199_v38, %v193_v33  ;;  %v10821_v33 = vld [vmem:[#allocation6 + $0x10e4] ss:$144 sps:$4 sm:$0xff]   ;;  %v10830_v38 = vld [vmem:[#allocation6 + $0x120c] ss:$144 sps:$4 sm:$0xff]  }
 0x154   :  { %vm9474_vm3 = vmpackc.low %vm201_vm2, %vm200_vm1 }
 0x155   :  { %9475 = vmatmul.mubr.msk.bf16.vlgmr.msra.gmra.mrb[0].mxu0 %vm9474_vm3, %v12616_v41  ;;  %10543 = vmatmul.mubr.msk.bf16.vlgmr.msra.gmra.mrb[0].mxu1 %vm9474_vm3, %v12616_v41 }
 0x156   :  { %5639 = vmatpush1.bf16.msra.mxu0 %v10729_v34  ;;  %5725 = vmatpush1.bf16.msra.mxu1 %v10732_v35  ;;  %v10824_v34 = vld [vmem:[#allocation6 + $0x10ec] ss:$144 sps:$4 sm:$0xff]   ;;  %v10819_v35 = vld [vmem:[#allocation6 + $0x10e0] ss:$144 sps:$4 sm:$0xff]  }
 0x157   :  { %5640 = vmatprep.subr.bf16.mxu0 %v10737_v36  ;;  %5726 = vmatprep.subr.bf16.mxu1 %v10740_v37  ;;  %v10822_v36 = vld [vmem:[#allocation6 + $0x10e8] ss:$144 sps:$4 sm:$0xff]   ;;  %v10827_v37 = vld [vmem:[#allocation6 + $0x1204] ss:$144 sps:$4 sm:$0xff]  }
 0x15a   :  { %5641 = vmatpush1.bf16.msra.mxu0 %v10735_v39  ;;  %5727 = vmatpush1.bf16.msra.mxu1 %v10738_v40 }
 0x15b   :  { %5642 = vmatprep.subr.bf16.mxu0 %v10743_v42  ;;  %5728 = vmatprep.subr.bf16.mxu1 %v10746_v43 }
 0x15e   :  { %5643 = vmatpush1.bf16.msra.mxu0 %v10741_v44  ;;  %5729 = vmatpush1.bf16.msra.mxu1 %v10744_v45  ;;  %v10825_v45 = vld [vmem:[#allocation6 + $0x1200] ss:$144 sps:$4 sm:$0xff]  }
 0x15f   :  { %5644 = vmatprep.subr.bf16.mxu0 %v10749_v46  ;;  %5730 = vmatprep.subr.bf16.mxu1 %v10752_v47  ;;  %v10828_v46 = vld [vmem:[#allocation6 + $0x1208] ss:$144 sps:$4 sm:$0xff]  }
 0x162   :  { %5645 = vmatpush1.bf16.msra.mxu0 %v10747_v48  ;;  %5731 = vmatpush1.bf16.msra.mxu1 %v10750_v49 }
 0x163   :  { %5646 = vmatprep.subr.bf16.mxu0 %v10755_v50  ;;  %5732 = vmatprep.subr.bf16.mxu1 %v10758_v51  ;;  %v10833_v51 = vld [vmem:[#allocation6 + $0x1324] ss:$144 sps:$4 sm:$0xff]  }
 0x166   :  { %5647 = vmatpush1.bf16.msra.mxu0 %v10753_v52  ;;  %5733 = vmatpush1.bf16.msra.mxu1 %v10756_v53  ;;  %v10836_v52 = vld [vmem:[#allocation6 + $0x132c] ss:$144 sps:$4 sm:$0xff]  }
 0x167   :  { %5648 = vmatprep.subr.bf16.mxu0 %v10761_v54  ;;  %5734 = vmatprep.subr.bf16.mxu1 %v10764_v55  ;;  %v10831_v54 = vld [vmem:[#allocation6 + $0x1320] ss:$144 sps:$4 sm:$0xff]   ;;  %v10834_v55 = vld [vmem:[#allocation6 + $0x1328] ss:$144 sps:$4 sm:$0xff]  }
 0x16a   :  { %5649 = vmatpush1.bf16.msra.mxu0 %v10759_v56  ;;  %5735 = vmatpush1.bf16.msra.mxu1 %v10762_v57  ;;  %v10839_v56 = vld [vmem:[#allocation6 + $0x1444] ss:$144 sps:$4 sm:$0xff]   ;;  %v10842_v57 = vld [vmem:[#allocation6 + $0x144c] ss:$144 sps:$4 sm:$0xff]  }
 0x16b   :  { %5650 = vmatprep.subr.bf16.mxu0 %v10767_v58  ;;  %5736 = vmatprep.subr.bf16.mxu1 %v10770_v59  ;;  %v10837_v58 = vld [vmem:[#allocation6 + $0x1440] ss:$144 sps:$4 sm:$0xff]   ;;  %v10840_v59 = vld [vmem:[#allocation6 + $0x1448] ss:$144 sps:$4 sm:$0xff]  }
 0x16e   :  { %5651 = vmatpush1.bf16.msra.mxu0 %v10765_v60  ;;  %5737 = vmatpush1.bf16.msra.mxu1 %v10768_v61  ;;  %v10845_v60 = vld [vmem:[#allocation6 + $0x1564] ss:$144 sps:$4 sm:$0xff]   ;;  %v10848_v61 = vld [vmem:[#allocation6 + $0x156c] ss:$144 sps:$4 sm:$0xff]  }
 0x16f   :  { %5652 = vmatprep.subr.bf16.mxu0 %v10773_v62  ;;  %5738 = vmatprep.subr.bf16.mxu1 %v10776_v63  ;;  %v10843_v62 = vld [vmem:[#allocation6 + $0x1560] ss:$144 sps:$4 sm:$0xff]   ;;  %v10846_v63 = vld [vmem:[#allocation6 + $0x1568] ss:$144 sps:$4 sm:$0xff]  }
 0x172   :  { %5653 = vmatpush1.bf16.msra.mxu0 %v10771_v0  ;;  %5739 = vmatpush1.bf16.msra.mxu1 %v10774_v3  ;;  %v10851_v0 = vld [vmem:[#allocation6 + $0x1684] ss:$144 sps:$4 sm:$0xff]   ;;  %v10854_v3 = vld [vmem:[#allocation6 + $0x168c] ss:$144 sps:$4 sm:$0xff]  }
 0x173   :  { %5654 = vmatprep.subr.bf16.mxu0 %v10779_v4  ;;  %5740 = vmatprep.subr.bf16.mxu1 %v10782_v5  ;;  %v10849_v4 = vld [vmem:[#allocation6 + $0x1680] ss:$144 sps:$4 sm:$0xff]   ;;  %v10852_v5 = vld [vmem:[#allocation6 + $0x1688] ss:$144 sps:$4 sm:$0xff]  }
 0x176   :  { %5655 = vmatpush1.bf16.msra.mxu0 %v10777_v6  ;;  %5741 = vmatpush1.bf16.msra.mxu1 %v10780_v7  ;;  %v10857_v6 = vld [vmem:[#allocation6 + $0x17a4] ss:$144 sps:$4 sm:$0xff]   ;;  %v10860_v7 = vld [vmem:[#allocation6 + $0x17ac] ss:$144 sps:$4 sm:$0xff]  }
 0x177   :  { %5656 = vmatprep.subr.bf16.mxu0 %v10785_v8  ;;  %5742 = vmatprep.subr.bf16.mxu1 %v10788_v9  ;;  %v10855_v8 = vld [vmem:[#allocation6 + $0x17a0] ss:$144 sps:$4 sm:$0xff]   ;;  %v10858_v9 = vld [vmem:[#allocation6 + $0x17a8] ss:$144 sps:$4 sm:$0xff]  }
 0x17a   :  { %5657 = vmatpush1.bf16.msra.mxu0 %v10783_v10  ;;  %5743 = vmatpush1.bf16.msra.mxu1 %v10786_v11  ;;  %v10863_v10 = vld [vmem:[#allocation6 + $0x18c4] ss:$144 sps:$4 sm:$0xff]   ;;  %v10866_v11 = vld [vmem:[#allocation6 + $0x18cc] ss:$144 sps:$4 sm:$0xff]  }
 0x17b   :  { %5658 = vmatprep.subr.bf16.mxu0 %v10791_v12  ;;  %5744 = vmatprep.subr.bf16.mxu1 %v10794_v13  ;;  %v10861_v12 = vld [vmem:[#allocation6 + $0x18c0] ss:$144 sps:$4 sm:$0xff]   ;;  %v10864_v13 = vld [vmem:[#allocation6 + $0x18c8] ss:$144 sps:$4 sm:$0xff]  }
 0x17e   :  { %5659 = vmatpush1.bf16.msra.mxu0 %v10789_v14  ;;  %5745 = vmatpush1.bf16.msra.mxu1 %v10792_v15  ;;  %v10869_v14 = vld [vmem:[#allocation6 + $0x19e4] ss:$144 sps:$4 sm:$0xff]   ;;  %v10872_v15 = vld [vmem:[#allocation6 + $0x19ec] ss:$144 sps:$4 sm:$0xff]  }
 0x17f   :  { %5660 = vmatprep.subr.bf16.mxu0 %v10797_v16  ;;  %5746 = vmatprep.subr.bf16.mxu1 %v10800_v17  ;;  %v10867_v16 = vld [vmem:[#allocation6 + $0x19e0] ss:$144 sps:$4 sm:$0xff]   ;;  %v10870_v17 = vld [vmem:[#allocation6 + $0x19e8] ss:$144 sps:$4 sm:$0xff]  }
 0x182   :  { %5661 = vmatpush1.bf16.msra.mxu0 %v10795_v18  ;;  %5747 = vmatpush1.bf16.msra.mxu1 %v10798_v19  ;;  %v10875_v18 = vld [vmem:[#allocation6 + $0x14] ss:$144 sps:$4 sm:$0xff]   ;;  %v10878_v19 = vld [vmem:[#allocation6 + $0x1c] ss:$144 sps:$4 sm:$0xff]  }
 0x183   :  { %5662 = vmatprep.subr.bf16.mxu0 %v10803_v20  ;;  %5748 = vmatprep.subr.bf16.mxu1 %v10806_v21  ;;  %v10873_v20 = vld [vmem:[#allocation6 + $0x10] ss:$144 sps:$4 sm:$0xff]   ;;  %v10876_v21 = vld [vmem:[#allocation6 + $0x18] ss:$144 sps:$4 sm:$0xff]  }
 0x186   :  { %5663 = vmatpush1.bf16.msra.mxu0 %v10801_v22  ;;  %5749 = vmatpush1.bf16.msra.mxu1 %v10804_v23  ;;  %v10881_v22 = vld [vmem:[#allocation6 + $0x134] ss:$144 sps:$4 sm:$0xff]   ;;  %v10879_v23 = vld [vmem:[#allocation6 + $0x130] ss:$144 sps:$4 sm:$0xff]  }
 0x187   :  { %5664 = vmatprep.subr.bf16.mxu0 %v10809_v24  ;;  %5750 = vmatprep.subr.bf16.mxu1 %v10812_v25  ;;  %v10884_v24 = vld [vmem:[#allocation6 + $0x13c] ss:$144 sps:$4 sm:$0xff]   ;;  %v10882_v25 = vld [vmem:[#allocation6 + $0x138] ss:$144 sps:$4 sm:$0xff]  }
 0x18a   :  { %5665 = vmatpush1.bf16.msra.mxu0 %v10807_v26  ;;  %5751 = vmatpush1.bf16.msra.mxu1 %v10810_v27  ;;  %v10887_v26 = vld [vmem:[#allocation6 + $0x254] ss:$144 sps:$4 sm:$0xff]   ;;  %v10885_v27 = vld [vmem:[#allocation6 + $0x250] ss:$144 sps:$4 sm:$0xff]  }
 0x18b   :  { %5666 = vmatprep.subr.bf16.mxu0 %v10815_v28  ;;  %5752 = vmatprep.subr.bf16.mxu1 %v10818_v29  ;;  %v10890_v28 = vld [vmem:[#allocation6 + $0x25c] ss:$144 sps:$4 sm:$0xff]   ;;  %v10888_v29 = vld [vmem:[#allocation6 + $0x258] ss:$144 sps:$4 sm:$0xff]  }
 0x18e   :  { %5667 = vmatpush1.bf16.msra.mxu0 %v10813_v30  ;;  %5753 = vmatpush1.bf16.msra.mxu1 %v10816_v32  ;;  %v10893_v30 = vld [vmem:[#allocation6 + $0x374] ss:$144 sps:$4 sm:$0xff]   ;;  %v10891_v32 = vld [vmem:[#allocation6 + $0x370] ss:$144 sps:$4 sm:$0xff]  }
 0x18f   :  { %5668 = vmatprep.subr.bf16.mxu0 %v10821_v33  ;;  %5754 = vmatprep.subr.bf16.mxu1 %v10824_v34  ;;  %v10896_v33 = vld [vmem:[#allocation6 + $0x37c] ss:$144 sps:$4 sm:$0xff]   ;;  %v10894_v34 = vld [vmem:[#allocation6 + $0x378] ss:$144 sps:$4 sm:$0xff]  }
 0x192   :  { %5669 = vmatpush1.bf16.msra.mxu0 %v10819_v35  ;;  %5755 = vmatpush1.bf16.msra.mxu1 %v10822_v36  ;;  %v10899_v35 = vld [vmem:[#allocation6 + $0x494] ss:$144 sps:$4 sm:$0xff]   ;;  %v10897_v36 = vld [vmem:[#allocation6 + $0x490] ss:$144 sps:$4 sm:$0xff]  }
 0x193   :  { %5681 = vmatprep.subr.bf16.mxu0 %v10827_v37  ;;  %5767 = vmatprep.subr.bf16.mxu1 %v10830_v38  ;;  %v10902_v37 = vld [vmem:[#allocation6 + $0x49c] ss:$144 sps:$4 sm:$0xff]   ;;  %v10900_v38 = vld [vmem:[#allocation6 + $0x498] ss:$144 sps:$4 sm:$0xff]  }
 0x228   :  { %v401_v39 = vpop.f32.mrb[0].mxu0  ;;  %v444_v40 = vpop.f32.mrb[0].mxu1 }
 0x229   :  { %v403_v41 = vpop.f32.mrb[1].mxu0  ;;  %v10544_v42 = vpop.f32.mrb[1].mxu1 }
 0x22a   :  { %v405_v43 = vpop.f32.mrb[2].mxu0  ;;  %v447_v44 = vpop.f32.mrb[2].mxu1  ;;  %v10906_v42 = vld [vmem:[#allocation6 + $0x5b8] ss:$144 sps:$4 sm:$0xff]  }
 0x22b   :  { %v12875_v47 = vpack.c.bf16 %v405_v43, %v401_v39  ;;  %v12877_v48 = vpack.c.bf16 %v447_v44, %v444_v40  ;;  %v407_v49 = vpop.f32.mrb[3].mxu0  ;;  %v10545_v50 = vpop.f32.mrb[3].mxu1  ;;  %v10905_v39 = vld [vmem:[#allocation6 + $0x5b4] ss:$144 sps:$4 sm:$0xff]   ;;  %v10903_v40 = vld [vmem:[#allocation6 + $0x5b0] ss:$144 sps:$4 sm:$0xff]  }
 0x22c   :  { %v12879_v53 = vpack.c.bf16 %v407_v49, %v403_v41  ;;  %v10908_v41 = vld [vmem:[#allocation6 + $0x5bc] ss:$144 sps:$4 sm:$0xff]   ;;  %v10911_v43 = vld [vmem:[#allocation6 + $0x6d4] ss:$144 sps:$4 sm:$0xff]   ;;  %v10909_v44 = vld [vmem:[#allocation6 + $0x6d0] ss:$144 sps:$4 sm:$0xff]  }
 0x22d   :  { %v10917_v49 = vld [vmem:[#allocation6 + $0x7f4] ss:$144 sps:$4 sm:$0xff]   ;;  %v10915_v50 = vld [vmem:[#allocation6 + $0x7f0] ss:$144 sps:$4 sm:$0xff]  }
 0x22e   :  { %5670 = vmatprep.mubr.bf16.mxu0 %v12879_v53  ;;  %5756 = vmatprep.mubr.bf16.mxu1 %v12879_v53 }
 0x22f   :  { %5671 = vmatmul.mubr.bf16.vlgmr.msra.gmra.mrb[4].mxu0 %v12875_v47  ;;  %5757 = vmatmul.mubr.bf16.vlgmr.msra.gmra.mrb[4].mxu1 %v12875_v47 }
 0x230   :  { %5682 = vmatpush1.bf16.msra.mxu0 %v10825_v45  ;;  %5768 = vmatpush1.bf16.msra.mxu1 %v10828_v46  ;;  %v10914_v45 = vld [vmem:[#allocation6 + $0x6dc] ss:$144 sps:$4 sm:$0xff]   ;;  %v10912_v46 = vld [vmem:[#allocation6 + $0x6d8] ss:$144 sps:$4 sm:$0xff]  }
 0x231   :  { %5683 = vmatprep.subr.bf16.mxu0 %v10833_v51  ;;  %5769 = vmatprep.subr.bf16.mxu1 %v10836_v52  ;;  %v10920_v51 = vld [vmem:[#allocation6 + $0x7fc] ss:$144 sps:$4 sm:$0xff]   ;;  %v10918_v52 = vld [vmem:[#allocation6 + $0x7f8] ss:$144 sps:$4 sm:$0xff]  }
 0x232   :  { %5713 = vmatprep.mubr.bf16.mxu0 %v12613_v1  ;;  %5799 = vmatprep.mubr.bf16.mxu1 %v12613_v1 }
 0x234   :  { %5684 = vmatpush1.bf16.msra.mxu0 %v10831_v54  ;;  %5770 = vmatpush1.bf16.msra.mxu1 %v10834_v55  ;;  %v10923_v54 = vld [vmem:[#allocation6 + $0x914] ss:$144 sps:$4 sm:$0xff]   ;;  %v10921_v55 = vld [vmem:[#allocation6 + $0x910] ss:$144 sps:$4 sm:$0xff]  }
 0x235   :  { %5685 = vmatprep.subr.bf16.mxu0 %v10839_v56  ;;  %5771 = vmatprep.subr.bf16.mxu1 %v10842_v57  ;;  %v10926_v56 = vld [vmem:[#allocation6 + $0x91c] ss:$144 sps:$4 sm:$0xff]   ;;  %v10924_v57 = vld [vmem:[#allocation6 + $0x918] ss:$144 sps:$4 sm:$0xff]  }
 0x238   :  { %5686 = vmatpush1.bf16.msra.mxu0 %v10837_v58  ;;  %5772 = vmatpush1.bf16.msra.mxu1 %v10840_v59  ;;  %v10929_v58 = vld [vmem:[#allocation6 + $0xa34] ss:$144 sps:$4 sm:$0xff]   ;;  %v10932_v59 = vld [vmem:[#allocation6 + $0xa3c] ss:$144 sps:$4 sm:$0xff]  }
 0x239   :  { %5687 = vmatprep.subr.bf16.mxu0 %v10845_v60  ;;  %5773 = vmatprep.subr.bf16.mxu1 %v10848_v61  ;;  %v10927_v60 = vld [vmem:[#allocation6 + $0xa30] ss:$144 sps:$4 sm:$0xff]   ;;  %v10930_v61 = vld [vmem:[#allocation6 + $0xa38] ss:$144 sps:$4 sm:$0xff]  }
 0x23c   :  { %5688 = vmatpush1.bf16.msra.mxu0 %v10843_v62  ;;  %5774 = vmatpush1.bf16.msra.mxu1 %v10846_v63  ;;  %v10935_v62 = vld [vmem:[#allocation6 + $0xb54] ss:$144 sps:$4 sm:$0xff]   ;;  %v10933_v63 = vld [vmem:[#allocation6 + $0xb50] ss:$144 sps:$4 sm:$0xff]  }
 0x23d   :  { %5689 = vmatprep.subr.bf16.mxu0 %v10851_v0  ;;  %5775 = vmatprep.subr.bf16.mxu1 %v10854_v3  ;;  %v10938_v0 = vld [vmem:[#allocation6 + $0xb5c] ss:$144 sps:$4 sm:$0xff]   ;;  %v10936_v3 = vld [vmem:[#allocation6 + $0xb58] ss:$144 sps:$4 sm:$0xff]  }
 0x240   :  { %5690 = vmatpush1.bf16.msra.mxu0 %v10849_v4  ;;  %5776 = vmatpush1.bf16.msra.mxu1 %v10852_v5  ;;  %v10941_v4 = vld [vmem:[#allocation6 + $0xc74] ss:$144 sps:$4 sm:$0xff]   ;;  %v10939_v5 = vld [vmem:[#allocation6 + $0xc70] ss:$144 sps:$4 sm:$0xff]  }
 0x241   :  { %5691 = vmatprep.subr.bf16.mxu0 %v10857_v6  ;;  %5777 = vmatprep.subr.bf16.mxu1 %v10860_v7  ;;  %v10944_v6 = vld [vmem:[#allocation6 + $0xc7c] ss:$144 sps:$4 sm:$0xff]   ;;  %v10942_v7 = vld [vmem:[#allocation6 + $0xc78] ss:$144 sps:$4 sm:$0xff]  }
 0x244   :  { %5692 = vmatpush1.bf16.msra.mxu0 %v10855_v8  ;;  %5778 = vmatpush1.bf16.msra.mxu1 %v10858_v9  ;;  %v10947_v8 = vld [vmem:[#allocation6 + $0xd94] ss:$144 sps:$4 sm:$0xff]   ;;  %v10945_v9 = vld [vmem:[#allocation6 + $0xd90] ss:$144 sps:$4 sm:$0xff]  }
 0x245   :  { %5693 = vmatprep.subr.bf16.mxu0 %v10863_v10  ;;  %5779 = vmatprep.subr.bf16.mxu1 %v10866_v11  ;;  %v10950_v10 = vld [vmem:[#allocation6 + $0xd9c] ss:$144 sps:$4 sm:$0xff]   ;;  %v10948_v11 = vld [vmem:[#allocation6 + $0xd98] ss:$144 sps:$4 sm:$0xff]  }
 0x248   :  { %5694 = vmatpush1.bf16.msra.mxu0 %v10861_v12  ;;  %5780 = vmatpush1.bf16.msra.mxu1 %v10864_v13  ;;  %v10953_v12 = vld [vmem:[#allocation6 + $0xeb4] ss:$144 sps:$4 sm:$0xff]   ;;  %v10951_v13 = vld [vmem:[#allocation6 + $0xeb0] ss:$144 sps:$4 sm:$0xff]  }
 0x249   :  { %5695 = vmatprep.subr.bf16.mxu0 %v10869_v14  ;;  %5781 = vmatprep.subr.bf16.mxu1 %v10872_v15  ;;  %v10956_v14 = vld [vmem:[#allocation6 + $0xebc] ss:$144 sps:$4 sm:$0xff]   ;;  %v10954_v15 = vld [vmem:[#allocation6 + $0xeb8] ss:$144 sps:$4 sm:$0xff]  }
 0x24c   :  { %5696 = vmatpush1.bf16.msra.mxu0 %v10867_v16  ;;  %5782 = vmatpush1.bf16.msra.mxu1 %v10870_v17  ;;  %v10959_v16 = vld [vmem:[#allocation6 + $0xfd4] ss:$144 sps:$4 sm:$0xff]   ;;  %v10957_v17 = vld [vmem:[#allocation6 + $0xfd0] ss:$144 sps:$4 sm:$0xff]  }
 0x24d   :  { %5810 = vmatprep.subr.bf16.mxu0 %v10875_v18  ;;  %5896 = vmatprep.subr.bf16.mxu1 %v10878_v19  ;;  %v10962_v18 = vld [vmem:[#allocation6 + $0xfdc] ss:$144 sps:$4 sm:$0xff]   ;;  %v10960_v19 = vld [vmem:[#allocation6 + $0xfd8] ss:$144 sps:$4 sm:$0xff]  }
 0x24f   :  { %5714 = vmatmul.mubr.bf16.vlgmr.msra.gmra.mrb[4].mxu0 %v12877_v48  ;;  %5800 = vmatmul.mubr.bf16.vlgmr.msra.gmra.mrb[4].mxu1 %v12877_v48 }
 0x250   :  { %5811 = vmatpush1.bf16.msra.mxu0 %v10873_v20  ;;  %5842 = vmatprep.mubr.bf16.mxu0 %v12879_v53  ;;  %v10965_v20 = vld [vmem:[#allocation6 + $0x10f4] ss:$144 sps:$4 sm:$0xff]  }
 0x251   :  { %5897 = vmatpush1.bf16.msra.mxu1 %v10876_v21  ;;  %5928 = vmatprep.mubr.bf16.mxu1 %v12879_v53  ;;  %v10963_v21 = vld [vmem:[#allocation6 + $0x10f0] ss:$144 sps:$4 sm:$0xff]  }
 0x252   :  { %5812 = vmatprep.subr.bf16.mxu0 %v10881_v22  ;;  %5898 = vmatprep.subr.bf16.mxu1 %v10884_v24  ;;  %v10968_v22 = vld [vmem:[#allocation6 + $0x10fc] ss:$144 sps:$4 sm:$0xff]   ;;  %v10971_v24 = vld [vmem:[#allocation6 + $0x1214] ss:$144 sps:$4 sm:$0xff]  }
 0x254   :  { %5813 = vmatpush1.bf16.msra.mxu0 %v10879_v23  ;;  %v10966_v23 = vld [vmem:[#allocation6 + $0x10f8] ss:$144 sps:$4 sm:$0xff]  }
 0x255   :  { %5899 = vmatpush1.bf16.msra.mxu1 %v10882_v25  ;;  %5814 = vmatprep.subr.bf16.mxu0 %v10887_v26  ;;  %v10974_v25 = vld [vmem:[#allocation6 + $0x121c] ss:$144 sps:$4 sm:$0xff]   ;;  %v10969_v26 = vld [vmem:[#allocation6 + $0x1210] ss:$144 sps:$4 sm:$0xff]  }
 0x256   :  { %5900 = vmatprep.subr.bf16.mxu1 %v10890_v28  ;;  %v10977_v28 = vld [vmem:[#allocation6 + $0x1334] ss:$144 sps:$4 sm:$0xff]  }
 0x258   :  { %5815 = vmatpush1.bf16.msra.mxu0 %v10885_v27  ;;  %v10972_v27 = vld [vmem:[#allocation6 + $0x1218] ss:$144 sps:$4 sm:$0xff]  }
 0x259   :  { %5901 = vmatpush1.bf16.msra.mxu1 %v10888_v29  ;;  %5816 = vmatprep.subr.bf16.mxu0 %v10893_v30  ;;  %v10980_v29 = vld [vmem:[#allocation6 + $0x133c] ss:$144 sps:$4 sm:$0xff]   ;;  %v10975_v30 = vld [vmem:[#allocation6 + $0x1330] ss:$144 sps:$4 sm:$0xff]  }
 0x25a   :  { %5902 = vmatprep.subr.bf16.mxu1 %v10896_v33  ;;  %v10983_v33 = vld [vmem:[#allocation6 + $0x1454] ss:$144 sps:$4 sm:$0xff]  }
 0x25c   :  { %5817 = vmatpush1.bf16.msra.mxu0 %v10891_v32  ;;  %v10978_v32 = vld [vmem:[#allocation6 + $0x1338] ss:$144 sps:$4 sm:$0xff]  }
 0x25d   :  { %5903 = vmatpush1.bf16.msra.mxu1 %v10894_v34  ;;  %5818 = vmatprep.subr.bf16.mxu0 %v10899_v35  ;;  %v10986_v34 = vld [vmem:[#allocation6 + $0x145c] ss:$144 sps:$4 sm:$0xff]   ;;  %v10981_v35 = vld [vmem:[#allocation6 + $0x1450] ss:$144 sps:$4 sm:$0xff]  }
 0x25e   :  { %5904 = vmatprep.subr.bf16.mxu1 %v10902_v37  ;;  %v10989_v37 = vld [vmem:[#allocation6 + $0x1574] ss:$144 sps:$4 sm:$0xff]  }
 0x260   :  { %5819 = vmatpush1.bf16.msra.mxu0 %v10897_v36  ;;  %v10984_v36 = vld [vmem:[#allocation6 + $0x1458] ss:$144 sps:$4 sm:$0xff]  }
 0x261   :  { %5905 = vmatpush1.bf16.msra.mxu1 %v10900_v38  ;;  %5820 = vmatprep.subr.bf16.mxu0 %v10905_v39  ;;  %v10987_v38 = vld [vmem:[#allocation6 + $0x1570] ss:$144 sps:$4 sm:$0xff]   ;;  %v10992_v39 = vld [vmem:[#allocation6 + $0x157c] ss:$144 sps:$4 sm:$0xff]  }
 0x262   :  { %5906 = vmatprep.subr.bf16.mxu1 %v10908_v41  ;;  %v10995_v41 = vld [vmem:[#allocation6 + $0x1694] ss:$144 sps:$4 sm:$0xff]  }
 0x264   :  { %5821 = vmatpush1.bf16.msra.mxu0 %v10903_v40  ;;  %v10990_v40 = vld [vmem:[#allocation6 + $0x1578] ss:$144 sps:$4 sm:$0xff]  }
 0x265   :  { %5907 = vmatpush1.bf16.msra.mxu1 %v10906_v42  ;;  %5822 = vmatprep.subr.bf16.mxu0 %v10911_v43  ;;  %v10993_v42 = vld [vmem:[#allocation6 + $0x1690] ss:$144 sps:$4 sm:$0xff]   ;;  %v10998_v43 = vld [vmem:[#allocation6 + $0x169c] ss:$144 sps:$4 sm:$0xff]  }
 0x266   :  { %5908 = vmatprep.subr.bf16.mxu1 %v10914_v45  ;;  %v11001_v45 = vld [vmem:[#allocation6 + $0x17b4] ss:$144 sps:$4 sm:$0xff]  }
 0x268   :  { %5823 = vmatpush1.bf16.msra.mxu0 %v10909_v44  ;;  %v10996_v44 = vld [vmem:[#allocation6 + $0x1698] ss:$144 sps:$4 sm:$0xff]  }
 0x269   :  { %5909 = vmatpush1.bf16.msra.mxu1 %v10912_v46  ;;  %5824 = vmatprep.subr.bf16.mxu0 %v10917_v49  ;;  %v11004_v46 = vld [vmem:[#allocation6 + $0x17bc] ss:$144 sps:$4 sm:$0xff]   ;;  %v10999_v49 = vld [vmem:[#allocation6 + $0x17b0] ss:$144 sps:$4 sm:$0xff]  }
 0x26a   :  { %5910 = vmatprep.subr.bf16.mxu1 %v10920_v51  ;;  %v11007_v51 = vld [vmem:[#allocation6 + $0x18d4] ss:$144 sps:$4 sm:$0xff]  }
 0x26c   :  { %5825 = vmatpush1.bf16.msra.mxu0 %v10915_v50  ;;  %v11002_v50 = vld [vmem:[#allocation6 + $0x17b8] ss:$144 sps:$4 sm:$0xff]  }
 0x26d   :  { %5911 = vmatpush1.bf16.msra.mxu1 %v10918_v52  ;;  %5826 = vmatprep.subr.bf16.mxu0 %v10923_v54  ;;  %v11010_v52 = vld [vmem:[#allocation6 + $0x18dc] ss:$144 sps:$4 sm:$0xff]   ;;  %v11005_v54 = vld [vmem:[#allocation6 + $0x18d0] ss:$144 sps:$4 sm:$0xff]  }
 0x26e   :  { %5912 = vmatprep.subr.bf16.mxu1 %v10926_v56  ;;  %v11013_v56 = vld [vmem:[#allocation6 + $0x19f4] ss:$144 sps:$4 sm:$0xff]  }
 0x270   :  { %5827 = vmatpush1.bf16.msra.mxu0 %v10921_v55  ;;  %v11008_v55 = vld [vmem:[#allocation6 + $0x18d8] ss:$144 sps:$4 sm:$0xff]  }
 0x271   :  { %5913 = vmatpush1.bf16.msra.mxu1 %v10924_v57  ;;  %5828 = vmatprep.subr.bf16.mxu0 %v10929_v58  ;;  %v11016_v57 = vld [vmem:[#allocation6 + $0x19fc] ss:$144 sps:$4 sm:$0xff]   ;;  %v11011_v58 = vld [vmem:[#allocation6 + $0x19f0] ss:$144 sps:$4 sm:$0xff]  }
 0x272   :  { %5914 = vmatprep.subr.bf16.mxu1 %v10932_v59  ;;  %v11014_v59 = vld [vmem:[#allocation6 + $0x19f8] ss:$144 sps:$4 sm:$0xff]  }
 0x274   :  { %5829 = vmatpush1.bf16.msra.mxu0 %v10927_v60  ;;  %v11019_v60 = vld [vmem:[#allocation6 + $0x24] ss:$144 sps:$4 sm:$0xff]  }
 0x275   :  { %5915 = vmatpush1.bf16.msra.mxu1 %v10930_v61  ;;  %5830 = vmatprep.subr.bf16.mxu0 %v10935_v62  ;;  %v11022_v61 = vld [vmem:[#allocation6 + $0x2c] ss:$144 sps:$4 sm:$0xff]   ;;  %v11017_v62 = vld [vmem:[#allocation6 + $0x20] ss:$144 sps:$4 sm:$0xff]  }
 0x276   :  { %5916 = vmatprep.subr.bf16.mxu1 %v10938_v0  ;;  %v11025_v0 = vld [vmem:[#allocation6 + $0x144] ss:$144 sps:$4 sm:$0xff]  }
 0x278   :  { %5831 = vmatpush1.bf16.msra.mxu0 %v10933_v63  ;;  %v11020_v63 = vld [vmem:[#allocation6 + $0x28] ss:$144 sps:$4 sm:$0xff]  }
 0x279   :  { %5917 = vmatpush1.bf16.msra.mxu1 %v10936_v3  ;;  %5832 = vmatprep.subr.bf16.mxu0 %v10941_v4  ;;  %v11028_v3 = vld [vmem:[#allocation6 + $0x14c] ss:$144 sps:$4 sm:$0xff]   ;;  %v11023_v4 = vld [vmem:[#allocation6 + $0x140] ss:$144 sps:$4 sm:$0xff]  }
 0x27a   :  { %5918 = vmatprep.subr.bf16.mxu1 %v10944_v6  ;;  %v11031_v6 = vld [vmem:[#allocation6 + $0x264] ss:$144 sps:$4 sm:$0xff]  }
 0x27c   :  { %5833 = vmatpush1.bf16.msra.mxu0 %v10939_v5  ;;  %v11026_v5 = vld [vmem:[#allocation6 + $0x148] ss:$144 sps:$4 sm:$0xff]  }
 0x27d   :  { %5919 = vmatpush1.bf16.msra.mxu1 %v10942_v7  ;;  %5834 = vmatprep.subr.bf16.mxu0 %v10947_v8  ;;  %v11034_v7 = vld [vmem:[#allocation6 + $0x26c] ss:$144 sps:$4 sm:$0xff]   ;;  %v11029_v8 = vld [vmem:[#allocation6 + $0x260] ss:$144 sps:$4 sm:$0xff]  }
 0x27e   :  { %5920 = vmatprep.subr.bf16.mxu1 %v10950_v10  ;;  %v11037_v10 = vld [vmem:[#allocation6 + $0x384] ss:$144 sps:$4 sm:$0xff]  }
 0x280   :  { %5835 = vmatpush1.bf16.msra.mxu0 %v10945_v9  ;;  %v11032_v9 = vld [vmem:[#allocation6 + $0x268] ss:$144 sps:$4 sm:$0xff]  }
 0x281   :  { %5921 = vmatpush1.bf16.msra.mxu1 %v10948_v11  ;;  %5836 = vmatprep.subr.bf16.mxu0 %v10953_v12  ;;  %v11040_v11 = vld [vmem:[#allocation6 + $0x38c] ss:$144 sps:$4 sm:$0xff]   ;;  %v11035_v12 = vld [vmem:[#allocation6 + $0x380] ss:$144 sps:$4 sm:$0xff]  }
 0x282   :  { %5922 = vmatprep.subr.bf16.mxu1 %v10956_v14  ;;  %v11043_v14 = vld [vmem:[#allocation6 + $0x4a4] ss:$144 sps:$4 sm:$0xff]  }
 0x284   :  { %5837 = vmatpush1.bf16.msra.mxu0 %v10951_v13  ;;  %v11038_v13 = vld [vmem:[#allocation6 + $0x388] ss:$144 sps:$4 sm:$0xff]  }
 0x285   :  { %5923 = vmatpush1.bf16.msra.mxu1 %v10954_v15  ;;  %5838 = vmatprep.subr.bf16.mxu0 %v10959_v16  ;;  %v11046_v15 = vld [vmem:[#allocation6 + $0x4ac] ss:$144 sps:$4 sm:$0xff]   ;;  %v11041_v16 = vld [vmem:[#allocation6 + $0x4a0] ss:$144 sps:$4 sm:$0xff]  }
 0x286   :  { %5924 = vmatprep.subr.bf16.mxu1 %v10962_v18  ;;  %v11049_v18 = vld [vmem:[#allocation6 + $0x5c4] ss:$144 sps:$4 sm:$0xff]  }
 0x288   :  { %5839 = vmatpush1.bf16.msra.mxu0 %v10957_v17  ;;  %v11044_v17 = vld [vmem:[#allocation6 + $0x4a8] ss:$144 sps:$4 sm:$0xff]  }
 0x289   :  { %5925 = vmatpush1.bf16.msra.mxu1 %v10960_v19  ;;  %5840 = vmatprep.subr.bf16.mxu0 %v10965_v20  ;;  %v11052_v19 = vld [vmem:[#allocation6 + $0x5cc] ss:$144 sps:$4 sm:$0xff]   ;;  %v11047_v20 = vld [vmem:[#allocation6 + $0x5c0] ss:$144 sps:$4 sm:$0xff]  }
 0x28a   :  { %5926 = vmatprep.subr.bf16.mxu1 %v10968_v22  ;;  %v11055_v22 = vld [vmem:[#allocation6 + $0x6e4] ss:$144 sps:$4 sm:$0xff]  }
 0x28c   :  { %5841 = vmatpush1.bf16.msra.mxu0 %v10963_v21  ;;  %v11050_v21 = vld [vmem:[#allocation6 + $0x5c8] ss:$144 sps:$4 sm:$0xff]  }
 0x28d   :  { %5927 = vmatpush1.bf16.msra.mxu1 %v10966_v23  ;;  %5853 = vmatprep.subr.bf16.mxu0 %v10971_v24  ;;  %v11058_v23 = vld [vmem:[#allocation6 + $0x6ec] ss:$144 sps:$4 sm:$0xff]   ;;  %v11053_v24 = vld [vmem:[#allocation6 + $0x6e0] ss:$144 sps:$4 sm:$0xff]  }
 0x28e   :  { %5939 = vmatprep.subr.bf16.mxu1 %v10974_v25  ;;  %v11056_v25 = vld [vmem:[#allocation6 + $0x6e8] ss:$144 sps:$4 sm:$0xff]  }
 0x28f   :  { %5843 = vmatmul.mubr.bf16.vlgmr.msra.gmra.mrb[8].mxu0 %v12875_v47 }
 0x290   :  { %5929 = vmatmul.mubr.bf16.vlgmr.msra.gmra.mrb[8].mxu1 %v12875_v47  ;;  %5854 = vmatpush1.bf16.msra.mxu0 %v10969_v26  ;;  %v11061_v26 = vld [vmem:[#allocation6 + $0x804] ss:$144 sps:$4 sm:$0xff]  }
 0x291   :  { %5940 = vmatpush1.bf16.msra.mxu1 %v10972_v27  ;;  %5855 = vmatprep.subr.bf16.mxu0 %v10977_v28  ;;  %v11064_v27 = vld [vmem:[#allocation6 + $0x80c] ss:$144 sps:$4 sm:$0xff]   ;;  %v11059_v28 = vld [vmem:[#allocation6 + $0x800] ss:$144 sps:$4 sm:$0xff]  }
 0x292   :  { %5941 = vmatprep.subr.bf16.mxu1 %v10980_v29  ;;  %5885 = vmatprep.mubr.bf16.mxu0 %v12613_v1  ;;  %v11062_v29 = vld [vmem:[#allocation6 + $0x808] ss:$144 sps:$4 sm:$0xff]  }
 0x293   :  { %5971 = vmatprep.mubr.bf16.mxu1 %v12613_v1 }
 0x294   :  { %5856 = vmatpush1.bf16.msra.mxu0 %v10975_v30  ;;  %v11067_v30 = vld [vmem:[#allocation6 + $0x924] ss:$144 sps:$4 sm:$0xff]  }
 0x295   :  { %5942 = vmatpush1.bf16.msra.mxu1 %v10978_v32  ;;  %5857 = vmatprep.subr.bf16.mxu0 %v10983_v33  ;;  %v11070_v32 = vld [vmem:[#allocation6 + $0x92c] ss:$144 sps:$4 sm:$0xff]   ;;  %v11065_v33 = vld [vmem:[#allocation6 + $0x920] ss:$144 sps:$4 sm:$0xff]  }
 0x296   :  { %5943 = vmatprep.subr.bf16.mxu1 %v10986_v34  ;;  %v11068_v34 = vld [vmem:[#allocation6 + $0x928] ss:$144 sps:$4 sm:$0xff]  }
 0x298   :  { %5858 = vmatpush1.bf16.msra.mxu0 %v10981_v35  ;;  %v11073_v35 = vld [vmem:[#allocation6 + $0xa44] ss:$144 sps:$4 sm:$0xff]  }
 0x299   :  { %5944 = vmatpush1.bf16.msra.mxu1 %v10984_v36  ;;  %5859 = vmatprep.subr.bf16.mxu0 %v10989_v37  ;;  %v11076_v36 = vld [vmem:[#allocation6 + $0xa4c] ss:$144 sps:$4 sm:$0xff]   ;;  %v11071_v37 = vld [vmem:[#allocation6 + $0xa40] ss:$144 sps:$4 sm:$0xff]  }
 0x29a   :  { %5945 = vmatprep.subr.bf16.mxu1 %v10992_v39  ;;  %v11079_v39 = vld [vmem:[#allocation6 + $0xb64] ss:$144 sps:$4 sm:$0xff]  }
 0x29c   :  { %5860 = vmatpush1.bf16.msra.mxu0 %v10987_v38  ;;  %v11074_v38 = vld [vmem:[#allocation6 + $0xa48] ss:$144 sps:$4 sm:$0xff]  }
 0x29d   :  { %5946 = vmatpush1.bf16.msra.mxu1 %v10990_v40  ;;  %5861 = vmatprep.subr.bf16.mxu0 %v10995_v41  ;;  %v11082_v40 = vld [vmem:[#allocation6 + $0xb6c] ss:$144 sps:$4 sm:$0xff]   ;;  %v11077_v41 = vld [vmem:[#allocation6 + $0xb60] ss:$144 sps:$4 sm:$0xff]  }
 0x29e   :  { %5947 = vmatprep.subr.bf16.mxu1 %v10998_v43  ;;  %v11085_v43 = vld [vmem:[#allocation6 + $0xc84] ss:$144 sps:$4 sm:$0xff]  }
 0x2a0   :  { %5862 = vmatpush1.bf16.msra.mxu0 %v10993_v42  ;;  %v11080_v42 = vld [vmem:[#allocation6 + $0xb68] ss:$144 sps:$4 sm:$0xff]  }
 0x2a1   :  { %5948 = vmatpush1.bf16.msra.mxu1 %v10996_v44  ;;  %5863 = vmatprep.subr.bf16.mxu0 %v11001_v45  ;;  %v11088_v44 = vld [vmem:[#allocation6 + $0xc8c] ss:$144 sps:$4 sm:$0xff]   ;;  %v11083_v45 = vld [vmem:[#allocation6 + $0xc80] ss:$144 sps:$4 sm:$0xff]  }
 0x2a2   :  { %5949 = vmatprep.subr.bf16.mxu1 %v11004_v46  ;;  %v11086_v46 = vld [vmem:[#allocation6 + $0xc88] ss:$144 sps:$4 sm:$0xff]  }
 0x2a4   :  { %5864 = vmatpush1.bf16.msra.mxu0 %v10999_v49  ;;  %v11091_v49 = vld [vmem:[#allocation6 + $0xda4] ss:$144 sps:$4 sm:$0xff]  }
 0x2a5   :  { %5950 = vmatpush1.bf16.msra.mxu1 %v11002_v50  ;;  %5865 = vmatprep.subr.bf16.mxu0 %v11007_v51  ;;  %v11094_v50 = vld [vmem:[#allocation6 + $0xdac] ss:$144 sps:$4 sm:$0xff]   ;;  %v11089_v51 = vld [vmem:[#allocation6 + $0xda0] ss:$144 sps:$4 sm:$0xff]  }
 0x2a6   :  { %5951 = vmatprep.subr.bf16.mxu1 %v11010_v52  ;;  %v11092_v52 = vld [vmem:[#allocation6 + $0xda8] ss:$144 sps:$4 sm:$0xff]  }
 0x2a8   :  { %5866 = vmatpush1.bf16.msra.mxu0 %v11005_v54  ;;  %v11097_v54 = vld [vmem:[#allocation6 + $0xec4] ss:$144 sps:$4 sm:$0xff]  }
 0x2a9   :  { %5952 = vmatpush1.bf16.msra.mxu1 %v11008_v55  ;;  %5867 = vmatprep.subr.bf16.mxu0 %v11013_v56  ;;  %v11100_v55 = vld [vmem:[#allocation6 + $0xecc] ss:$144 sps:$4 sm:$0xff]   ;;  %v11095_v56 = vld [vmem:[#allocation6 + $0xec0] ss:$144 sps:$4 sm:$0xff]  }
 0x2aa   :  { %5953 = vmatprep.subr.bf16.mxu1 %v11016_v57  ;;  %v11098_v57 = vld [vmem:[#allocation6 + $0xec8] ss:$144 sps:$4 sm:$0xff]  }
 0x2ac   :  { %5868 = vmatpush1.bf16.msra.mxu0 %v11011_v58  ;;  %v11103_v58 = vld [vmem:[#allocation6 + $0xfe4] ss:$144 sps:$4 sm:$0xff]  }
 0x2ad   :  { %5954 = vmatpush1.bf16.msra.mxu1 %v11014_v59  ;;  %5982 = vmatprep.subr.bf16.mxu0 %v11019_v60  ;;  %v11106_v59 = vld [vmem:[#allocation6 + $0xfec] ss:$144 sps:$4 sm:$0xff]   ;;  %v11101_v60 = vld [vmem:[#allocation6 + $0xfe0] ss:$144 sps:$4 sm:$0xff]  }
 0x2ae   :  { %6068 = vmatprep.subr.bf16.mxu1 %v11022_v61  ;;  %v11104_v61 = vld [vmem:[#allocation6 + $0xfe8] ss:$144 sps:$4 sm:$0xff]  }
 0x2af   :  { %5886 = vmatmul.mubr.bf16.vlgmr.msra.gmra.mrb[8].mxu0 %v12877_v48 }
 0x2b0   :  { %5972 = vmatmul.mubr.bf16.vlgmr.msra.gmra.mrb[8].mxu1 %v12877_v48  ;;  %5983 = vmatpush1.bf16.msra.mxu0 %v11017_v62  ;;  %v11109_v62 = vld [vmem:[#allocation6 + $0x1104] ss:$144 sps:$4 sm:$0xff]  }
 0x2b1   :  { %6014 = vmatprep.mubr.bf16.mxu0 %v12879_v53  ;;  %6069 = vmatpush1.bf16.msra.mxu1 %v11020_v63  ;;  %v11112_v63 = vld [vmem:[#allocation6 + $0x110c] ss:$144 sps:$4 sm:$0xff]  }
 0x2b2   :  { %6100 = vmatprep.mubr.bf16.mxu1 %v12879_v53  ;;  %5984 = vmatprep.subr.bf16.mxu0 %v11025_v0  ;;  %v11107_v0 = vld [vmem:[#allocation6 + $0x1100] ss:$144 sps:$4 sm:$0xff]  }
 0x2b3   :  { %6070 = vmatprep.subr.bf16.mxu1 %v11028_v3  ;;  %v11110_v3 = vld [vmem:[#allocation6 + $0x1108] ss:$144 sps:$4 sm:$0xff]  }
 0x2b4   :  { %5985 = vmatpush1.bf16.msra.mxu0 %v11023_v4  ;;  %v11115_v4 = vld [vmem:[#allocation6 + $0x1224] ss:$144 sps:$4 sm:$0xff]  }
 0x2b5   :  { %6071 = vmatpush1.bf16.msra.mxu1 %v11026_v5  ;;  %5986 = vmatprep.subr.bf16.mxu0 %v11031_v6  ;;  %v11118_v5 = vld [vmem:[#allocation6 + $0x122c] ss:$144 sps:$4 sm:$0xff]   ;;  %v11113_v6 = vld [vmem:[#allocation6 + $0x1220] ss:$144 sps:$4 sm:$0xff]  }
 0x2b6   :  { %6072 = vmatprep.subr.bf16.mxu1 %v11034_v7  ;;  %v11116_v7 = vld [vmem:[#allocation6 + $0x1228] ss:$144 sps:$4 sm:$0xff]  }
 0x2b8   :  { %5987 = vmatpush1.bf16.msra.mxu0 %v11029_v8  ;;  %v11121_v8 = vld [vmem:[#allocation6 + $0x1344] ss:$144 sps:$4 sm:$0xff]  }
 0x2b9   :  { %6073 = vmatpush1.bf16.msra.mxu1 %v11032_v9  ;;  %5988 = vmatprep.subr.bf16.mxu0 %v11037_v10  ;;  %v11124_v9 = vld [vmem:[#allocation6 + $0x134c] ss:$144 sps:$4 sm:$0xff]   ;;  %v11119_v10 = vld [vmem:[#allocation6 + $0x1340] ss:$144 sps:$4 sm:$0xff]  }
 0x2ba   :  { %6074 = vmatprep.subr.bf16.mxu1 %v11040_v11  ;;  %v11122_v11 = vld [vmem:[#allocation6 + $0x1348] ss:$144 sps:$4 sm:$0xff]  }
 0x2bc   :  { %5989 = vmatpush1.bf16.msra.mxu0 %v11035_v12  ;;  %v11127_v12 = vld [vmem:[#allocation6 + $0x1464] ss:$144 sps:$4 sm:$0xff]  }
 0x2bd   :  { %6075 = vmatpush1.bf16.msra.mxu1 %v11038_v13  ;;  %5990 = vmatprep.subr.bf16.mxu0 %v11043_v14  ;;  %v11130_v13 = vld [vmem:[#allocation6 + $0x146c] ss:$144 sps:$4 sm:$0xff]   ;;  %v11125_v14 = vld [vmem:[#allocation6 + $0x1460] ss:$144 sps:$4 sm:$0xff]  }
 0x2be   :  { %6076 = vmatprep.subr.bf16.mxu1 %v11046_v15  ;;  %v11128_v15 = vld [vmem:[#allocation6 + $0x1468] ss:$144 sps:$4 sm:$0xff]  }
 0x2c0   :  { %5991 = vmatpush1.bf16.msra.mxu0 %v11041_v16  ;;  %v11133_v16 = vld [vmem:[#allocation6 + $0x1584] ss:$144 sps:$4 sm:$0xff]  }
 0x2c1   :  { %6077 = vmatpush1.bf16.msra.mxu1 %v11044_v17  ;;  %5992 = vmatprep.subr.bf16.mxu0 %v11049_v18  ;;  %v11136_v17 = vld [vmem:[#allocation6 + $0x158c] ss:$144 sps:$4 sm:$0xff]   ;;  %v11131_v18 = vld [vmem:[#allocation6 + $0x1580] ss:$144 sps:$4 sm:$0xff]  }
 0x2c2   :  { %6078 = vmatprep.subr.bf16.mxu1 %v11052_v19  ;;  %v11134_v19 = vld [vmem:[#allocation6 + $0x1588] ss:$144 sps:$4 sm:$0xff]  }
 0x2c4   :  { %5993 = vmatpush1.bf16.msra.mxu0 %v11047_v20  ;;  %v11139_v20 = vld [vmem:[#allocation6 + $0x16a4] ss:$144 sps:$4 sm:$0xff]  }
 0x2c5   :  { %6079 = vmatpush1.bf16.msra.mxu1 %v11050_v21  ;;  %5994 = vmatprep.subr.bf16.mxu0 %v11055_v22  ;;  %v11142_v21 = vld [vmem:[#allocation6 + $0x16ac] ss:$144 sps:$4 sm:$0xff]   ;;  %v11137_v22 = vld [vmem:[#allocation6 + $0x16a0] ss:$144 sps:$4 sm:$0xff]  }
 0x2c6   :  { %6080 = vmatprep.subr.bf16.mxu1 %v11058_v23  ;;  %v11140_v23 = vld [vmem:[#allocation6 + $0x16a8] ss:$144 sps:$4 sm:$0xff]  }
 0x2c8   :  { %5995 = vmatpush1.bf16.msra.mxu0 %v11053_v24  ;;  %v11145_v24 = vld [vmem:[#allocation6 + $0x17c4] ss:$144 sps:$4 sm:$0xff]  }
 0x2c9   :  { %6081 = vmatpush1.bf16.msra.mxu1 %v11056_v25  ;;  %5996 = vmatprep.subr.bf16.mxu0 %v11061_v26  ;;  %v11148_v25 = vld [vmem:[#allocation6 + $0x17cc] ss:$144 sps:$4 sm:$0xff]   ;;  %v11143_v26 = vld [vmem:[#allocation6 + $0x17c0] ss:$144 sps:$4 sm:$0xff]  }
 0x2ca   :  { %6082 = vmatprep.subr.bf16.mxu1 %v11064_v27  ;;  %v11146_v27 = vld [vmem:[#allocation6 + $0x17c8] ss:$144 sps:$4 sm:$0xff]  }
 0x2cc   :  { %5997 = vmatpush1.bf16.msra.mxu0 %v11059_v28  ;;  %v11151_v28 = vld [vmem:[#allocation6 + $0x18e4] ss:$144 sps:$4 sm:$0xff]  }
 0x2cd   :  { %6083 = vmatpush1.bf16.msra.mxu1 %v11062_v29  ;;  %5998 = vmatprep.subr.bf16.mxu0 %v11067_v30  ;;  %v11154_v29 = vld [vmem:[#allocation6 + $0x18ec] ss:$144 sps:$4 sm:$0xff]   ;;  %v11149_v30 = vld [vmem:[#allocation6 + $0x18e0] ss:$144 sps:$4 sm:$0xff]  }
 0x2ce   :  { %6084 = vmatprep.subr.bf16.mxu1 %v11070_v32  ;;  %v11152_v32 = vld [vmem:[#allocation6 + $0x18e8] ss:$144 sps:$4 sm:$0xff]  }
 0x2d0   :  { %5999 = vmatpush1.bf16.msra.mxu0 %v11065_v33  ;;  %v11157_v33 = vld [vmem:[#allocation6 + $0x1a04] ss:$144 sps:$4 sm:$0xff]  }
 0x2d1   :  { %6085 = vmatpush1.bf16.msra.mxu1 %v11068_v34  ;;  %6000 = vmatprep.subr.bf16.mxu0 %v11073_v35  ;;  %v11160_v34 = vld [vmem:[#allocation6 + $0x1a0c] ss:$144 sps:$4 sm:$0xff]   ;;  %v11155_v35 = vld [vmem:[#allocation6 + $0x1a00] ss:$144 sps:$4 sm:$0xff]  }
 0x2d2   :  { %6086 = vmatprep.subr.bf16.mxu1 %v11076_v36  ;;  %v11158_v36 = vld [vmem:[#allocation6 + $0x1a08] ss:$144 sps:$4 sm:$0xff]  }
 0x2d4   :  { %6001 = vmatpush1.bf16.msra.mxu0 %v11071_v37  ;;  %v11163_v37 = vld [vmem:[#allocation6 + $0x34] ss:$144 sps:$4 sm:$0xff]  }
 0x2d5   :  { %6087 = vmatpush1.bf16.msra.mxu1 %v11074_v38  ;;  %6002 = vmatprep.subr.bf16.mxu0 %v11079_v39  ;;  %v11166_v38 = vld [vmem:[#allocation6 + $0x3c] ss:$144 sps:$4 sm:$0xff]   ;;  %v11161_v39 = vld [vmem:[#allocation6 + $0x30] ss:$144 sps:$4 sm:$0xff]  }
 0x2d6   :  { %6088 = vmatprep.subr.bf16.mxu1 %v11082_v40  ;;  %v11164_v40 = vld [vmem:[#allocation6 + $0x38] ss:$144 sps:$4 sm:$0xff]  }
 0x2d8   :  { %6003 = vmatpush1.bf16.msra.mxu0 %v11077_v41  ;;  %v11169_v41 = vld [vmem:[#allocation6 + $0x154] ss:$144 sps:$4 sm:$0xff]  }
 0x2d9   :  { %6089 = vmatpush1.bf16.msra.mxu1 %v11080_v42  ;;  %6004 = vmatprep.subr.bf16.mxu0 %v11085_v43  ;;  %v11172_v42 = vld [vmem:[#allocation6 + $0x15c] ss:$144 sps:$4 sm:$0xff]   ;;  %v11167_v43 = vld [vmem:[#allocation6 + $0x150] ss:$144 sps:$4 sm:$0xff]  }
 0x2da   :  { %6090 = vmatprep.subr.bf16.mxu1 %v11088_v44  ;;  %v11170_v44 = vld [vmem:[#allocation6 + $0x158] ss:$144 sps:$4 sm:$0xff]  }
 0x2dc   :  { %6005 = vmatpush1.bf16.msra.mxu0 %v11083_v45  ;;  %v11175_v45 = vld [vmem:[#allocation6 + $0x274] ss:$144 sps:$4 sm:$0xff]  }
 0x2dd   :  { %6091 = vmatpush1.bf16.msra.mxu1 %v11086_v46  ;;  %6006 = vmatprep.subr.bf16.mxu0 %v11091_v49  ;;  %v11178_v46 = vld [vmem:[#allocation6 + $0x27c] ss:$144 sps:$4 sm:$0xff]   ;;  %v11173_v49 = vld [vmem:[#allocation6 + $0x270] ss:$144 sps:$4 sm:$0xff]  }
 0x2de   :  { %6092 = vmatprep.subr.bf16.mxu1 %v11094_v50  ;;  %v11176_v50 = vld [vmem:[#allocation6 + $0x278] ss:$144 sps:$4 sm:$0xff]  }
 0x2e0   :  { %6007 = vmatpush1.bf16.msra.mxu0 %v11089_v51  ;;  %v11181_v51 = vld [vmem:[#allocation6 + $0x394] ss:$144 sps:$4 sm:$0xff]  }
 0x2e1   :  { %6093 = vmatpush1.bf16.msra.mxu1 %v11092_v52  ;;  %6008 = vmatprep.subr.bf16.mxu0 %v11097_v54  ;;  %v11184_v52 = vld [vmem:[#allocation6 + $0x39c] ss:$144 sps:$4 sm:$0xff]   ;;  %v11179_v54 = vld [vmem:[#allocation6 + $0x390] ss:$144 sps:$4 sm:$0xff]  }
 0x2e2   :  { %6094 = vmatprep.subr.bf16.mxu1 %v11100_v55  ;;  %v11182_v55 = vld [vmem:[#allocation6 + $0x398] ss:$144 sps:$4 sm:$0xff]  }
 0x2e4   :  { %6009 = vmatpush1.bf16.msra.mxu0 %v11095_v56  ;;  %v11187_v56 = vld [vmem:[#allocation6 + $0x4b4] ss:$144 sps:$4 sm:$0xff]  }
 0x2e5   :  { %6095 = vmatpush1.bf16.msra.mxu1 %v11098_v57  ;;  %6010 = vmatprep.subr.bf16.mxu0 %v11103_v58  ;;  %v11190_v57 = vld [vmem:[#allocation6 + $0x4bc] ss:$144 sps:$4 sm:$0xff]   ;;  %v11185_v58 = vld [vmem:[#allocation6 + $0x4b0] ss:$144 sps:$4 sm:$0xff]  }
 0x2e6   :  { %6096 = vmatprep.subr.bf16.mxu1 %v11106_v59  ;;  %v11188_v59 = vld [vmem:[#allocation6 + $0x4b8] ss:$144 sps:$4 sm:$0xff]  }
 0x2e8   :  { %6011 = vmatpush1.bf16.msra.mxu0 %v11101_v60  ;;  %v11193_v60 = vld [vmem:[#allocation6 + $0x5d4] ss:$144 sps:$4 sm:$0xff]  }
 0x2e9   :  { %6097 = vmatpush1.bf16.msra.mxu1 %v11104_v61  ;;  %6012 = vmatprep.subr.bf16.mxu0 %v11109_v62  ;;  %v11196_v61 = vld [vmem:[#allocation6 + $0x5dc] ss:$144 sps:$4 sm:$0xff]   ;;  %v11191_v62 = vld [vmem:[#allocation6 + $0x5d0] ss:$144 sps:$4 sm:$0xff]  }
 0x2ea   :  { %6098 = vmatprep.subr.bf16.mxu1 %v11112_v63  ;;  %v11194_v63 = vld [vmem:[#allocation6 + $0x5d8] ss:$144 sps:$4 sm:$0xff]  }
 0x2ec   :  { %6013 = vmatpush1.bf16.msra.mxu0 %v11107_v0  ;;  %v11199_v0 = vld [vmem:[#allocation6 + $0x6f4] ss:$144 sps:$4 sm:$0xff]  }
 0x2ed   :  { %6099 = vmatpush1.bf16.msra.mxu1 %v11110_v3  ;;  %6025 = vmatprep.subr.bf16.mxu0 %v11115_v4 }
 0x2ee   :  { %6111 = vmatprep.subr.bf16.mxu1 %v11118_v5  ;;  %v11202_v5 = vld [vmem:[#allocation6 + $0x6fc] ss:$144 sps:$4 sm:$0xff]  }
 0x2ef   :  { %6015 = vmatmul.mubr.bf16.vlgmr.msra.gmra.mrb[12].mxu0 %v12875_v47 }
 0x2f0   :  { %6101 = vmatmul.mubr.bf16.vlgmr.msra.gmra.mrb[12].mxu1 %v12875_v47  ;;  %6026 = vmatpush1.bf16.msra.mxu0 %v11113_v6 }
 0x2f1   :  { %6112 = vmatpush1.bf16.msra.mxu1 %v11116_v7  ;;  %6027 = vmatprep.subr.bf16.mxu0 %v11121_v8 }
 0x2f2   :  { %6113 = vmatprep.subr.bf16.mxu1 %v11124_v9  ;;  %6057 = vmatprep.mubr.bf16.mxu0 %v12613_v1 }
 0x2f3   :  { %6143 = vmatprep.mubr.bf16.mxu1 %v12613_v1 }
 0x2f4   :  { %6028 = vmatpush1.bf16.msra.mxu0 %v11119_v10  ;;  %v11197_v10 = vld [vmem:[#allocation6 + $0x6f0] ss:$144 sps:$4 sm:$0xff]  }
 0x2f5   :  { %6114 = vmatpush1.bf16.msra.mxu1 %v11122_v11  ;;  %6029 = vmatprep.subr.bf16.mxu0 %v11127_v12 }
 0x2f6   :  { %6115 = vmatprep.subr.bf16.mxu1 %v11130_v13  ;;  %v11200_v13 = vld [vmem:[#allocation6 + $0x6f8] ss:$144 sps:$4 sm:$0xff]  }
 0x2f8   :  { %6030 = vmatpush1.bf16.msra.mxu0 %v11125_v14  ;;  %v11205_v14 = vld [vmem:[#allocation6 + $0x814] ss:$144 sps:$4 sm:$0xff]  }
 0x2f9   :  { %6116 = vmatpush1.bf16.msra.mxu1 %v11128_v15  ;;  %6031 = vmatprep.subr.bf16.mxu0 %v11133_v16 }
 0x2fa   :  { %6117 = vmatprep.subr.bf16.mxu1 %v11136_v17  ;;  %v11208_v17 = vld [vmem:[#allocation6 + $0x81c] ss:$144 sps:$4 sm:$0xff]  }
 0x2fc   :  { %6032 = vmatpush1.bf16.msra.mxu0 %v11131_v18 }
 0x2fd   :  { %6118 = vmatpush1.bf16.msra.mxu1 %v11134_v19  ;;  %6033 = vmatprep.subr.bf16.mxu0 %v11139_v20  ;;  %v11203_v20 = vld [vmem:[#allocation6 + $0x810] ss:$144 sps:$4 sm:$0xff]  }
 0x2fe   :  { %6119 = vmatprep.subr.bf16.mxu1 %v11142_v21 }
 0x300   :  { %6034 = vmatpush1.bf16.msra.mxu0 %v11137_v22 }
 0x301   :  { %6120 = vmatpush1.bf16.msra.mxu1 %v11140_v23  ;;  %6035 = vmatprep.subr.bf16.mxu0 %v11145_v24  ;;  %v11206_v23 = vld [vmem:[#allocation6 + $0x818] ss:$144 sps:$4 sm:$0xff]   ;;  %v11211_v24 = vld [vmem:[#allocation6 + $0x934] ss:$144 sps:$4 sm:$0xff]  }
 0x302   :  { %6121 = vmatprep.subr.bf16.mxu1 %v11148_v25  ;;  %v11214_v25 = vld [vmem:[#allocation6 + $0x93c] ss:$144 sps:$4 sm:$0xff]  }
 0x304   :  { %6036 = vmatpush1.bf16.msra.mxu0 %v11143_v26  ;;  %v11209_v26 = vld [vmem:[#allocation6 + $0x930] ss:$144 sps:$4 sm:$0xff]  }
 0x305   :  { %6122 = vmatpush1.bf16.msra.mxu1 %v11146_v27  ;;  %6037 = vmatprep.subr.bf16.mxu0 %v11151_v28  ;;  %v11212_v27 = vld [vmem:[#allocation6 + $0x938] ss:$144 sps:$4 sm:$0xff]   ;;  %v11217_v28 = vld [vmem:[#allocation6 + $0xa54] ss:$144 sps:$4 sm:$0xff]  }
 0x306   :  { %6123 = vmatprep.subr.bf16.mxu1 %v11154_v29  ;;  %v11220_v29 = vld [vmem:[#allocation6 + $0xa5c] ss:$144 sps:$4 sm:$0xff]  }
 0x308   :  { %6038 = vmatpush1.bf16.msra.mxu0 %v11149_v30  ;;  %v11215_v30 = vld [vmem:[#allocation6 + $0xa50] ss:$144 sps:$4 sm:$0xff]  }
 0x309   :  { %6124 = vmatpush1.bf16.msra.mxu1 %v11152_v32  ;;  %6039 = vmatprep.subr.bf16.mxu0 %v11157_v33  ;;  %v11218_v32 = vld [vmem:[#allocation6 + $0xa58] ss:$144 sps:$4 sm:$0xff]   ;;  %v11223_v33 = vld [vmem:[#allocation6 + $0xb74] ss:$144 sps:$4 sm:$0xff]  }
 0x30a   :  { %6125 = vmatprep.subr.bf16.mxu1 %v11160_v34  ;;  %v11226_v34 = vld [vmem:[#allocation6 + $0xb7c] ss:$144 sps:$4 sm:$0xff]  }
 0x30c   :  { %6040 = vmatpush1.bf16.msra.mxu0 %v11155_v35  ;;  %v11221_v35 = vld [vmem:[#allocation6 + $0xb70] ss:$144 sps:$4 sm:$0xff]  }
 0x30d   :  { %6126 = vmatpush1.bf16.msra.mxu1 %v11158_v36  ;;  %6154 = vmatprep.subr.bf16.mxu0 %v11163_v37  ;;  %v11224_v36 = vld [vmem:[#allocation6 + $0xb78] ss:$144 sps:$4 sm:$0xff]   ;;  %v11229_v37 = vld [vmem:[#allocation6 + $0xc94] ss:$144 sps:$4 sm:$0xff]  }
 0x30e   :  { %6240 = vmatprep.subr.bf16.mxu1 %v11166_v38  ;;  %v11232_v38 = vld [vmem:[#allocation6 + $0xc9c] ss:$144 sps:$4 sm:$0xff]  }
 0x30f   :  { %6058 = vmatmul.mubr.bf16.vlgmr.msra.gmra.mrb[12].mxu0 %v12877_v48 }
 0x310   :  { %6144 = vmatmul.mubr.bf16.vlgmr.msra.gmra.mrb[12].mxu1 %v12877_v48  ;;  %6155 = vmatpush1.bf16.msra.mxu0 %v11161_v39  ;;  %v11227_v39 = vld [vmem:[#allocation6 + $0xc90] ss:$144 sps:$4 sm:$0xff]  }
 0x311   :  { %6186 = vmatprep.mubr.bf16.mxu0 %v12879_v53  ;;  %6241 = vmatpush1.bf16.msra.mxu1 %v11164_v40  ;;  %v11230_v40 = vld [vmem:[#allocation6 + $0xc98] ss:$144 sps:$4 sm:$0xff]  }
 0x312   :  { %6272 = vmatprep.mubr.bf16.mxu1 %v12879_v53  ;;  %6156 = vmatprep.subr.bf16.mxu0 %v11169_v41  ;;  %v11235_v41 = vld [vmem:[#allocation6 + $0xdb4] ss:$144 sps:$4 sm:$0xff]  }
 0x313   :  { %6242 = vmatprep.subr.bf16.mxu1 %v11172_v42  ;;  %v11238_v42 = vld [vmem:[#allocation6 + $0xdbc] ss:$144 sps:$4 sm:$0xff]  }
 0x314   :  { %6157 = vmatpush1.bf16.msra.mxu0 %v11167_v43  ;;  %v11233_v43 = vld [vmem:[#allocation6 + $0xdb0] ss:$144 sps:$4 sm:$0xff]  }
 0x315   :  { %6243 = vmatpush1.bf16.msra.mxu1 %v11170_v44  ;;  %6158 = vmatprep.subr.bf16.mxu0 %v11175_v45  ;;  %v11236_v44 = vld [vmem:[#allocation6 + $0xdb8] ss:$144 sps:$4 sm:$0xff]   ;;  %v11241_v45 = vld [vmem:[#allocation6 + $0xed4] ss:$144 sps:$4 sm:$0xff]  }
 0x316   :  { %6244 = vmatprep.subr.bf16.mxu1 %v11178_v46  ;;  %v11244_v46 = vld [vmem:[#allocation6 + $0xedc] ss:$144 sps:$4 sm:$0xff]  }
 0x318   :  { %6159 = vmatpush1.bf16.msra.mxu0 %v11173_v49  ;;  %v11239_v49 = vld [vmem:[#allocation6 + $0xed0] ss:$144 sps:$4 sm:$0xff]  }
 0x319   :  { %6245 = vmatpush1.bf16.msra.mxu1 %v11176_v50  ;;  %6160 = vmatprep.subr.bf16.mxu0 %v11181_v51  ;;  %v11242_v50 = vld [vmem:[#allocation6 + $0xed8] ss:$144 sps:$4 sm:$0xff]   ;;  %v11247_v51 = vld [vmem:[#allocation6 + $0xff4] ss:$144 sps:$4 sm:$0xff]  }
 0x31a   :  { %6246 = vmatprep.subr.bf16.mxu1 %v11184_v52  ;;  %v11250_v52 = vld [vmem:[#allocation6 + $0xffc] ss:$144 sps:$4 sm:$0xff]  }
 0x31c   :  { %6161 = vmatpush1.bf16.msra.mxu0 %v11179_v54  ;;  %v11245_v54 = vld [vmem:[#allocation6 + $0xff0] ss:$144 sps:$4 sm:$0xff]  }
 0x31d   :  { %6247 = vmatpush1.bf16.msra.mxu1 %v11182_v55  ;;  %6162 = vmatprep.subr.bf16.mxu0 %v11187_v56  ;;  %v11248_v55 = vld [vmem:[#allocation6 + $0xff8] ss:$144 sps:$4 sm:$0xff]   ;;  %v11253_v56 = vld [vmem:[#allocation6 + $0x1114] ss:$144 sps:$4 sm:$0xff]  }
 0x31e   :  { %6248 = vmatprep.subr.bf16.mxu1 %v11190_v57  ;;  %v11256_v57 = vld [vmem:[#allocation6 + $0x111c] ss:$144 sps:$4 sm:$0xff]  }
 0x320   :  { %6163 = vmatpush1.bf16.msra.mxu0 %v11185_v58  ;;  %v11251_v58 = vld [vmem:[#allocation6 + $0x1110] ss:$144 sps:$4 sm:$0xff]  }
 0x321   :  { %6249 = vmatpush1.bf16.msra.mxu1 %v11188_v59  ;;  %6164 = vmatprep.subr.bf16.mxu0 %v11193_v60  ;;  %v11254_v59 = vld [vmem:[#allocation6 + $0x1118] ss:$144 sps:$4 sm:$0xff]   ;;  %v11259_v60 = vld [vmem:[#allocation6 + $0x1234] ss:$144 sps:$4 sm:$0xff]  }
 0x322   :  { %v5715_v3 = vpop.f32.mrb[4].mxu0  ;;  %v12907_v4 = vpop.f32.mrb[4].mxu1  ;;  %6250 = vmatprep.subr.bf16.mxu1 %v11196_v61  ;;  %v11262_v61 = vld [vmem:[#allocation6 + $0x123c] ss:$144 sps:$4 sm:$0xff]  }
 0x323   :  { %v12909_v6 = vpop.f32.mrb[5].mxu0  ;;  %v5803_v7 = vpop.f32.mrb[5].mxu1 }
 0x324   :  { %v5719_v8 = vpop.f32.mrb[6].mxu0  ;;  %v12911_v9 = vpop.f32.mrb[6].mxu1  ;;  %6165 = vmatpush1.bf16.msra.mxu0 %v11191_v62  ;;  %v7195_v15 = vrot.slane %v5803_v7, 1  ;;  %v11257_v62 = vld [vmem:[#allocation6 + $0x1230] ss:$144 sps:$4 sm:$0xff]  }
 0x325   :  { %6251 = vmatpush1.bf16.msra.mxu1 %v11194_v63  ;;  %v12913_v11 = vpop.f32.mrb[7].mxu0  ;;  %v5807_v12 = vpop.f32.mrb[7].mxu1  ;;  %6166 = vmatprep.subr.bf16.mxu0 %v11199_v0  ;;  %v11260_v63 = vld [vmem:[#allocation6 + $0x1238] ss:$144 sps:$4 sm:$0xff]   ;;  %v11265_v0 = vld [vmem:[#allocation6 + $0x1354] ss:$144 sps:$4 sm:$0xff]  }
 0x326   :  { %v7196_v16 = vrot.slane %v5807_v12, 1  ;;  %6252 = vmatprep.subr.bf16.mxu1 %v11202_v5  ;;  %v11263_v5 = vld [vmem:[#allocation6 + $0x1350] ss:$144 sps:$4 sm:$0xff]   ;;  %v11266_v7 = vld [vmem:[#allocation6 + $0x1358] ss:$144 sps:$4 sm:$0xff]  }
 0x327   :  { %v11269_v12 = vld [vmem:[#allocation6 + $0x1470] ss:$144 sps:$4 sm:$0xff]  }
 0x328   :  { %v7197_v18 = vsel %vm7194_vm4, %v7195_v15, %v7196_v16  ;;  %v7213_v19 = vsel %vm7194_vm4, %v7196_v16, %v7195_v15  ;;  %6167 = vmatpush1.bf16.msra.mxu0 %v11197_v10  ;;  %v11274_v10 = vld [vmem:[#allocation6 + $0x147c] ss:$144 sps:$4 sm:$0xff]   ;;  %v11275_v16 = vld [vmem:[#allocation6 + $0x1590] ss:$144 sps:$4 sm:$0xff]  }
 0x329   :  { %v12917_v21 = vadd.f32 %v7197_v18, %v5715_v3  ;;  %v12919_v22 = vadd.f32 %v7213_v19, %v5719_v8  ;;  %6253 = vmatpush1.bf16.msra.mxu1 %v11200_v13  ;;  %6168 = vmatprep.subr.bf16.mxu0 %v11205_v14  ;;  %v11268_v3 = vld [vmem:[#allocation6 + $0x135c] ss:$144 sps:$4 sm:$0xff]   ;;  %v11271_v8 = vld [vmem:[#allocation6 + $0x1474] ss:$144 sps:$4 sm:$0xff]   ;;  %v11272_v13 = vld [vmem:[#allocation6 + $0x1478] ss:$144 sps:$4 sm:$0xff]  }
 0x32a   :  { %6254 = vmatprep.subr.bf16.mxu1 %v11208_v17  ;;  %v11277_v14 = vld [vmem:[#allocation6 + $0x1594] ss:$144 sps:$4 sm:$0xff]   ;;  %v11280_v15 = vld [vmem:[#allocation6 + $0x159c] ss:$144 sps:$4 sm:$0xff]   ;;  %v11278_v17 = vld [vmem:[#allocation6 + $0x1598] ss:$144 sps:$4 sm:$0xff]  }
 0x32b   :  { %v11283_v18 = vld [vmem:[#allocation6 + $0x16b4] ss:$144 sps:$4 sm:$0xff]   ;;  %v11286_v19 = vld [vmem:[#allocation6 + $0x16bc] ss:$144 sps:$4 sm:$0xff]  }
 0x32c   :  { %6169 = vmatpush1.bf16.msra.mxu0 %v11203_v20  ;;  %v11281_v20 = vld [vmem:[#allocation6 + $0x16b0] ss:$144 sps:$4 sm:$0xff]  }
 0x32d   :  { %6255 = vmatpush1.bf16.msra.mxu1 %v11206_v23  ;;  %6170 = vmatprep.subr.bf16.mxu0 %v11211_v24  ;;  %v11284_v23 = vld [vmem:[#allocation6 + $0x16b8] ss:$144 sps:$4 sm:$0xff]   ;;  %v11289_v24 = vld [vmem:[#allocation6 + $0x17d4] ss:$144 sps:$4 sm:$0xff]  }
 0x32e   :  { %6256 = vmatprep.subr.bf16.mxu1 %v11214_v25  ;;  %v11292_v25 = vld [vmem:[#allocation6 + $0x17dc] ss:$144 sps:$4 sm:$0xff]  }
 0x330   :  { %6171 = vmatpush1.bf16.msra.mxu0 %v11209_v26  ;;  %v11287_v26 = vld [vmem:[#allocation6 + $0x17d0] ss:$144 sps:$4 sm:$0xff]  }
 0x331   :  { %6257 = vmatpush1.bf16.msra.mxu1 %v11212_v27  ;;  %6172 = vmatprep.subr.bf16.mxu0 %v11217_v28  ;;  %v11290_v27 = vld [vmem:[#allocation6 + $0x17d8] ss:$144 sps:$4 sm:$0xff]   ;;  %v11295_v28 = vld [vmem:[#allocation6 + $0x18f4] ss:$144 sps:$4 sm:$0xff]  }
 0x332   :  { %6258 = vmatprep.subr.bf16.mxu1 %v11220_v29  ;;  %v11298_v29 = vld [vmem:[#allocation6 + $0x18fc] ss:$144 sps:$4 sm:$0xff]  }
 0x334   :  { %6173 = vmatpush1.bf16.msra.mxu0 %v11215_v30  ;;  %v11293_v30 = vld [vmem:[#allocation6 + $0x18f0] ss:$144 sps:$4 sm:$0xff]  }
 0x335   :  { %6259 = vmatpush1.bf16.msra.mxu1 %v11218_v32  ;;  %6174 = vmatprep.subr.bf16.mxu0 %v11223_v33  ;;  %v11296_v32 = vld [vmem:[#allocation6 + $0x18f8] ss:$144 sps:$4 sm:$0xff]   ;;  %v11301_v33 = vld [vmem:[#allocation6 + $0x1a14] ss:$144 sps:$4 sm:$0xff]  }
 0x336   :  { %6260 = vmatprep.subr.bf16.mxu1 %v11226_v34  ;;  %v11304_v34 = vld [vmem:[#allocation6 + $0x1a1c] ss:$144 sps:$4 sm:$0xff]  }
 0x338   :  { %6175 = vmatpush1.bf16.msra.mxu0 %v11221_v35  ;;  %v11299_v35 = vld [vmem:[#allocation6 + $0x1a10] ss:$144 sps:$4 sm:$0xff]  }
 0x339   :  { %6261 = vmatpush1.bf16.msra.mxu1 %v11224_v36  ;;  %6176 = vmatprep.subr.bf16.mxu0 %v11229_v37  ;;  %v11302_v36 = vld [vmem:[#allocation6 + $0x1a18] ss:$144 sps:$4 sm:$0xff]   ;;  %v11307_v37 = vld [vmem:[#allocation6 + $0x44] ss:$144 sps:$4 sm:$0xff]  }
 0x33a   :  { %6262 = vmatprep.subr.bf16.mxu1 %v11232_v38  ;;  %v11310_v38 = vld [vmem:[#allocation6 + $0x4c] ss:$144 sps:$4 sm:$0xff]  }
 0x33c   :  { %6177 = vmatpush1.bf16.msra.mxu0 %v11227_v39  ;;  %v11305_v39 = vld [vmem:[#allocation6 + $0x40] ss:$144 sps:$4 sm:$0xff]  }
 0x33d   :  { %6263 = vmatpush1.bf16.msra.mxu1 %v11230_v40  ;;  %6178 = vmatprep.subr.bf16.mxu0 %v11235_v41  ;;  %v11308_v40 = vld [vmem:[#allocation6 + $0x48] ss:$144 sps:$4 sm:$0xff]   ;;  %v11313_v41 = vld [vmem:[#allocation6 + $0x164] ss:$144 sps:$4 sm:$0xff]  }
 0x33e   :  { %6264 = vmatprep.subr.bf16.mxu1 %v11238_v42  ;;  %v11316_v42 = vld [vmem:[#allocation6 + $0x16c] ss:$144 sps:$4 sm:$0xff]  }
 0x340   :  { %6179 = vmatpush1.bf16.msra.mxu0 %v11233_v43  ;;  %v11311_v43 = vld [vmem:[#allocation6 + $0x160] ss:$144 sps:$4 sm:$0xff]  }
 0x341   :  { %6265 = vmatpush1.bf16.msra.mxu1 %v11236_v44  ;;  %6180 = vmatprep.subr.bf16.mxu0 %v11241_v45  ;;  %v11314_v44 = vld [vmem:[#allocation6 + $0x168] ss:$144 sps:$4 sm:$0xff]   ;;  %v11319_v45 = vld [vmem:[#allocation6 + $0x284] ss:$144 sps:$4 sm:$0xff]  }
 0x342   :  { %6266 = vmatprep.subr.bf16.mxu1 %v11244_v46  ;;  %v11322_v46 = vld [vmem:[#allocation6 + $0x28c] ss:$144 sps:$4 sm:$0xff]  }
 0x344   :  { %6181 = vmatpush1.bf16.msra.mxu0 %v11239_v49  ;;  %v11317_v49 = vld [vmem:[#allocation6 + $0x280] ss:$144 sps:$4 sm:$0xff]  }
 0x345   :  { %6267 = vmatpush1.bf16.msra.mxu1 %v11242_v50  ;;  %6182 = vmatprep.subr.bf16.mxu0 %v11247_v51  ;;  %v11320_v50 = vld [vmem:[#allocation6 + $0x288] ss:$144 sps:$4 sm:$0xff]   ;;  %v11325_v51 = vld [vmem:[#allocation6 + $0x3a4] ss:$144 sps:$4 sm:$0xff]  }
 0x346   :  { %6268 = vmatprep.subr.bf16.mxu1 %v11250_v52  ;;  %v11328_v52 = vld [vmem:[#allocation6 + $0x3ac] ss:$144 sps:$4 sm:$0xff]  }
 0x348   :  { %6183 = vmatpush1.bf16.msra.mxu0 %v11245_v54  ;;  %v11323_v54 = vld [vmem:[#allocation6 + $0x3a0] ss:$144 sps:$4 sm:$0xff]  }
 0x349   :  { %6269 = vmatpush1.bf16.msra.mxu1 %v11248_v55  ;;  %6184 = vmatprep.subr.bf16.mxu0 %v11253_v56  ;;  %v12930_v55 = vshrl.u32 %v192_v31, 7  ;;  %v11326_v56 = vld [vmem:[#allocation6 + $0x3a8] ss:$144 sps:$4 sm:$0xff]   ;;  %v11340_v31 = vld [vmem:[#allocation6 + $0x5ec] ss:$144 sps:$4 sm:$0xff]  }
 0x34a   :  { %6270 = vmatprep.subr.bf16.mxu1 %v11256_v57  ;;  %v11331_v57 = vld [vmem:[#allocation6 + $0x4c4] ss:$144 sps:$4 sm:$0xff]  }
 0x34b   :  { %vm7299_vm6 = vcmp.lt.s32.totalorder %v12930_v55, 6  ;;  %vm7487_vm9 = vcmp.lt.s32.totalorder %v12930_v55, 5  ;;  %vm7707_vm12 = vcmp.lt.s32.totalorder %v12930_v55, 4 }
 0x34c   :  { %6185 = vmatpush1.bf16.msra.mxu0 %v11251_v58  ;;  %v11334_v58 = vld [vmem:[#allocation6 + $0x4cc] ss:$144 sps:$4 sm:$0xff]  }
 0x34d   :  { %6271 = vmatpush1.bf16.msra.mxu1 %v11254_v59  ;;  %6197 = vmatprep.subr.bf16.mxu0 %v11259_v60  ;;  %v11329_v59 = vld [vmem:[#allocation6 + $0x4c0] ss:$144 sps:$4 sm:$0xff]   ;;  %v11332_v60 = vld [vmem:[#allocation6 + $0x4c8] ss:$144 sps:$4 sm:$0xff]  }
 0x34e   :  { %6283 = vmatprep.subr.bf16.mxu1 %v11262_v61  ;;  %v11337_v61 = vld [vmem:[#allocation6 + $0x5e4] ss:$144 sps:$4 sm:$0xff]  }
 0x34f   :  { %6187 = vmatmul.mubr.bf16.vlgmr.msra.gmra.mrb[16].mxu0 %v12875_v47 }
 0x350   :  { %6273 = vmatmul.mubr.bf16.vlgmr.msra.gmra.mrb[16].mxu1 %v12875_v47  ;;  %6198 = vmatpush1.bf16.msra.mxu0 %v11257_v62  ;;  %v12933_v62 = vsub.s32 0, %v12930_v55 }
 0x351   :  { %6284 = vmatpush1.bf16.msra.mxu1 %v11260_v63  ;;  %6199 = vmatprep.subr.bf16.mxu0 %v11265_v0  ;;  %v7264_v63 = vsub.s32 4, %v12930_v55  ;;  %v7186_v0 = vld [vmem:[#allocation8] sm:$0x77] }
 0x352   :  { %6285 = vmatprep.subr.bf16.mxu1 %v11268_v3  ;;  %6229 = vmatprep.mubr.bf16.mxu0 %v12613_v1  ;;  %v11335_v3 = vld [vmem:[#allocation6 + $0x5e0] ss:$144 sps:$4 sm:$0xff]  }
 0x353   :  { %6315 = vmatprep.mubr.bf16.mxu1 %v12613_v1 }
 0x354   :  { %6200 = vmatpush1.bf16.msra.mxu0 %v11263_v5  ;;  %v11338_v5 = vld [vmem:[#allocation6 + $0x5e8] ss:$144 sps:$4 sm:$0xff]  }
 0x355   :  { %6286 = vmatpush1.bf16.msra.mxu1 %v11266_v7  ;;  %6201 = vmatprep.subr.bf16.mxu0 %v11271_v8  ;;  %v7261_v7 = vrot.slane %v7186_v0, %v12933_v62  ;;  %v7265_v8 = vrot.slane %v7186_v0, %v7264_v63  ;;  %v11361_v0 = vld [vmem:[#allocation6 + $0xa64] ss:$144 sps:$4 sm:$0xff]  }
 0x356   :  { %6287 = vmatprep.subr.bf16.mxu1 %v11274_v10  ;;  %v11343_v10 = vld [vmem:[#allocation6 + $0x704] ss:$144 sps:$4 sm:$0xff]  }
 0x358   :  { %6202 = vmatpush1.bf16.msra.mxu0 %v11269_v12 }
 0x359   :  { %6288 = vmatpush1.bf16.msra.mxu1 %v11272_v13  ;;  %6203 = vmatprep.subr.bf16.mxu0 %v11277_v14  ;;  %v11346_v13 = vld [vmem:[#allocation6 + $0x70c] ss:$144 sps:$4 sm:$0xff]  }
 0x35a   :  { %6289 = vmatprep.subr.bf16.mxu1 %v11280_v15 }
 0x35c   :  { %6204 = vmatpush1.bf16.msra.mxu0 %v11275_v16 }
 0x35d   :  { %6290 = vmatpush1.bf16.msra.mxu1 %v11278_v17  ;;  %6205 = vmatprep.subr.bf16.mxu0 %v11283_v18  ;;  %v11341_v18 = vld [vmem:[#allocation6 + $0x700] ss:$144 sps:$4 sm:$0xff]  }
 0x35e   :  { %6291 = vmatprep.subr.bf16.mxu1 %v11286_v19  ;;  %v11344_v19 = vld [vmem:[#allocation6 + $0x708] ss:$144 sps:$4 sm:$0xff]  }
 0x360   :  { %6206 = vmatpush1.bf16.msra.mxu0 %v11281_v20 }
 0x361   :  { %6292 = vmatpush1.bf16.msra.mxu1 %v11284_v23  ;;  %6207 = vmatprep.subr.bf16.mxu0 %v11289_v24 }
 0x362   :  { %6293 = vmatprep.subr.bf16.mxu1 %v11292_v25  ;;  %v7276_v25 = vrot.slane %v7261_v7, %v12933_v62 }
 0x364   :  { %6208 = vmatpush1.bf16.msra.mxu0 %v11287_v26 }
 0x365   :  { %6294 = vmatpush1.bf16.msra.mxu1 %v11290_v27  ;;  %6209 = vmatprep.subr.bf16.mxu0 %v11295_v28  ;;  %v7280_v27 = vrot.slane %v7265_v8, %v12933_v62  ;;  %v11349_v28 = vld [vmem:[#allocation6 + $0x824] ss:$144 sps:$4 sm:$0xff]  }
 0x366   :  { %6295 = vmatprep.subr.bf16.mxu1 %v11298_v29 }
 0x368   :  { %6210 = vmatpush1.bf16.msra.mxu0 %v11293_v30 }
 0x369   :  { %6296 = vmatpush1.bf16.msra.mxu1 %v11296_v32  ;;  %6211 = vmatprep.subr.bf16.mxu0 %v11301_v33 }
 0x36a   :  { %6297 = vmatprep.subr.bf16.mxu1 %v11304_v34 }
 0x36c   :  { %6212 = vmatpush1.bf16.msra.mxu0 %v11299_v35 }
 0x36d   :  { %6298 = vmatpush1.bf16.msra.mxu1 %v11302_v36  ;;  %6326 = vmatprep.subr.bf16.mxu0 %v11307_v37 }
 0x36e   :  { %6412 = vmatprep.subr.bf16.mxu1 %v11310_v38 }
 0x36f   :  { %6230 = vmatmul.mubr.bf16.vlgmr.msra.gmra.mrb[16].mxu0 %v12877_v48 }
 0x370   :  { %6316 = vmatmul.mubr.bf16.vlgmr.msra.gmra.mrb[16].mxu1 %v12877_v48  ;;  %6327 = vmatpush1.bf16.msra.mxu0 %v11305_v39  ;;  %v11352_v39 = vld [vmem:[#allocation6 + $0x82c] ss:$144 sps:$4 sm:$0xff]  }
 0x371   :  { %6358 = vmatprep.mubr.bf16.mxu0 %v12879_v53  ;;  %6413 = vmatpush1.bf16.msra.mxu1 %v11308_v40 }
 0x372   :  { %6444 = vmatprep.mubr.bf16.mxu1 %v12879_v53  ;;  %6328 = vmatprep.subr.bf16.mxu0 %v11313_v41 }
 0x373   :  { %6414 = vmatprep.subr.bf16.mxu1 %v11316_v42 }
 0x374   :  { %6329 = vmatpush1.bf16.msra.mxu0 %v11311_v43 }
 0x375   :  { %6415 = vmatpush1.bf16.msra.mxu1 %v11314_v44  ;;  %6330 = vmatprep.subr.bf16.mxu0 %v11319_v45  ;;  %v11347_v44 = vld [vmem:[#allocation6 + $0x820] ss:$144 sps:$4 sm:$0xff]  }
 0x376   :  { %6416 = vmatprep.subr.bf16.mxu1 %v11322_v46 }
 0x378   :  { %6331 = vmatpush1.bf16.msra.mxu0 %v11317_v49 }
 0x379   :  { %6417 = vmatpush1.bf16.msra.mxu1 %v11320_v50  ;;  %6332 = vmatprep.subr.bf16.mxu0 %v11325_v51  ;;  %v11350_v51 = vld [vmem:[#allocation6 + $0x828] ss:$144 sps:$4 sm:$0xff]  }
 0x37a   :  { %6418 = vmatprep.subr.bf16.mxu1 %v11328_v52  ;;  %v11355_v52 = vld [vmem:[#allocation6 + $0x944] ss:$144 sps:$4 sm:$0xff]  }
 0x37c   :  { %6333 = vmatpush1.bf16.msra.mxu0 %v11323_v54 }
 0x37d   :  { %6419 = vmatpush1.bf16.msra.mxu1 %v11326_v56  ;;  %6334 = vmatprep.subr.bf16.mxu0 %v11331_v57 }
 0x37e   :  { %6420 = vmatprep.subr.bf16.mxu1 %v11334_v58 }
 0x380   :  { %6335 = vmatpush1.bf16.msra.mxu0 %v11329_v59 }
 0x381   :  { %6421 = vmatpush1.bf16.msra.mxu1 %v11332_v60  ;;  %6336 = vmatprep.subr.bf16.mxu0 %v11337_v61  ;;  %v11353_v60 = vld [vmem:[#allocation6 + $0x940] ss:$144 sps:$4 sm:$0xff]  }
 0x382   :  { %v5887_v12 = vpop.f32.mrb[8].mxu0  ;;  %6422 = vmatprep.subr.bf16.mxu1 %v11340_v31  ;;  %v11356_v31 = vld [vmem:[#allocation6 + $0x948] ss:$144 sps:$4 sm:$0xff]  }
 0x383   :  { %v5973_v14 = vpop.f32.mrb[8].mxu1  ;;  %v5889_v15 = vpop.f32.mrb[9].mxu0  ;;  %v7198_v20 = vrot.slane %v5887_v12, 1 }
 0x384   :  { %v5975_v16 = vpop.f32.mrb[9].mxu1  ;;  %v5891_v17 = vpop.f32.mrb[10].mxu0  ;;  %6337 = vmatpush1.bf16.msra.mxu0 %v11335_v3  ;;  %v7229_v29 = vrot.slane %v5973_v14, 2  ;;  %v7201_v30 = vrot.slane %v5889_v15, 1  ;;  %v11364_v3 = vld [vmem:[#allocation6 + $0xa6c] ss:$144 sps:$4 sm:$0xff]  }
 0x385   :  { %v7199_v23 = vrot.slane %v5891_v17, 1  ;;  %v5977_v24 = vpop.f32.mrb[10].mxu1  ;;  %6423 = vmatpush1.bf16.msra.mxu1 %v11338_v5  ;;  %v5893_v26 = vpop.f32.mrb[11].mxu0  ;;  %6338 = vmatprep.subr.bf16.mxu0 %v11343_v10  ;;  %v7232_v35 = vrot.slane %v5975_v16, 2  ;;  %v11359_v14 = vld [vmem:[#allocation6 + $0xa60] ss:$144 sps:$4 sm:$0xff]  }
 0x386   :  { %v7230_v32 = vrot.slane %v5977_v24, 2  ;;  %v7202_v33 = vrot.slane %v5893_v26, 1  ;;  %v5979_v34 = vpop.f32.mrb[11].mxu1  ;;  %6424 = vmatprep.subr.bf16.mxu1 %v11346_v13  ;;  %v11362_v17 = vld [vmem:[#allocation6 + $0xa68] ss:$144 sps:$4 sm:$0xff]  }
 0x387   :  { %v7200_v36 = vsel %vm7194_vm4, %v7198_v20, %v7199_v23  ;;  %v7214_v37 = vsel %vm7194_vm4, %v7199_v23, %v7198_v20  ;;  %v7233_v38 = vrot.slane %v5979_v34, 2 }
 0x388   :  { %v7217_v40 = vadd.f32 %v7200_v36, %v12909_v6  ;;  %v7220_v41 = vadd.f32 %v7214_v37, %v12913_v11  ;;  %v7231_v42 = vsel %vm7228_vm5, %v7229_v29, %v7230_v32  ;;  %v7247_v43 = vsel %vm7228_vm5, %v7230_v32, %v7229_v29  ;;  %6339 = vmatpush1.bf16.msra.mxu0 %v11341_v18  ;;  %v11367_v18 = vld [vmem:[#allocation6 + $0xb84] ss:$144 sps:$4 sm:$0xff]   ;;  %v11368_v32 = vld [vmem:[#allocation6 + $0xb88] ss:$144 sps:$4 sm:$0xff]  }
 0x389   :  { %v7250_v45 = vadd.f32 %v7231_v42, %v12917_v21  ;;  %v7253_v46 = vadd.f32 %v7247_v43, %v12919_v22  ;;  %v7203_v49 = vsel %vm7194_vm4, %v7201_v30, %v7202_v33  ;;  %v7215_v50 = vsel %vm7194_vm4, %v7202_v33, %v7201_v30  ;;  %6425 = vmatpush1.bf16.msra.mxu1 %v11344_v19  ;;  %v11358_v21 = vld [vmem:[#allocation6 + $0x94c] ss:$144 sps:$4 sm:$0xff]   ;;  %v11365_v30 = vld [vmem:[#allocation6 + $0xb80] ss:$144 sps:$4 sm:$0xff]   ;;  %v11373_v33 = vld [vmem:[#allocation6 + $0xca4] ss:$144 sps:$4 sm:$0xff]  }
 0x38a   :  { %v12950_v6 = vadd.f32 %v7203_v49, %v12907_v4  ;;  %v12953_v11 = vadd.f32 %v7215_v50, %v12911_v9  ;;  %v7234_v54 = vsel %vm7228_vm5, %v7232_v35, %v7233_v38  ;;  %v7248_v56 = vsel %vm7228_vm5, %v7233_v38, %v7232_v35  ;;  %6340 = vmatprep.subr.bf16.mxu0 %v11349_v28  ;;  %v11376_v38 = vld [vmem:[#allocation6 + $0xcac] ss:$144 sps:$4 sm:$0xff]   ;;  %v11371_v43 = vld [vmem:[#allocation6 + $0xca0] ss:$144 sps:$4 sm:$0xff]  }
 0x38b   :  { %v7285_v22 = vadd.f32 %v7276_v25, %v7250_v45  ;;  %v7288_v57 = vadd.f32 %v7276_v25, %v7253_v46  ;;  %v7251_v58 = vadd.f32 %v7234_v54, %v7217_v40  ;;  %v7254_v59 = vadd.f32 %v7248_v56, %v7220_v41  ;;  %6426 = vmatprep.subr.bf16.mxu1 %v11352_v39  ;;  %v11370_v25 = vld [vmem:[#allocation6 + $0xb8c] ss:$144 sps:$4 sm:$0xff]   ;;  %v11379_v45 = vld [vmem:[#allocation6 + $0xdc4] ss:$144 sps:$4 sm:$0xff]   ;;  %v11377_v54 = vld [vmem:[#allocation6 + $0xdc0] ss:$144 sps:$4 sm:$0xff]  }
 0x38c   :  { %6341 = vmatpush1.bf16.msra.mxu0 %v11347_v44  ;;  %v11374_v44 = vld [vmem:[#allocation6 + $0xca8] ss:$144 sps:$4 sm:$0xff]   ;;  %v11382_v50 = vld [vmem:[#allocation6 + $0xdcc] ss:$144 sps:$4 sm:$0xff]  }
 0x38d   :  { %v7291_v4 = vmax.f32 %v7285_v22, 0.0  ;;  %v7294_v61 = vmax.f32 %v7288_v57, 0.0  ;;  %v7286_v63 = vadd.f32 %v7280_v27, %v7251_v58  ;;  %v7289_v9 = vadd.f32 %v7280_v27, %v7254_v59  ;;  %6427 = vmatpush1.bf16.msra.mxu1 %v11350_v51  ;;  %6342 = vmatprep.subr.bf16.mxu0 %v11355_v52  ;;  %v11380_v57 = vld [vmem:[#allocation6 + $0xdc8] ss:$144 sps:$4 sm:$0xff]   ;;  %v11385_v58 = vld [vmem:[#allocation6 + $0xee4] ss:$144 sps:$4 sm:$0xff]  }
 0x38e   :  { %6428 = vmatprep.subr.bf16.mxu1 %v11358_v21  ;;  %v11388_v59 = vld [vmem:[#allocation6 + $0xeec] ss:$144 sps:$4 sm:$0xff]  }
 0x38f   :  { %v7302_v5 = vsel %vm7299_vm6, %v7291_v4, 0.0  ;;  %v7323_v7 = vsel %vm7299_vm6, %v7294_v61, 0.0  ;;  %v7292_v8 = vmax.f32 %v7286_v63, 0.0  ;;  %v7295_v10 = vmax.f32 %v7289_v9, 0.0  ;;  %v11383_v4 = vld [vmem:[#allocation6 + $0xee0] ss:$144 sps:$4 sm:$0xff]  }
 0x390   :  { %v7305_v12 = vrot.slane %v7302_v5, 4  ;;  %v7326_v13 = vrot.slane %v7323_v7, 4  ;;  %6343 = vmatpush1.bf16.msra.mxu0 %v11353_v60  ;;  %v11386_v61 = vld [vmem:[#allocation6 + $0xee8] ss:$144 sps:$4 sm:$0xff]   ;;  %v11391_v63 = vld [vmem:[#allocation6 + $0x1004] ss:$144 sps:$4 sm:$0xff]  }
 0x391   :  { %v7303_v15 = vsel %vm7299_vm6, %v7292_v8, 0.0  ;;  %v7324_v16 = vsel %vm7299_vm6, %v7295_v10, 0.0  ;;  %6429 = vmatpush1.bf16.msra.mxu1 %v11356_v31  ;;  %6344 = vmatprep.subr.bf16.mxu0 %v11361_v0  ;;  %v11394_v9 = vld [vmem:[#allocation6 + $0x100c] ss:$144 sps:$4 sm:$0xff]   ;;  %v11389_v31 = vld [vmem:[#allocation6 + $0x1000] ss:$144 sps:$4 sm:$0xff]  }
 0x392   :  { %v7306_v19 = vmax.f32 %v7302_v5, %v7305_v12  ;;  %v7327_v20 = vmax.f32 %v7323_v7, %v7326_v13  ;;  %v7311_v23 = vrot.slane %v7303_v15, 4  ;;  %v7332_v24 = vrot.slane %v7324_v16, 4  ;;  %6430 = vmatprep.subr.bf16.mxu1 %v11364_v3  ;;  %v11392_v0 = vld [vmem:[#allocation6 + $0x1008] ss:$144 sps:$4 sm:$0xff]   ;;  %v11397_v3 = vld [vmem:[#allocation6 + $0x1124] ss:$144 sps:$4 sm:$0xff]  }
 0x393   :  { %v11400_v5 = vld [vmem:[#allocation6 + $0x112c] ss:$144 sps:$4 sm:$0xff]   ;;  %v11395_v7 = vld [vmem:[#allocation6 + $0x1120] ss:$144 sps:$4 sm:$0xff]   ;;  %v11398_v8 = vld [vmem:[#allocation6 + $0x1128] ss:$144 sps:$4 sm:$0xff]  }
 0x394   :  { %v7307_v26 = vrot.slane %v7306_v19, 2  ;;  %v7328_v27 = vrot.slane %v7327_v20, 2  ;;  %v7312_v28 = vmax.f32 %v7303_v15, %v7311_v23  ;;  %v7333_v29 = vmax.f32 %v7324_v16, %v7332_v24  ;;  %6345 = vmatpush1.bf16.msra.mxu0 %v11359_v14  ;;  %v11403_v10 = vld [vmem:[#allocation6 + $0x1244] ss:$144 sps:$4 sm:$0xff]   ;;  %v11406_v12 = vld [vmem:[#allocation6 + $0x124c] ss:$144 sps:$4 sm:$0xff]  }
 0x395   :  { %6431 = vmatpush1.bf16.msra.mxu1 %v11362_v17  ;;  %6346 = vmatprep.subr.bf16.mxu0 %v11367_v18  ;;  %v11401_v13 = vld [vmem:[#allocation6 + $0x1240] ss:$144 sps:$4 sm:$0xff]   ;;  %v11404_v14 = vld [vmem:[#allocation6 + $0x1248] ss:$144 sps:$4 sm:$0xff]   ;;  %v11409_v15 = vld [vmem:[#allocation6 + $0x1364] ss:$144 sps:$4 sm:$0xff]  }
 0x396   :  { %v7308_v34 = vmax.f32 %v7306_v19, %v7307_v26  ;;  %v7329_v35 = vmax.f32 %v7327_v20, %v7328_v27  ;;  %v7313_v36 = vrot.slane %v7312_v28, 2  ;;  %v7334_v37 = vrot.slane %v7333_v29, 2  ;;  %6432 = vmatprep.subr.bf16.mxu1 %v11370_v25  ;;  %v11412_v16 = vld [vmem:[#allocation6 + $0x136c] ss:$144 sps:$4 sm:$0xff]   ;;  %v11407_v17 = vld [vmem:[#allocation6 + $0x1360] ss:$144 sps:$4 sm:$0xff]  }
 0x397   :  { %v11410_v18 = vld [vmem:[#allocation6 + $0x1368] ss:$144 sps:$4 sm:$0xff]   ;;  %v11415_v19 = vld [vmem:[#allocation6 + $0x1484] ss:$144 sps:$4 sm:$0xff]   ;;  %v11418_v20 = vld [vmem:[#allocation6 + $0x148c] ss:$144 sps:$4 sm:$0xff]  }
 0x398   :  { %v7309_v39 = vrot.slane %v7308_v34, 1  ;;  %v7330_v40 = vrot.slane %v7329_v35, 1  ;;  %v7314_v41 = vmax.f32 %v7312_v28, %v7313_v36  ;;  %v7335_v42 = vmax.f32 %v7333_v29, %v7334_v37  ;;  %6347 = vmatpush1.bf16.msra.mxu0 %v11365_v30  ;;  %v11413_v23 = vld [vmem:[#allocation6 + $0x1480] ss:$144 sps:$4 sm:$0xff]   ;;  %v11416_v24 = vld [vmem:[#allocation6 + $0x1488] ss:$144 sps:$4 sm:$0xff]  }
 0x399   :  { %6433 = vmatpush1.bf16.msra.mxu1 %v11368_v32  ;;  %6348 = vmatprep.subr.bf16.mxu0 %v11373_v33  ;;  %v11421_v25 = vld [vmem:[#allocation6 + $0x15a4] ss:$144 sps:$4 sm:$0xff]   ;;  %v11424_v26 = vld [vmem:[#allocation6 + $0x15ac] ss:$144 sps:$4 sm:$0xff]   ;;  %v11419_v27 = vld [vmem:[#allocation6 + $0x15a0] ss:$144 sps:$4 sm:$0xff]  }
 0x39a   :  { %v7310_v46 = vmax.f32 %v7308_v34, %v7309_v39  ;;  %v7331_v49 = vmax.f32 %v7329_v35, %v7330_v40  ;;  %6434 = vmatprep.subr.bf16.mxu1 %v11376_v38  ;;  %v7315_v51 = vrot.slane %v7314_v41, 1  ;;  %v7336_v52 = vrot.slane %v7335_v42, 1  ;;  %v11422_v28 = vld [vmem:[#allocation6 + $0x15a8] ss:$144 sps:$4 sm:$0xff]   ;;  %v11427_v29 = vld [vmem:[#allocation6 + $0x16c4] ss:$144 sps:$4 sm:$0xff]  }
 0x39b   :  { %v11430_v30 = vld [vmem:[#allocation6 + $0x16cc] ss:$144 sps:$4 sm:$0xff]   ;;  %v11425_v32 = vld [vmem:[#allocation6 + $0x16c0] ss:$144 sps:$4 sm:$0xff]   ;;  %v11428_v33 = vld [vmem:[#allocation6 + $0x16c8] ss:$144 sps:$4 sm:$0xff]  }
 0x39c   :  { %6349 = vmatpush1.bf16.msra.mxu0 %v11371_v43  ;;  %v7316_v56 = vmax.f32 %v7314_v41, %v7315_v51  ;;  %v7337_v21 = vmax.f32 %v7335_v42, %v7336_v52  ;;  %v12967_v22 = vsel %vm7344_vm7, %v7310_v46, %v7331_v49  ;;  %v11433_v34 = vld [vmem:[#allocation6 + $0x17e4] ss:$144 sps:$4 sm:$0xff]   ;;  %v11436_v35 = vld [vmem:[#allocation6 + $0x17ec] ss:$144 sps:$4 sm:$0xff]   ;;  %v11431_v36 = vld [vmem:[#allocation6 + $0x17e0] ss:$144 sps:$4 sm:$0xff]  }
 0x39d   :  { %6435 = vmatpush1.bf16.msra.mxu1 %v11374_v44  ;;  %6350 = vmatprep.subr.bf16.mxu0 %v11379_v45  ;;  %v11434_v37 = vld [vmem:[#allocation6 + $0x17e8] ss:$144 sps:$4 sm:$0xff]   ;;  %v11439_v38 = vld [vmem:[#allocation6 + $0x1904] ss:$144 sps:$4 sm:$0xff]   ;;  %v11442_v39 = vld [vmem:[#allocation6 + $0x190c] ss:$144 sps:$4 sm:$0xff]  }
 0x39e   :  { %6436 = vmatprep.subr.bf16.mxu1 %v11382_v50  ;;  %v12970_v60 = vsel %vm7344_vm7, %v7316_v56, %v7337_v21  ;;  %v11437_v40 = vld [vmem:[#allocation6 + $0x1900] ss:$144 sps:$4 sm:$0xff]   ;;  %v11440_v41 = vld [vmem:[#allocation6 + $0x1908] ss:$144 sps:$4 sm:$0xff]   ;;  %v11445_v42 = vld [vmem:[#allocation6 + $0x1a24] ss:$144 sps:$4 sm:$0xff]  }
 0x39f   :  { %v11448_v43 = vld [vmem:[#allocation6 + $0x1a2c] ss:$144 sps:$4 sm:$0xff]   ;;  %v11443_v44 = vld [vmem:[#allocation6 + $0x1a20] ss:$144 sps:$4 sm:$0xff]   ;;  %v11446_v45 = vld [vmem:[#allocation6 + $0x1a28] ss:$144 sps:$4 sm:$0xff]  }
 0x3a0   :  { %6351 = vmatpush1.bf16.msra.mxu0 %v11377_v54  ;;  %v11451_v46 = vld [vmem:[#allocation6 + $0x54] ss:$144 sps:$4 sm:$0xff]   ;;  %v11454_v49 = vld [vmem:[#allocation6 + $0x5c] ss:$144 sps:$4 sm:$0xff]   ;;  %v11449_v50 = vld [vmem:[#allocation6 + $0x50] ss:$144 sps:$4 sm:$0xff]  }
 0x3a1   :  { %6437 = vmatpush1.bf16.msra.mxu1 %v11380_v57  ;;  %6352 = vmatprep.subr.bf16.mxu0 %v11385_v58  ;;  %v11452_v51 = vld [vmem:[#allocation6 + $0x58] ss:$144 sps:$4 sm:$0xff]   ;;  %v11457_v52 = vld [vmem:[#allocation6 + $0x174] ss:$144 sps:$4 sm:$0xff]   ;;  %v11460_v54 = vld [vmem:[#allocation6 + $0x17c] ss:$144 sps:$4 sm:$0xff]  }
 0x3a2   :  { %6438 = vmatprep.subr.bf16.mxu1 %v11388_v59  ;;  %v11455_v56 = vld [vmem:[#allocation6 + $0x170] ss:$144 sps:$4 sm:$0xff]   ;;  %v11458_v21 = vld [vmem:[#allocation6 + $0x178] ss:$144 sps:$4 sm:$0xff]   ;;  %v11463_v57 = vld [vmem:[#allocation6 + $0x294] ss:$144 sps:$4 sm:$0xff]  }
 0x3a3   :  { %v11466_v58 = vld [vmem:[#allocation6 + $0x29c] ss:$144 sps:$4 sm:$0xff]   ;;  %v11461_v59 = vld [vmem:[#allocation6 + $0x290] ss:$144 sps:$4 sm:$0xff]  }
 0x3a4   :  { %6353 = vmatpush1.bf16.msra.mxu0 %v11383_v4  ;;  %v11464_v4 = vld [vmem:[#allocation6 + $0x298] ss:$144 sps:$4 sm:$0xff]  }
 0x3a5   :  { %6439 = vmatpush1.bf16.msra.mxu1 %v11386_v61  ;;  %6354 = vmatprep.subr.bf16.mxu0 %v11391_v63  ;;  %v11469_v61 = vld [vmem:[#allocation6 + $0x3b4] ss:$144 sps:$4 sm:$0xff]   ;;  %v11472_v63 = vld [vmem:[#allocation6 + $0x3bc] ss:$144 sps:$4 sm:$0xff]  }
 0x3a6   :  { %6440 = vmatprep.subr.bf16.mxu1 %v11394_v9  ;;  %v11467_v9 = vld [vmem:[#allocation6 + $0x3b0] ss:$144 sps:$4 sm:$0xff]  }
 0x3a8   :  { %6355 = vmatpush1.bf16.msra.mxu0 %v11389_v31  ;;  %v11470_v31 = vld [vmem:[#allocation6 + $0x3b8] ss:$144 sps:$4 sm:$0xff]  }
 0x3a9   :  { %6441 = vmatpush1.bf16.msra.mxu1 %v11392_v0  ;;  %6356 = vmatprep.subr.bf16.mxu0 %v11397_v3  ;;  %v11475_v0 = vld [vmem:[#allocation6 + $0x4d4] ss:$144 sps:$4 sm:$0xff]   ;;  %v11478_v3 = vld [vmem:[#allocation6 + $0x4dc] ss:$144 sps:$4 sm:$0xff]  }
 0x3aa   :  { %6442 = vmatprep.subr.bf16.mxu1 %v11400_v5  ;;  %v11473_v5 = vld [vmem:[#allocation6 + $0x4d0] ss:$144 sps:$4 sm:$0xff]  }
 0x3ac   :  { %6357 = vmatpush1.bf16.msra.mxu0 %v11395_v7  ;;  %v11476_v7 = vld [vmem:[#allocation6 + $0x4d8] ss:$144 sps:$4 sm:$0xff]  }
 0x3ad   :  { %6443 = vmatpush1.bf16.msra.mxu1 %v11398_v8  ;;  %6369 = vmatprep.subr.bf16.mxu0 %v11403_v10  ;;  %v11481_v8 = vld [vmem:[#allocation6 + $0x5f4] ss:$144 sps:$4 sm:$0xff]   ;;  %v11484_v10 = vld [vmem:[#allocation6 + $0x5fc] ss:$144 sps:$4 sm:$0xff]  }
 0x3ae   :  { %6455 = vmatprep.subr.bf16.mxu1 %v11406_v12  ;;  %v7187_v12 = vld [vmem:[#allocation8 + $0x8] sm:$0x7] }
 0x3af   :  { %6359 = vmatmul.mubr.bf16.vlgmr.msra.gmra.mrb[20].mxu0 %v12875_v47 }
 0x3b0   :  { %6445 = vmatmul.mubr.bf16.vlgmr.msra.gmra.mrb[20].mxu1 %v12875_v47  ;;  %6370 = vmatpush1.bf16.msra.mxu0 %v11401_v13  ;;  %v11479_v13 = vld [vmem:[#allocation6 + $0x5f0] ss:$144 sps:$4 sm:$0xff]  }
 0x3b1   :  { %6456 = vmatpush1.bf16.msra.mxu1 %v11404_v14  ;;  %6371 = vmatprep.subr.bf16.mxu0 %v11409_v15  ;;  %v11482_v14 = vld [vmem:[#allocation6 + $0x5f8] ss:$144 sps:$4 sm:$0xff]   ;;  %v11487_v15 = vld [vmem:[#allocation6 + $0x714] ss:$144 sps:$4 sm:$0xff]  }
 0x3b2   :  { %6457 = vmatprep.subr.bf16.mxu1 %v11412_v16  ;;  %6401 = vmatprep.mubr.bf16.mxu0 %v12613_v1 }
 0x3b3   :  { %6487 = vmatprep.mubr.bf16.mxu1 %v12613_v1 }
 0x3b4   :  { %6372 = vmatpush1.bf16.msra.mxu0 %v11407_v17  ;;  %v7269_v17 = vrot.slane %v7187_v12, %v12933_v62 }
 0x3b5   :  { %6458 = vmatpush1.bf16.msra.mxu1 %v11410_v18  ;;  %6373 = vmatprep.subr.bf16.mxu0 %v11415_v19  ;;  %v11490_v18 = vld [vmem:[#allocation6 + $0x71c] ss:$144 sps:$4 sm:$0xff]  }
 0x3b6   :  { %6459 = vmatprep.subr.bf16.mxu1 %v11418_v20 }
 0x3b8   :  { %6374 = vmatpush1.bf16.msra.mxu0 %v11413_v23 }
 0x3b9   :  { %6460 = vmatpush1.bf16.msra.mxu1 %v11416_v24  ;;  %6375 = vmatprep.subr.bf16.mxu0 %v11421_v25  ;;  %v11485_v25 = vld [vmem:[#allocation6 + $0x710] ss:$144 sps:$4 sm:$0xff]  }
 0x3ba   :  { %6461 = vmatprep.subr.bf16.mxu1 %v11424_v26  ;;  %v11488_v26 = vld [vmem:[#allocation6 + $0x718] ss:$144 sps:$4 sm:$0xff]  }
 0x3bc   :  { %6376 = vmatpush1.bf16.msra.mxu0 %v11419_v27 }
 0x3bd   :  { %6462 = vmatpush1.bf16.msra.mxu1 %v11422_v28  ;;  %6377 = vmatprep.subr.bf16.mxu0 %v11427_v29 }
 0x3be   :  { %6463 = vmatprep.subr.bf16.mxu1 %v11430_v30 }
 0x3c0   :  { %6378 = vmatpush1.bf16.msra.mxu0 %v11425_v32  ;;  %v11493_v32 = vld [vmem:[#allocation6 + $0x834] ss:$144 sps:$4 sm:$0xff]  }
 0x3c1   :  { %6464 = vmatpush1.bf16.msra.mxu1 %v11428_v33  ;;  %6379 = vmatprep.subr.bf16.mxu0 %v11433_v34  ;;  %v7284_v33 = vrot.slane %v7269_v17, %v12933_v62  ;;  %v11518_v17 = vld [vmem:[#allocation6 + $0xcb8] ss:$144 sps:$4 sm:$0xff]  }
 0x3c2   :  { %6465 = vmatprep.subr.bf16.mxu1 %v11436_v35  ;;  %v11496_v35 = vld [vmem:[#allocation6 + $0x83c] ss:$144 sps:$4 sm:$0xff]  }
 0x3c4   :  { %6380 = vmatpush1.bf16.msra.mxu0 %v11431_v36 }
 0x3c5   :  { %6466 = vmatpush1.bf16.msra.mxu1 %v11434_v37  ;;  %6381 = vmatprep.subr.bf16.mxu0 %v11439_v38 }
 0x3c6   :  { %6467 = vmatprep.subr.bf16.mxu1 %v11442_v39 }
 0x3c8   :  { %6382 = vmatpush1.bf16.msra.mxu0 %v11437_v40  ;;  %v11491_v40 = vld [vmem:[#allocation6 + $0x830] ss:$144 sps:$4 sm:$0xff]  }
 0x3c9   :  { %6468 = vmatpush1.bf16.msra.mxu1 %v11440_v41  ;;  %6383 = vmatprep.subr.bf16.mxu0 %v11445_v42  ;;  %v11494_v41 = vld [vmem:[#allocation6 + $0x838] ss:$144 sps:$4 sm:$0xff]   ;;  %v11499_v42 = vld [vmem:[#allocation6 + $0x954] ss:$144 sps:$4 sm:$0xff]  }
 0x3ca   :  { %6469 = vmatprep.subr.bf16.mxu1 %v11448_v43 }
 0x3cc   :  { %6384 = vmatpush1.bf16.msra.mxu0 %v11443_v44 }
 0x3cd   :  { %6470 = vmatpush1.bf16.msra.mxu1 %v11446_v45  ;;  %6498 = vmatprep.subr.bf16.mxu0 %v11451_v46  ;;  %v11502_v45 = vld [vmem:[#allocation6 + $0x95c] ss:$144 sps:$4 sm:$0xff]  }
 0x3ce   :  { %6584 = vmatprep.subr.bf16.mxu1 %v11454_v49 }
 0x3cf   :  { %6402 = vmatmul.mubr.bf16.vlgmr.msra.gmra.mrb[20].mxu0 %v12877_v48 }
 0x3d0   :  { %6488 = vmatmul.mubr.bf16.vlgmr.msra.gmra.mrb[20].mxu1 %v12877_v48  ;;  %6499 = vmatpush1.bf16.msra.mxu0 %v11449_v50  ;;  %v11497_v50 = vld [vmem:[#allocation6 + $0x950] ss:$144 sps:$4 sm:$0xff]  }
 0x3d1   :  { %6530 = vmatprep.mubr.bf16.mxu0 %v12879_v53  ;;  %6585 = vmatpush1.bf16.msra.mxu1 %v11452_v51  ;;  %v11500_v51 = vld [vmem:[#allocation6 + $0x958] ss:$144 sps:$4 sm:$0xff]  }
 0x3d2   :  { %6616 = vmatprep.mubr.bf16.mxu1 %v12879_v53  ;;  %6500 = vmatprep.subr.bf16.mxu0 %v11457_v52 }
 0x3d3   :  { %6586 = vmatprep.subr.bf16.mxu1 %v11460_v54  ;;  %v11508_v54 = vld [vmem:[#allocation6 + $0xa7c] ss:$144 sps:$4 sm:$0xff]  }
 0x3d4   :  { %6501 = vmatpush1.bf16.msra.mxu0 %v11455_v56 }
 0x3d5   :  { %6587 = vmatpush1.bf16.msra.mxu1 %v11458_v21  ;;  %6502 = vmatprep.subr.bf16.mxu0 %v11463_v57  ;;  %v11503_v57 = vld [vmem:[#allocation6 + $0xa70] ss:$144 sps:$4 sm:$0xff]  }
 0x3d6   :  { %6588 = vmatprep.subr.bf16.mxu1 %v11466_v58 }
 0x3d8   :  { %6503 = vmatpush1.bf16.msra.mxu0 %v11461_v59 }
 0x3d9   :  { %6589 = vmatpush1.bf16.msra.mxu1 %v11464_v4  ;;  %6504 = vmatprep.subr.bf16.mxu0 %v11469_v61  ;;  %v11506_v4 = vld [vmem:[#allocation6 + $0xa78] ss:$144 sps:$4 sm:$0xff]   ;;  %v11511_v61 = vld [vmem:[#allocation6 + $0xb94] ss:$144 sps:$4 sm:$0xff]  }
 0x3da   :  { %6590 = vmatprep.subr.bf16.mxu1 %v11472_v63  ;;  %v11514_v63 = vld [vmem:[#allocation6 + $0xb9c] ss:$144 sps:$4 sm:$0xff]  }
 0x3dc   :  { %6505 = vmatpush1.bf16.msra.mxu0 %v11467_v9 }
 0x3dd   :  { %6591 = vmatpush1.bf16.msra.mxu1 %v11470_v31  ;;  %6506 = vmatprep.subr.bf16.mxu0 %v11475_v0  ;;  %v11509_v0 = vld [vmem:[#allocation6 + $0xb90] ss:$144 sps:$4 sm:$0xff]  }
 0x3de   :  { %6592 = vmatprep.subr.bf16.mxu1 %v11478_v3 }
 0x3e0   :  { %6507 = vmatpush1.bf16.msra.mxu0 %v11473_v5 }
 0x3e1   :  { %6593 = vmatpush1.bf16.msra.mxu1 %v11476_v7  ;;  %6508 = vmatprep.subr.bf16.mxu0 %v11481_v8  ;;  %v11512_v7 = vld [vmem:[#allocation6 + $0xb98] ss:$144 sps:$4 sm:$0xff]   ;;  %v11517_v8 = vld [vmem:[#allocation6 + $0xcb4] ss:$144 sps:$4 sm:$0xff]  }
 0x3e2   :  { %v6059_v16 = vpop.f32.mrb[12].mxu0  ;;  %6594 = vmatprep.subr.bf16.mxu1 %v11484_v10  ;;  %v11520_v10 = vld [vmem:[#allocation6 + $0xcbc] ss:$144 sps:$4 sm:$0xff]  }
 0x3e3   :  { %v12981_v19 = vpop.f32.mrb[12].mxu1  ;;  %v12983_v20 = vpop.f32.mrb[13].mxu0  ;;  %v7235_v27 = vrot.slane %v6059_v16, 2 }
 0x3e4   :  { %v12985_v23 = vpop.f32.mrb[13].mxu1  ;;  %v6063_v24 = vpop.f32.mrb[14].mxu0  ;;  %6509 = vmatpush1.bf16.msra.mxu0 %v11479_v13 }
 0x3e5   :  { %v7236_v28 = vrot.slane %v6063_v24, 2  ;;  %v12987_v29 = vpop.f32.mrb[14].mxu1  ;;  %6595 = vmatpush1.bf16.msra.mxu1 %v11482_v14  ;;  %v12989_v30 = vpop.f32.mrb[15].mxu0  ;;  %6510 = vmatprep.subr.bf16.mxu0 %v11487_v15  ;;  %v11515_v14 = vld [vmem:[#allocation6 + $0xcb0] ss:$144 sps:$4 sm:$0xff]  }
 0x3e6   :  { %v12992_v34 = vpop.f32.mrb[15].mxu1  ;;  %6596 = vmatprep.subr.bf16.mxu1 %v11490_v18  ;;  %v11523_v18 = vld [vmem:[#allocation6 + $0xdd4] ss:$144 sps:$4 sm:$0xff]   ;;  %v11526_v24 = vld [vmem:[#allocation6 + $0xddc] ss:$144 sps:$4 sm:$0xff]  }
 0x3e7   :  { %v7237_v36 = vsel %vm7228_vm5, %v7235_v27, %v7236_v28  ;;  %v7249_v37 = vsel %vm7228_vm5, %v7236_v28, %v7235_v27  ;;  %v11524_v27 = vld [vmem:[#allocation6 + $0xdd8] ss:$144 sps:$4 sm:$0xff]   ;;  %v11529_v28 = vld [vmem:[#allocation6 + $0xef4] ss:$144 sps:$4 sm:$0xff]  }
 0x3e8   :  { %v7252_v38 = vadd.f32 %v7237_v36, %v12950_v6  ;;  %v7255_v39 = vadd.f32 %v7249_v37, %v12953_v11  ;;  %6511 = vmatpush1.bf16.msra.mxu0 %v11485_v25  ;;  %v11505_v6 = vld [vmem:[#allocation6 + $0xa74] ss:$144 sps:$4 sm:$0xff]   ;;  %v11538_v37 = vld [vmem:[#allocation6 + $0x101c] ss:$144 sps:$4 sm:$0xff]  }
 0x3e9   :  { %6597 = vmatpush1.bf16.msra.mxu1 %v11488_v26  ;;  %6512 = vmatprep.subr.bf16.mxu0 %v11493_v32  ;;  %v11521_v26 = vld [vmem:[#allocation6 + $0xdd0] ss:$144 sps:$4 sm:$0xff]   ;;  %v11532_v32 = vld [vmem:[#allocation6 + $0xefc] ss:$144 sps:$4 sm:$0xff]   ;;  %v11535_v36 = vld [vmem:[#allocation6 + $0x1014] ss:$144 sps:$4 sm:$0xff]  }
 0x3ea   :  { %v7287_v43 = vadd.f32 %v7284_v33, %v7252_v38  ;;  %v7290_v44 = vadd.f32 %v7284_v33, %v7255_v39  ;;  %6598 = vmatprep.subr.bf16.mxu1 %v11496_v35  ;;  %v11527_v33 = vld [vmem:[#allocation6 + $0xef0] ss:$144 sps:$4 sm:$0xff]   ;;  %v11530_v35 = vld [vmem:[#allocation6 + $0xef8] ss:$144 sps:$4 sm:$0xff]  }
 0x3eb   :  { %v11533_v38 = vld [vmem:[#allocation6 + $0x1010] ss:$144 sps:$4 sm:$0xff]   ;;  %v11536_v39 = vld [vmem:[#allocation6 + $0x1018] ss:$144 sps:$4 sm:$0xff]  }
 0x3ec   :  { %v7293_v46 = vmax.f32 %v7287_v43, 0.0  ;;  %v7296_v49 = vmax.f32 %v7290_v44, 0.0  ;;  %6513 = vmatpush1.bf16.msra.mxu0 %v11491_v40  ;;  %v11541_v40 = vld [vmem:[#allocation6 + $0x1134] ss:$144 sps:$4 sm:$0xff]   ;;  %v11542_v43 = vld [vmem:[#allocation6 + $0x1138] ss:$144 sps:$4 sm:$0xff]  }
 0x3ed   :  { %6599 = vmatpush1.bf16.msra.mxu1 %v11494_v41  ;;  %6514 = vmatprep.subr.bf16.mxu0 %v11499_v42  ;;  %v11544_v41 = vld [vmem:[#allocation6 + $0x113c] ss:$144 sps:$4 sm:$0xff]   ;;  %v11539_v42 = vld [vmem:[#allocation6 + $0x1130] ss:$144 sps:$4 sm:$0xff]   ;;  %v11547_v44 = vld [vmem:[#allocation6 + $0x1254] ss:$144 sps:$4 sm:$0xff]  }
 0x3ee   :  { %v7304_v11 = vsel %vm7299_vm6, %v7293_v46, 0.0  ;;  %v7325_v52 = vsel %vm7299_vm6, %v7296_v49, 0.0  ;;  %6600 = vmatprep.subr.bf16.mxu1 %v11502_v45  ;;  %v11550_v45 = vld [vmem:[#allocation6 + $0x125c] ss:$144 sps:$4 sm:$0xff]   ;;  %v11545_v46 = vld [vmem:[#allocation6 + $0x1250] ss:$144 sps:$4 sm:$0xff]  }
 0x3ef   :  { %v7317_v56 = vrot.slane %v7304_v11, 4  ;;  %v7338_v21 = vrot.slane %v7325_v52, 4  ;;  %v11548_v49 = vld [vmem:[#allocation6 + $0x1258] ss:$144 sps:$4 sm:$0xff]  }
 0x3f0   :  { %6515 = vmatpush1.bf16.msra.mxu0 %v11497_v50  ;;  %v11553_v50 = vld [vmem:[#allocation6 + $0x1374] ss:$144 sps:$4 sm:$0xff]  }
 0x3f1   :  { %v7318_v58 = vmax.f32 %v7304_v11, %v7317_v56  ;;  %v7339_v59 = vmax.f32 %v7325_v52, %v7338_v21  ;;  %6601 = vmatpush1.bf16.msra.mxu1 %v11500_v51  ;;  %6516 = vmatprep.subr.bf16.mxu0 %v11505_v6  ;;  %v11556_v51 = vld [vmem:[#allocation6 + $0x137c] ss:$144 sps:$4 sm:$0xff]   ;;  %v11551_v6 = vld [vmem:[#allocation6 + $0x1370] ss:$144 sps:$4 sm:$0xff]   ;;  %v11554_v11 = vld [vmem:[#allocation6 + $0x1378] ss:$144 sps:$4 sm:$0xff]  }
 0x3f2   :  { %6602 = vmatprep.subr.bf16.mxu1 %v11508_v54  ;;  %v11559_v52 = vld [vmem:[#allocation6 + $0x1494] ss:$144 sps:$4 sm:$0xff]   ;;  %v11562_v54 = vld [vmem:[#allocation6 + $0x149c] ss:$144 sps:$4 sm:$0xff]   ;;  %v11557_v56 = vld [vmem:[#allocation6 + $0x1490] ss:$144 sps:$4 sm:$0xff]  }
 0x3f3   :  { %v7319_v9 = vrot.slane %v7318_v58, 2  ;;  %v7340_v31 = vrot.slane %v7339_v59, 2  ;;  %v11560_v21 = vld [vmem:[#allocation6 + $0x1498] ss:$144 sps:$4 sm:$0xff]  }
 0x3f4   :  { %6517 = vmatpush1.bf16.msra.mxu0 %v11503_v57  ;;  %v11565_v57 = vld [vmem:[#allocation6 + $0x15b4] ss:$144 sps:$4 sm:$0xff]  }
 0x3f5   :  { %v7320_v3 = vmax.f32 %v7318_v58, %v7319_v9  ;;  %v7341_v5 = vmax.f32 %v7339_v59, %v7340_v31  ;;  %6603 = vmatpush1.bf16.msra.mxu1 %v11506_v4  ;;  %6518 = vmatprep.subr.bf16.mxu0 %v11511_v61  ;;  %v11568_v58 = vld [vmem:[#allocation6 + $0x15bc] ss:$144 sps:$4 sm:$0xff]   ;;  %v11563_v59 = vld [vmem:[#allocation6 + $0x15b0] ss:$144 sps:$4 sm:$0xff]   ;;  %v11566_v4 = vld [vmem:[#allocation6 + $0x15b8] ss:$144 sps:$4 sm:$0xff]  }
 0x3f6   :  { %6604 = vmatprep.subr.bf16.mxu1 %v11514_v63  ;;  %v11571_v61 = vld [vmem:[#allocation6 + $0x16d4] ss:$144 sps:$4 sm:$0xff]   ;;  %v11574_v63 = vld [vmem:[#allocation6 + $0x16dc] ss:$144 sps:$4 sm:$0xff]   ;;  %v11569_v9 = vld [vmem:[#allocation6 + $0x16d0] ss:$144 sps:$4 sm:$0xff]  }
 0x3f7   :  { %v7321_v12 = vrot.slane %v7320_v3, 1  ;;  %v7342_v13 = vrot.slane %v7341_v5, 1  ;;  %v11572_v31 = vld [vmem:[#allocation6 + $0x16d8] ss:$144 sps:$4 sm:$0xff]  }
 0x3f8   :  { %6519 = vmatpush1.bf16.msra.mxu0 %v11509_v0  ;;  %v11577_v0 = vld [vmem:[#allocation6 + $0x17f4] ss:$144 sps:$4 sm:$0xff]  }
 0x3f9   :  { %v7322_v15 = vmax.f32 %v7320_v3, %v7321_v12  ;;  %v7343_v16 = vmax.f32 %v7341_v5, %v7342_v13  ;;  %6605 = vmatpush1.bf16.msra.mxu1 %v11512_v7  ;;  %6520 = vmatprep.subr.bf16.mxu0 %v11517_v8  ;;  %v11580_v3 = vld [vmem:[#allocation6 + $0x17fc] ss:$144 sps:$4 sm:$0xff]   ;;  %v11575_v5 = vld [vmem:[#allocation6 + $0x17f0] ss:$144 sps:$4 sm:$0xff]   ;;  %v11578_v7 = vld [vmem:[#allocation6 + $0x17f8] ss:$144 sps:$4 sm:$0xff]  }
 0x3fa   :  { %6606 = vmatprep.subr.bf16.mxu1 %v11520_v10  ;;  %v11583_v8 = vld [vmem:[#allocation6 + $0x1914] ss:$144 sps:$4 sm:$0xff]   ;;  %v11586_v10 = vld [vmem:[#allocation6 + $0x191c] ss:$144 sps:$4 sm:$0xff]   ;;  %v11581_v12 = vld [vmem:[#allocation6 + $0x1910] ss:$144 sps:$4 sm:$0xff]  }
 0x3fb   :  { %v13003_v25 = vsel %vm7344_vm7, %v7322_v15, %v7343_v16  ;;  %v11584_v13 = vld [vmem:[#allocation6 + $0x1918] ss:$144 sps:$4 sm:$0xff]   ;;  %v11592_v15 = vld [vmem:[#allocation6 + $0x1a3c] ss:$144 sps:$4 sm:$0xff]   ;;  %v11587_v16 = vld [vmem:[#allocation6 + $0x1a30] ss:$144 sps:$4 sm:$0xff]  }
 0x3fc   :  { %6521 = vmatpush1.bf16.msra.mxu0 %v11515_v14  ;;  %v11589_v14 = vld [vmem:[#allocation6 + $0x1a34] ss:$144 sps:$4 sm:$0xff]  }
 0x3fd   :  { %6607 = vmatpush1.bf16.msra.mxu1 %v11518_v17  ;;  %6522 = vmatprep.subr.bf16.mxu0 %v11523_v18  ;;  %v11590_v17 = vld [vmem:[#allocation6 + $0x1a38] ss:$144 sps:$4 sm:$0xff]   ;;  %v11595_v18 = vld [vmem:[#allocation6 + $0x64] ss:$144 sps:$4 sm:$0xff]  }
 0x3fe   :  { %6608 = vmatprep.subr.bf16.mxu1 %v11526_v24  ;;  %v11598_v24 = vld [vmem:[#allocation6 + $0x6c] ss:$144 sps:$4 sm:$0xff]  }
 0x400   :  { %6523 = vmatpush1.bf16.msra.mxu0 %v11521_v26  ;;  %v11593_v26 = vld [vmem:[#allocation6 + $0x60] ss:$144 sps:$4 sm:$0xff]  }
 0x401   :  { %6609 = vmatpush1.bf16.msra.mxu1 %v11524_v27  ;;  %6524 = vmatprep.subr.bf16.mxu0 %v11529_v28  ;;  %v11596_v27 = vld [vmem:[#allocation6 + $0x68] ss:$144 sps:$4 sm:$0xff]   ;;  %v11601_v28 = vld [vmem:[#allocation6 + $0x184] ss:$144 sps:$4 sm:$0xff]  }
 0x402   :  { %6610 = vmatprep.subr.bf16.mxu1 %v11532_v32  ;;  %v11604_v32 = vld [vmem:[#allocation6 + $0x18c] ss:$144 sps:$4 sm:$0xff]  }
 0x404   :  { %6525 = vmatpush1.bf16.msra.mxu0 %v11527_v33  ;;  %v11599_v33 = vld [vmem:[#allocation6 + $0x180] ss:$144 sps:$4 sm:$0xff]  }
 0x405   :  { %6611 = vmatpush1.bf16.msra.mxu1 %v11530_v35  ;;  %6526 = vmatprep.subr.bf16.mxu0 %v11535_v36  ;;  %v11602_v35 = vld [vmem:[#allocation6 + $0x188] ss:$144 sps:$4 sm:$0xff]   ;;  %v11607_v36 = vld [vmem:[#allocation6 + $0x2a4] ss:$144 sps:$4 sm:$0xff]  }
 0x406   :  { %6612 = vmatprep.subr.bf16.mxu1 %v11538_v37  ;;  %v11610_v37 = vld [vmem:[#allocation6 + $0x2ac] ss:$144 sps:$4 sm:$0xff]  }
 0x408   :  { %6527 = vmatpush1.bf16.msra.mxu0 %v11533_v38  ;;  %v11605_v38 = vld [vmem:[#allocation6 + $0x2a0] ss:$144 sps:$4 sm:$0xff]  }
 0x409   :  { %6613 = vmatpush1.bf16.msra.mxu1 %v11536_v39  ;;  %6528 = vmatprep.subr.bf16.mxu0 %v11541_v40  ;;  %v11608_v39 = vld [vmem:[#allocation6 + $0x2a8] ss:$144 sps:$4 sm:$0xff]   ;;  %v11613_v40 = vld [vmem:[#allocation6 + $0x3c4] ss:$144 sps:$4 sm:$0xff]  }
 0x40a   :  { %6614 = vmatprep.subr.bf16.mxu1 %v11544_v41  ;;  %v11616_v41 = vld [vmem:[#allocation6 + $0x3cc] ss:$144 sps:$4 sm:$0xff]  }
 0x40c   :  { %6529 = vmatpush1.bf16.msra.mxu0 %v11539_v42  ;;  %v11611_v42 = vld [vmem:[#allocation6 + $0x3c0] ss:$144 sps:$4 sm:$0xff]  }
 0x40d   :  { %6615 = vmatpush1.bf16.msra.mxu1 %v11542_v43  ;;  %6541 = vmatprep.subr.bf16.mxu0 %v11547_v44  ;;  %v11614_v43 = vld [vmem:[#allocation6 + $0x3c8] ss:$144 sps:$4 sm:$0xff]   ;;  %v11619_v44 = vld [vmem:[#allocation6 + $0x4e4] ss:$144 sps:$4 sm:$0xff]  }
 0x40e   :  { %6627 = vmatprep.subr.bf16.mxu1 %v11550_v45  ;;  %v11622_v45 = vld [vmem:[#allocation6 + $0x4ec] ss:$144 sps:$4 sm:$0xff]  }
 0x40f   :  { %6531 = vmatmul.mubr.bf16.vlgmr.msra.gmra.mrb[24].mxu0 %v12875_v47 }
 0x410   :  { %6617 = vmatmul.mubr.bf16.vlgmr.msra.gmra.mrb[24].mxu1 %v12875_v47  ;;  %6542 = vmatpush1.bf16.msra.mxu0 %v11545_v46  ;;  %v11617_v46 = vld [vmem:[#allocation6 + $0x4e0] ss:$144 sps:$4 sm:$0xff]  }
 0x411   :  { %6628 = vmatpush1.bf16.msra.mxu1 %v11548_v49  ;;  %6543 = vmatprep.subr.bf16.mxu0 %v11553_v50  ;;  %v11620_v49 = vld [vmem:[#allocation6 + $0x4e8] ss:$144 sps:$4 sm:$0xff]   ;;  %v11625_v50 = vld [vmem:[#allocation6 + $0x604] ss:$144 sps:$4 sm:$0xff]  }
 0x412   :  { %6629 = vmatprep.subr.bf16.mxu1 %v11556_v51  ;;  %6573 = vmatprep.mubr.bf16.mxu0 %v12613_v1  ;;  %v11628_v51 = vld [vmem:[#allocation6 + $0x60c] ss:$144 sps:$4 sm:$0xff]  }
 0x413   :  { %6659 = vmatprep.mubr.bf16.mxu1 %v12613_v1 }
 0x414   :  { %6544 = vmatpush1.bf16.msra.mxu0 %v11551_v6  ;;  %v11623_v6 = vld [vmem:[#allocation6 + $0x600] ss:$144 sps:$4 sm:$0xff]  }
 0x415   :  { %6630 = vmatpush1.bf16.msra.mxu1 %v11554_v11  ;;  %6545 = vmatprep.subr.bf16.mxu0 %v11559_v52  ;;  %v11626_v11 = vld [vmem:[#allocation6 + $0x608] ss:$144 sps:$4 sm:$0xff]   ;;  %v11631_v52 = vld [vmem:[#allocation6 + $0x724] ss:$144 sps:$4 sm:$0xff]  }
 0x416   :  { %6631 = vmatprep.subr.bf16.mxu1 %v11562_v54 }
 0x418   :  { %6546 = vmatpush1.bf16.msra.mxu0 %v11557_v56  ;;  %v11634_v56 = vld [vmem:[#allocation6 + $0x72c] ss:$144 sps:$4 sm:$0xff]  }
 0x419   :  { %6632 = vmatpush1.bf16.msra.mxu1 %v11560_v21  ;;  %6547 = vmatprep.subr.bf16.mxu0 %v11565_v57 }
 0x41a   :  { %6633 = vmatprep.subr.bf16.mxu1 %v11568_v58 }
 0x41c   :  { %6548 = vmatpush1.bf16.msra.mxu0 %v11563_v59 }
 0x41d   :  { %6634 = vmatpush1.bf16.msra.mxu1 %v11566_v4  ;;  %6549 = vmatprep.subr.bf16.mxu0 %v11571_v61  ;;  %v11629_v4 = vld [vmem:[#allocation6 + $0x720] ss:$144 sps:$4 sm:$0xff]   ;;  %v11632_v61 = vld [vmem:[#allocation6 + $0x728] ss:$144 sps:$4 sm:$0xff]  }
 0x41e   :  { %6635 = vmatprep.subr.bf16.mxu1 %v11574_v63 }
 0x420   :  { %6550 = vmatpush1.bf16.msra.mxu0 %v11569_v9 }
 0x421   :  { %6636 = vmatpush1.bf16.msra.mxu1 %v11572_v31  ;;  %6551 = vmatprep.subr.bf16.mxu0 %v11577_v0 }
 0x422   :  { %6637 = vmatprep.subr.bf16.mxu1 %v11580_v3  ;;  %v11637_v3 = vld [vmem:[#allocation6 + $0x844] ss:$144 sps:$4 sm:$0xff]  }
 0x424   :  { %6552 = vmatpush1.bf16.msra.mxu0 %v11575_v5 }
 0x425   :  { %6638 = vmatpush1.bf16.msra.mxu1 %v11578_v7  ;;  %6553 = vmatprep.subr.bf16.mxu0 %v11583_v8 }
 0x426   :  { %6639 = vmatprep.subr.bf16.mxu1 %v11586_v10 }
 0x428   :  { %6554 = vmatpush1.bf16.msra.mxu0 %v11581_v12 }
 0x429   :  { %6640 = vmatpush1.bf16.msra.mxu1 %v11584_v13  ;;  %6555 = vmatprep.subr.bf16.mxu0 %v11589_v14 }
 0x42a   :  { %6641 = vmatprep.subr.bf16.mxu1 %v11592_v15 }
 0x42c   :  { %6556 = vmatpush1.bf16.msra.mxu0 %v11587_v16 }
 0x42d   :  { %6642 = vmatpush1.bf16.msra.mxu1 %v11590_v17  ;;  %6670 = vmatprep.subr.bf16.mxu0 %v11595_v18  ;;  %v11640_v17 = vld [vmem:[#allocation6 + $0x84c] ss:$144 sps:$4 sm:$0xff]  }
 0x42e   :  { %6756 = vmatprep.subr.bf16.mxu1 %v11598_v24 }
 0x42f   :  { %6574 = vmatmul.mubr.bf16.vlgmr.msra.gmra.mrb[24].mxu0 %v12877_v48 }
 0x430   :  { %6660 = vmatmul.mubr.bf16.vlgmr.msra.gmra.mrb[24].mxu1 %v12877_v48  ;;  %6671 = vmatpush1.bf16.msra.mxu0 %v11593_v26 }
 0x431   :  { %6702 = vmatprep.mubr.bf16.mxu0 %v12879_v53  ;;  %6757 = vmatpush1.bf16.msra.mxu1 %v11596_v27 }
 0x432   :  { %6788 = vmatprep.mubr.bf16.mxu1 %v12879_v53  ;;  %6672 = vmatprep.subr.bf16.mxu0 %v11601_v28  ;;  %v11635_v28 = vld [vmem:[#allocation6 + $0x840] ss:$144 sps:$4 sm:$0xff]  }
 0x433   :  { %6758 = vmatprep.subr.bf16.mxu1 %v11604_v32 }
 0x434   :  { %6673 = vmatpush1.bf16.msra.mxu0 %v11599_v33 }
 0x435   :  { %6759 = vmatpush1.bf16.msra.mxu1 %v11602_v35  ;;  %6674 = vmatprep.subr.bf16.mxu0 %v11607_v36 }
 0x436   :  { %6760 = vmatprep.subr.bf16.mxu1 %v11610_v37  ;;  %v11643_v37 = vld [vmem:[#allocation6 + $0x964] ss:$144 sps:$4 sm:$0xff]  }
 0x438   :  { %6675 = vmatpush1.bf16.msra.mxu0 %v11605_v38 }
 0x439   :  { %6761 = vmatpush1.bf16.msra.mxu1 %v11608_v39  ;;  %6676 = vmatprep.subr.bf16.mxu0 %v11613_v40 }
 0x43a   :  { %6762 = vmatprep.subr.bf16.mxu1 %v11616_v41 }
 0x43c   :  { %6677 = vmatpush1.bf16.msra.mxu0 %v11611_v42  ;;  %v11641_v42 = vld [vmem:[#allocation6 + $0x960] ss:$144 sps:$4 sm:$0xff]  }
 0x43d   :  { %6763 = vmatpush1.bf16.msra.mxu1 %v11614_v43  ;;  %6678 = vmatprep.subr.bf16.mxu0 %v11619_v44  ;;  %v11649_v43 = vld [vmem:[#allocation6 + $0xa84] ss:$144 sps:$4 sm:$0xff]   ;;  %v11647_v44 = vld [vmem:[#allocation6 + $0xa80] ss:$144 sps:$4 sm:$0xff]  }
 0x43e   :  { %6764 = vmatprep.subr.bf16.mxu1 %v11622_v45  ;;  %v11650_v45 = vld [vmem:[#allocation6 + $0xa88] ss:$144 sps:$4 sm:$0xff]  }
 0x440   :  { %6679 = vmatpush1.bf16.msra.mxu0 %v11617_v46  ;;  %v11655_v46 = vld [vmem:[#allocation6 + $0xba4] ss:$144 sps:$4 sm:$0xff]  }
 0x441   :  { %6765 = vmatpush1.bf16.msra.mxu1 %v11620_v49  ;;  %6680 = vmatprep.subr.bf16.mxu0 %v11625_v50  ;;  %v11658_v49 = vld [vmem:[#allocation6 + $0xbac] ss:$144 sps:$4 sm:$0xff]   ;;  %v11653_v50 = vld [vmem:[#allocation6 + $0xba0] ss:$144 sps:$4 sm:$0xff]  }
 0x442   :  { %v6231_v54 = vpop.f32.mrb[16].mxu0  ;;  %6766 = vmatprep.subr.bf16.mxu1 %v11628_v51  ;;  %v11656_v51 = vld [vmem:[#allocation6 + $0xba8] ss:$144 sps:$4 sm:$0xff]  }
 0x443   :  { %v6317_v21 = vpop.f32.mrb[16].mxu1  ;;  %v6233_v57 = vpop.f32.mrb[17].mxu0  ;;  %v7354_v63 = vrot.slane %v6231_v54, 1  ;;  %v11662_v54 = vld [vmem:[#allocation6 + $0xcc8] ss:$144 sps:$4 sm:$0xff]  }
 0x444   :  { %v6319_v58 = vpop.f32.mrb[17].mxu1  ;;  %v6235_v59 = vpop.f32.mrb[18].mxu0  ;;  %6681 = vmatpush1.bf16.msra.mxu0 %v11623_v6  ;;  %v7360_v5 = vrot.slane %v6317_v21, 1  ;;  %v7357_v7 = vrot.slane %v6233_v57, 1  ;;  %v11661_v6 = vld [vmem:[#allocation6 + $0xcc4] ss:$144 sps:$4 sm:$0xff]  }
 0x445   :  { %v7355_v9 = vrot.slane %v6235_v59, 1  ;;  %v6321_v31 = vpop.f32.mrb[18].mxu1  ;;  %6767 = vmatpush1.bf16.msra.mxu1 %v11626_v11  ;;  %v6237_v0 = vpop.f32.mrb[19].mxu0  ;;  %6682 = vmatprep.subr.bf16.mxu0 %v11631_v52  ;;  %v7387_v13 = vrot.slane %v6319_v58, 2  ;;  %v11664_v11 = vld [vmem:[#allocation6 + $0xccc] ss:$144 sps:$4 sm:$0xff]  }
 0x446   :  { %v7361_v8 = vrot.slane %v6321_v31, 1  ;;  %v7358_v10 = vrot.slane %v6237_v0, 1  ;;  %v6323_v12 = vpop.f32.mrb[19].mxu1  ;;  %6768 = vmatprep.subr.bf16.mxu1 %v11634_v56  ;;  %v11659_v52 = vld [vmem:[#allocation6 + $0xcc0] ss:$144 sps:$4 sm:$0xff]  }
 0x447   :  { %v7356_v14 = vsel %vm7194_vm4, %v7354_v63, %v7355_v9  ;;  %v7372_v15 = vsel %vm7194_vm4, %v7355_v9, %v7354_v63  ;;  %v7388_v16 = vrot.slane %v6323_v12, 2  ;;  %v11667_v56 = vld [vmem:[#allocation6 + $0xde4] ss:$144 sps:$4 sm:$0xff]   ;;  %v11670_v21 = vld [vmem:[#allocation6 + $0xdec] ss:$144 sps:$4 sm:$0xff]  }
 0x448   :  { %v7375_v18 = vadd.f32 %v7356_v14, %v12983_v20  ;;  %v7378_v24 = vadd.f32 %v7372_v15, %v12989_v30  ;;  %v7362_v26 = vsel %vm7194_vm4, %v7360_v5, %v7361_v8  ;;  %v7374_v27 = vsel %vm7194_vm4, %v7361_v8, %v7360_v5  ;;  %6683 = vmatpush1.bf16.msra.mxu0 %v11629_v4  ;;  %v11638_v20 = vld [vmem:[#allocation6 + $0x848] ss:$144 sps:$4 sm:$0xff]   ;;  %v11665_v57 = vld [vmem:[#allocation6 + $0xde0] ss:$144 sps:$4 sm:$0xff]   ;;  %v11673_v59 = vld [vmem:[#allocation6 + $0xf04] ss:$144 sps:$4 sm:$0xff]  }
 0x449   :  { %v13020_v32 = vadd.f32 %v7362_v26, %v12985_v23  ;;  %v13023_v33 = vadd.f32 %v7374_v27, %v12992_v34  ;;  %v7359_v35 = vsel %vm7194_vm4, %v7357_v7, %v7358_v10  ;;  %v7373_v36 = vsel %vm7194_vm4, %v7358_v10, %v7357_v7  ;;  %6769 = vmatpush1.bf16.msra.mxu1 %v11632_v61  ;;  %v11646_v34 = vld [vmem:[#allocation6 + $0x96c] ss:$144 sps:$4 sm:$0xff]   ;;  %v11668_v58 = vld [vmem:[#allocation6 + $0xde8] ss:$144 sps:$4 sm:$0xff]   ;;  %v11671_v61 = vld [vmem:[#allocation6 + $0xf00] ss:$144 sps:$4 sm:$0xff]  }
 0x44a   :  { %v13028_v30 = vadd.f32 %v7359_v35, %v12981_v19  ;;  %v13031_v38 = vadd.f32 %v7373_v36, %v12987_v29  ;;  %v7389_v39 = vsel %vm7228_vm5, %v7387_v13, %v7388_v16  ;;  %v7405_v23 = vsel %vm7228_vm5, %v7388_v16, %v7387_v13  ;;  %6684 = vmatprep.subr.bf16.mxu0 %v11637_v3  ;;  %v11644_v19 = vld [vmem:[#allocation6 + $0x968] ss:$144 sps:$4 sm:$0xff]   ;;  %v11652_v29 = vld [vmem:[#allocation6 + $0xa8c] ss:$144 sps:$4 sm:$0xff]   ;;  %v11679_v9 = vld [vmem:[#allocation6 + $0x1024] ss:$144 sps:$4 sm:$0xff]  }
 0x44b   :  { %v13035_v40 = vadd.f32 %v7389_v39, %v7375_v18  ;;  %v13037_v41 = vadd.f32 %v7405_v23, %v7378_v24  ;;  %6770 = vmatprep.subr.bf16.mxu1 %v11640_v17  ;;  %v11676_v4 = vld [vmem:[#allocation6 + $0xf0c] ss:$144 sps:$4 sm:$0xff]   ;;  %v11674_v63 = vld [vmem:[#allocation6 + $0xf08] ss:$144 sps:$4 sm:$0xff]   ;;  %v11677_v0 = vld [vmem:[#allocation6 + $0x1020] ss:$144 sps:$4 sm:$0xff]  }
 0x44c   :  { %6685 = vmatpush1.bf16.msra.mxu0 %v11635_v28  ;;  %v11682_v31 = vld [vmem:[#allocation6 + $0x102c] ss:$144 sps:$4 sm:$0xff]   ;;  %v11680_v3 = vld [vmem:[#allocation6 + $0x1028] ss:$144 sps:$4 sm:$0xff]   ;;  %v11685_v5 = vld [vmem:[#allocation6 + $0x1144] ss:$144 sps:$4 sm:$0xff]  }
 0x44d   :  { %6771 = vmatpush1.bf16.msra.mxu1 %v11638_v20  ;;  %6686 = vmatprep.subr.bf16.mxu0 %v11643_v37  ;;  %v11688_v7 = vld [vmem:[#allocation6 + $0x114c] ss:$144 sps:$4 sm:$0xff]   ;;  %v11683_v8 = vld [vmem:[#allocation6 + $0x1140] ss:$144 sps:$4 sm:$0xff]   ;;  %v11686_v10 = vld [vmem:[#allocation6 + $0x1148] ss:$144 sps:$4 sm:$0xff]  }
 0x44e   :  { %6772 = vmatprep.subr.bf16.mxu1 %v11646_v34  ;;  %v11691_v12 = vld [vmem:[#allocation6 + $0x1264] ss:$144 sps:$4 sm:$0xff]   ;;  %v11694_v13 = vld [vmem:[#allocation6 + $0x126c] ss:$144 sps:$4 sm:$0xff]   ;;  %v11689_v14 = vld [vmem:[#allocation6 + $0x1260] ss:$144 sps:$4 sm:$0xff]  }
 0x44f   :  { %v11692_v15 = vld [vmem:[#allocation6 + $0x1268] ss:$144 sps:$4 sm:$0xff]   ;;  %v11697_v16 = vld [vmem:[#allocation6 + $0x1384] ss:$144 sps:$4 sm:$0xff]   ;;  %v11700_v17 = vld [vmem:[#allocation6 + $0x138c] ss:$144 sps:$4 sm:$0xff]  }
 0x450   :  { %6687 = vmatpush1.bf16.msra.mxu0 %v11641_v42  ;;  %v11695_v18 = vld [vmem:[#allocation6 + $0x1380] ss:$144 sps:$4 sm:$0xff]   ;;  %v11698_v24 = vld [vmem:[#allocation6 + $0x1388] ss:$144 sps:$4 sm:$0xff]   ;;  %v11703_v26 = vld [vmem:[#allocation6 + $0x14a4] ss:$144 sps:$4 sm:$0xff]  }
 0x451   :  { %6773 = vmatpush1.bf16.msra.mxu1 %v11644_v19  ;;  %6688 = vmatprep.subr.bf16.mxu0 %v11649_v43  ;;  %v11706_v27 = vld [vmem:[#allocation6 + $0x14ac] ss:$144 sps:$4 sm:$0xff]   ;;  %v11701_v28 = vld [vmem:[#allocation6 + $0x14a0] ss:$144 sps:$4 sm:$0xff]   ;;  %v11704_v35 = vld [vmem:[#allocation6 + $0x14a8] ss:$144 sps:$4 sm:$0xff]  }
 0x452   :  { %6774 = vmatprep.subr.bf16.mxu1 %v11652_v29  ;;  %v11709_v36 = vld [vmem:[#allocation6 + $0x15c4] ss:$144 sps:$4 sm:$0xff]   ;;  %v11712_v20 = vld [vmem:[#allocation6 + $0x15cc] ss:$144 sps:$4 sm:$0xff]   ;;  %v11707_v37 = vld [vmem:[#allocation6 + $0x15c0] ss:$144 sps:$4 sm:$0xff]  }
 0x453   :  { %v11710_v39 = vld [vmem:[#allocation6 + $0x15c8] ss:$144 sps:$4 sm:$0xff]   ;;  %v11715_v23 = vld [vmem:[#allocation6 + $0x16e4] ss:$144 sps:$4 sm:$0xff]   ;;  %v11718_v34 = vld [vmem:[#allocation6 + $0x16ec] ss:$144 sps:$4 sm:$0xff]  }
 0x454   :  { %6689 = vmatpush1.bf16.msra.mxu0 %v11647_v44  ;;  %v11713_v42 = vld [vmem:[#allocation6 + $0x16e0] ss:$144 sps:$4 sm:$0xff]   ;;  %v11716_v19 = vld [vmem:[#allocation6 + $0x16e8] ss:$144 sps:$4 sm:$0xff]   ;;  %v11721_v43 = vld [vmem:[#allocation6 + $0x1804] ss:$144 sps:$4 sm:$0xff]  }
 0x455   :  { %6775 = vmatpush1.bf16.msra.mxu1 %v11650_v45  ;;  %6690 = vmatprep.subr.bf16.mxu0 %v11655_v46  ;;  %v11724_v29 = vld [vmem:[#allocation6 + $0x180c] ss:$144 sps:$4 sm:$0xff]   ;;  %v11719_v44 = vld [vmem:[#allocation6 + $0x1800] ss:$144 sps:$4 sm:$0xff]   ;;  %v11722_v45 = vld [vmem:[#allocation6 + $0x1808] ss:$144 sps:$4 sm:$0xff]  }
 0x456   :  { %6776 = vmatprep.subr.bf16.mxu1 %v11658_v49  ;;  %v11727_v46 = vld [vmem:[#allocation6 + $0x1924] ss:$144 sps:$4 sm:$0xff]   ;;  %v11730_v49 = vld [vmem:[#allocation6 + $0x192c] ss:$144 sps:$4 sm:$0xff]  }
 0x458   :  { %6691 = vmatpush1.bf16.msra.mxu0 %v11653_v50  ;;  %v11725_v50 = vld [vmem:[#allocation6 + $0x1920] ss:$144 sps:$4 sm:$0xff]  }
 0x459   :  { %6777 = vmatpush1.bf16.msra.mxu1 %v11656_v51  ;;  %6692 = vmatprep.subr.bf16.mxu0 %v11661_v6  ;;  %v11728_v51 = vld [vmem:[#allocation6 + $0x1928] ss:$144 sps:$4 sm:$0xff]   ;;  %v11733_v6 = vld [vmem:[#allocation6 + $0x1a44] ss:$144 sps:$4 sm:$0xff]  }
 0x45a   :  { %6778 = vmatprep.subr.bf16.mxu1 %v11664_v11  ;;  %v11736_v11 = vld [vmem:[#allocation6 + $0x1a4c] ss:$144 sps:$4 sm:$0xff]  }
 0x45c   :  { %6693 = vmatpush1.bf16.msra.mxu0 %v11659_v52  ;;  %v11731_v52 = vld [vmem:[#allocation6 + $0x1a40] ss:$144 sps:$4 sm:$0xff]  }
 0x45d   :  { %6779 = vmatpush1.bf16.msra.mxu1 %v11662_v54  ;;  %6694 = vmatprep.subr.bf16.mxu0 %v11667_v56  ;;  %v11734_v54 = vld [vmem:[#allocation6 + $0x1a48] ss:$144 sps:$4 sm:$0xff]   ;;  %v11739_v56 = vld [vmem:[#allocation6 + $0x74] ss:$144 sps:$4 sm:$0xff]  }
 0x45e   :  { %6780 = vmatprep.subr.bf16.mxu1 %v11670_v21  ;;  %v11742_v21 = vld [vmem:[#allocation6 + $0x7c] ss:$144 sps:$4 sm:$0xff]  }
 0x460   :  { %6695 = vmatpush1.bf16.msra.mxu0 %v11665_v57  ;;  %v11737_v57 = vld [vmem:[#allocation6 + $0x70] ss:$144 sps:$4 sm:$0xff]  }
 0x461   :  { %6781 = vmatpush1.bf16.msra.mxu1 %v11668_v58  ;;  %6696 = vmatprep.subr.bf16.mxu0 %v11673_v59  ;;  %v11740_v58 = vld [vmem:[#allocation6 + $0x78] ss:$144 sps:$4 sm:$0xff]   ;;  %v11745_v59 = vld [vmem:[#allocation6 + $0x194] ss:$144 sps:$4 sm:$0xff]  }
 0x462   :  { %6782 = vmatprep.subr.bf16.mxu1 %v11676_v4  ;;  %v11748_v4 = vld [vmem:[#allocation6 + $0x19c] ss:$144 sps:$4 sm:$0xff]  }
 0x464   :  { %6697 = vmatpush1.bf16.msra.mxu0 %v11671_v61  ;;  %v11743_v61 = vld [vmem:[#allocation6 + $0x190] ss:$144 sps:$4 sm:$0xff]  }
 0x465   :  { %6783 = vmatpush1.bf16.msra.mxu1 %v11674_v63  ;;  %6698 = vmatprep.subr.bf16.mxu0 %v11679_v9  ;;  %v11746_v63 = vld [vmem:[#allocation6 + $0x198] ss:$144 sps:$4 sm:$0xff]   ;;  %v11751_v9 = vld [vmem:[#allocation6 + $0x2b4] ss:$144 sps:$4 sm:$0xff]  }
 0x466   :  { %6784 = vmatprep.subr.bf16.mxu1 %v11682_v31  ;;  %v11754_v31 = vld [vmem:[#allocation6 + $0x2bc] ss:$144 sps:$4 sm:$0xff]  }
 0x468   :  { %6699 = vmatpush1.bf16.msra.mxu0 %v11677_v0  ;;  %v11749_v0 = vld [vmem:[#allocation6 + $0x2b0] ss:$144 sps:$4 sm:$0xff]  }
 0x469   :  { %6785 = vmatpush1.bf16.msra.mxu1 %v11680_v3  ;;  %6700 = vmatprep.subr.bf16.mxu0 %v11685_v5  ;;  %v11752_v3 = vld [vmem:[#allocation6 + $0x2b8] ss:$144 sps:$4 sm:$0xff]   ;;  %v11757_v5 = vld [vmem:[#allocation6 + $0x3d4] ss:$144 sps:$4 sm:$0xff]  }
 0x46a   :  { %6786 = vmatprep.subr.bf16.mxu1 %v11688_v7  ;;  %v11760_v7 = vld [vmem:[#allocation6 + $0x3dc] ss:$144 sps:$4 sm:$0xff]  }
 0x46c   :  { %6701 = vmatpush1.bf16.msra.mxu0 %v11683_v8  ;;  %v11755_v8 = vld [vmem:[#allocation6 + $0x3d0] ss:$144 sps:$4 sm:$0xff]  }
 0x46d   :  { %6787 = vmatpush1.bf16.msra.mxu1 %v11686_v10  ;;  %6713 = vmatprep.subr.bf16.mxu0 %v11691_v12  ;;  %v11758_v10 = vld [vmem:[#allocation6 + $0x3d8] ss:$144 sps:$4 sm:$0xff]   ;;  %v11763_v12 = vld [vmem:[#allocation6 + $0x4f4] ss:$144 sps:$4 sm:$0xff]  }
 0x46e   :  { %6799 = vmatprep.subr.bf16.mxu1 %v11694_v13  ;;  %v11766_v13 = vld [vmem:[#allocation6 + $0x4fc] ss:$144 sps:$4 sm:$0xff]  }
 0x46f   :  { %6703 = vmatmul.mubr.bf16.vlgmr.msra.gmra.mrb[28].mxu0 %v12875_v47 }
 0x470   :  { %6789 = vmatmul.mubr.bf16.vlgmr.msra.gmra.mrb[28].mxu1 %v12875_v47  ;;  %6714 = vmatpush1.bf16.msra.mxu0 %v11689_v14  ;;  %v11761_v14 = vld [vmem:[#allocation6 + $0x4f0] ss:$144 sps:$4 sm:$0xff]  }
 0x471   :  { %6800 = vmatpush1.bf16.msra.mxu1 %v11692_v15  ;;  %6715 = vmatprep.subr.bf16.mxu0 %v11697_v16  ;;  %v11764_v15 = vld [vmem:[#allocation6 + $0x4f8] ss:$144 sps:$4 sm:$0xff]   ;;  %v11769_v16 = vld [vmem:[#allocation6 + $0x614] ss:$144 sps:$4 sm:$0xff]  }
 0x472   :  { %6801 = vmatprep.subr.bf16.mxu1 %v11700_v17  ;;  %6745 = vmatprep.mubr.bf16.mxu0 %v12613_v1  ;;  %v13048_v17 = vsub.s32 1, %v12930_v55 }
 0x473   :  { %6831 = vmatprep.mubr.bf16.mxu1 %v12613_v1 }
 0x474   :  { %6716 = vmatpush1.bf16.msra.mxu0 %v11695_v18  ;;  %v7454_v18 = vsub.s32 5, %v12930_v55 }
 0x475   :  { %6802 = vmatpush1.bf16.msra.mxu1 %v11698_v24  ;;  %6717 = vmatprep.subr.bf16.mxu0 %v11703_v26  ;;  %v11772_v24 = vld [vmem:[#allocation6 + $0x61c] ss:$144 sps:$4 sm:$0xff]   ;;  %v11767_v26 = vld [vmem:[#allocation6 + $0x610] ss:$144 sps:$4 sm:$0xff]  }
 0x476   :  { %6803 = vmatprep.subr.bf16.mxu1 %v11706_v27  ;;  %v11770_v27 = vld [vmem:[#allocation6 + $0x618] ss:$144 sps:$4 sm:$0xff]  }
 0x478   :  { %6718 = vmatpush1.bf16.msra.mxu0 %v11701_v28  ;;  %v12289_v28 = vld [vmem:[#allocation8] sm:$0x77] }
 0x479   :  { %6804 = vmatpush1.bf16.msra.mxu1 %v11704_v35  ;;  %6719 = vmatprep.subr.bf16.mxu0 %v11709_v36  ;;  %v7451_v35 = vrot.slane %v12289_v28, %v13048_v17  ;;  %v7455_v36 = vrot.slane %v12289_v28, %v7454_v18 }
 0x47a   :  { %6805 = vmatprep.subr.bf16.mxu1 %v11712_v20  ;;  %v11775_v20 = vld [vmem:[#allocation6 + $0x734] ss:$144 sps:$4 sm:$0xff]  }
 0x47c   :  { %6720 = vmatpush1.bf16.msra.mxu0 %v11707_v37 }
 0x47d   :  { %6806 = vmatpush1.bf16.msra.mxu1 %v11710_v39  ;;  %6721 = vmatprep.subr.bf16.mxu0 %v11715_v23  ;;  %v11778_v39 = vld [vmem:[#allocation6 + $0x73c] ss:$144 sps:$4 sm:$0xff]  }
 0x47e   :  { %6807 = vmatprep.subr.bf16.mxu1 %v11718_v34 }
 0x480   :  { %6722 = vmatpush1.bf16.msra.mxu0 %v11713_v42 }
 0x481   :  { %6808 = vmatpush1.bf16.msra.mxu1 %v11716_v19  ;;  %6723 = vmatprep.subr.bf16.mxu0 %v11721_v43  ;;  %v11773_v43 = vld [vmem:[#allocation6 + $0x730] ss:$144 sps:$4 sm:$0xff]  }
 0x482   :  { %6809 = vmatprep.subr.bf16.mxu1 %v11724_v29  ;;  %v11776_v29 = vld [vmem:[#allocation6 + $0x738] ss:$144 sps:$4 sm:$0xff]  }
 0x484   :  { %6724 = vmatpush1.bf16.msra.mxu0 %v11719_v44 }
 0x485   :  { %6810 = vmatpush1.bf16.msra.mxu1 %v11722_v45  ;;  %6725 = vmatprep.subr.bf16.mxu0 %v11727_v46 }
 0x486   :  { %6811 = vmatprep.subr.bf16.mxu1 %v11730_v49  ;;  %v7466_v49 = vrot.slane %v7451_v35, %v13048_v17  ;;  %v11788_v35 = vld [vmem:[#allocation6 + $0x978] ss:$144 sps:$4 sm:$0xff]  }
 0x488   :  { %6726 = vmatpush1.bf16.msra.mxu0 %v11725_v50 }
 0x489   :  { %6812 = vmatpush1.bf16.msra.mxu1 %v11728_v51  ;;  %6727 = vmatprep.subr.bf16.mxu0 %v11733_v6  ;;  %v7470_v51 = vrot.slane %v7455_v36, %v13048_v17  ;;  %v11781_v6 = vld [vmem:[#allocation6 + $0x854] ss:$144 sps:$4 sm:$0xff]  }
 0x48a   :  { %6813 = vmatprep.subr.bf16.mxu1 %v11736_v11  ;;  %v11793_v36 = vld [vmem:[#allocation6 + $0xa94] ss:$144 sps:$4 sm:$0xff]  }
 0x48c   :  { %6728 = vmatpush1.bf16.msra.mxu0 %v11731_v52 }
 0x48d   :  { %6814 = vmatpush1.bf16.msra.mxu1 %v11734_v54  ;;  %6842 = vmatprep.subr.bf16.mxu0 %v11739_v56 }
 0x48e   :  { %6928 = vmatprep.subr.bf16.mxu1 %v11742_v21 }
 0x48f   :  { %6746 = vmatmul.mubr.bf16.vlgmr.msra.gmra.mrb[28].mxu0 %v12877_v48 }
 0x490   :  { %6832 = vmatmul.mubr.bf16.vlgmr.msra.gmra.mrb[28].mxu1 %v12877_v48  ;;  %6843 = vmatpush1.bf16.msra.mxu0 %v11737_v57 }
 0x491   :  { %6874 = vmatprep.mubr.bf16.mxu0 %v12879_v53  ;;  %6929 = vmatpush1.bf16.msra.mxu1 %v11740_v58 }
 0x492   :  { %6960 = vmatprep.mubr.bf16.mxu1 %v12879_v53  ;;  %6844 = vmatprep.subr.bf16.mxu0 %v11745_v59 }
 0x493   :  { %6930 = vmatprep.subr.bf16.mxu1 %v11748_v4 }
 0x494   :  { %6845 = vmatpush1.bf16.msra.mxu0 %v11743_v61  ;;  %v11784_v61 = vld [vmem:[#allocation6 + $0x85c] ss:$144 sps:$4 sm:$0xff]  }
 0x495   :  { %6931 = vmatpush1.bf16.msra.mxu1 %v11746_v63  ;;  %6846 = vmatprep.subr.bf16.mxu0 %v11751_v9 }
 0x496   :  { %6932 = vmatprep.subr.bf16.mxu1 %v11754_v31 }
 0x498   :  { %6847 = vmatpush1.bf16.msra.mxu0 %v11749_v0 }
 0x499   :  { %6933 = vmatpush1.bf16.msra.mxu1 %v11752_v3  ;;  %6848 = vmatprep.subr.bf16.mxu0 %v11757_v5  ;;  %v11779_v3 = vld [vmem:[#allocation6 + $0x850] ss:$144 sps:$4 sm:$0xff]  }
 0x49a   :  { %6934 = vmatprep.subr.bf16.mxu1 %v11760_v7 }
 0x49c   :  { %6849 = vmatpush1.bf16.msra.mxu0 %v11755_v8 }
 0x49d   :  { %6935 = vmatpush1.bf16.msra.mxu1 %v11758_v10  ;;  %6850 = vmatprep.subr.bf16.mxu0 %v11763_v12  ;;  %v11782_v12 = vld [vmem:[#allocation6 + $0x858] ss:$144 sps:$4 sm:$0xff]  }
 0x49e   :  { %6936 = vmatprep.subr.bf16.mxu1 %v11766_v13  ;;  %v11787_v13 = vld [vmem:[#allocation6 + $0x974] ss:$144 sps:$4 sm:$0xff]  }
 0x4a0   :  { %6851 = vmatpush1.bf16.msra.mxu0 %v11761_v14 }
 0x4a1   :  { %6937 = vmatpush1.bf16.msra.mxu1 %v11764_v15  ;;  %6852 = vmatprep.subr.bf16.mxu0 %v11769_v16 }
 0x4a2   :  { %v6403_v37 = vpop.f32.mrb[20].mxu0  ;;  %6938 = vmatprep.subr.bf16.mxu1 %v11772_v24 }
 0x4a3   :  { %v6489_v23 = vpop.f32.mrb[20].mxu1  ;;  %v6405_v34 = vpop.f32.mrb[21].mxu0  ;;  %v7390_v44 = vrot.slane %v6403_v37, 2 }
 0x4a4   :  { %v6491_v42 = vpop.f32.mrb[21].mxu1  ;;  %v6407_v19 = vpop.f32.mrb[22].mxu0  ;;  %6853 = vmatpush1.bf16.msra.mxu0 %v11767_v26  ;;  %v7421_v11 = vrot.slane %v6489_v23, 3  ;;  %v7393_v52 = vrot.slane %v6405_v34, 2  ;;  %v11785_v26 = vld [vmem:[#allocation6 + $0x970] ss:$144 sps:$4 sm:$0xff]  }
 0x4a5   :  { %v7391_v45 = vrot.slane %v6407_v19, 2  ;;  %v6493_v46 = vpop.f32.mrb[22].mxu1  ;;  %6939 = vmatpush1.bf16.msra.mxu1 %v11770_v27  ;;  %v6409_v50 = vpop.f32.mrb[23].mxu0  ;;  %6854 = vmatprep.subr.bf16.mxu0 %v11775_v20  ;;  %v7424_v57 = vrot.slane %v6491_v42, 3  ;;  %v11796_v20 = vld [vmem:[#allocation6 + $0xa9c] ss:$144 sps:$4 sm:$0xff]  }
 0x4a6   :  { %v7422_v54 = vrot.slane %v6493_v46, 3  ;;  %v7394_v56 = vrot.slane %v6409_v50, 2  ;;  %v6495_v21 = vpop.f32.mrb[23].mxu1  ;;  %6940 = vmatprep.subr.bf16.mxu1 %v11778_v39  ;;  %v11799_v46 = vld [vmem:[#allocation6 + $0xbb4] ss:$144 sps:$4 sm:$0xff]  }
 0x4a7   :  { %v7392_v58 = vsel %vm7228_vm5, %v7390_v44, %v7391_v45  ;;  %v7406_v59 = vsel %vm7228_vm5, %v7391_v45, %v7390_v44  ;;  %v7425_v4 = vrot.slane %v6495_v21, 3  ;;  %v11794_v45 = vld [vmem:[#allocation6 + $0xa98] ss:$144 sps:$4 sm:$0xff]  }
 0x4a8   :  { %v7409_v63 = vadd.f32 %v7392_v58, %v13028_v30  ;;  %v7412_v9 = vadd.f32 %v7406_v59, %v13031_v38  ;;  %v7423_v31 = vsel %vm7420_vm8, %v7421_v11, %v7422_v54  ;;  %v7439_v0 = vsel %vm7420_vm8, %v7422_v54, %v7421_v11  ;;  %6855 = vmatpush1.bf16.msra.mxu0 %v11773_v43  ;;  %v11791_v43 = vld [vmem:[#allocation6 + $0xa90] ss:$144 sps:$4 sm:$0xff]   ;;  %v11802_v11 = vld [vmem:[#allocation6 + $0xbbc] ss:$144 sps:$4 sm:$0xff]   ;;  %v11800_v58 = vld [vmem:[#allocation6 + $0xbb8] ss:$144 sps:$4 sm:$0xff]  }
 0x4a9   :  { %v7442_v5 = vadd.f32 %v7423_v31, %v13035_v40  ;;  %v7445_v7 = vadd.f32 %v7439_v0, %v13037_v41  ;;  %v7395_v8 = vsel %vm7228_vm5, %v7393_v52, %v7394_v56  ;;  %v7407_v10 = vsel %vm7228_vm5, %v7394_v56, %v7393_v52  ;;  %6941 = vmatpush1.bf16.msra.mxu1 %v11776_v29  ;;  %v11790_v40 = vld [vmem:[#allocation6 + $0x97c] ss:$144 sps:$4 sm:$0xff]   ;;  %v11805_v59 = vld [vmem:[#allocation6 + $0xcd4] ss:$144 sps:$4 sm:$0xff]  }
 0x4aa   :  { %v13065_v30 = vadd.f32 %v7395_v8, %v13020_v32  ;;  %v13068_v38 = vadd.f32 %v7407_v10, %v13023_v33  ;;  %v7426_v14 = vsel %vm7420_vm8, %v7424_v57, %v7425_v4  ;;  %v7440_v15 = vsel %vm7420_vm8, %v7425_v4, %v7424_v57  ;;  %6856 = vmatprep.subr.bf16.mxu0 %v11781_v6  ;;  %v11797_v57 = vld [vmem:[#allocation6 + $0xbb0] ss:$144 sps:$4 sm:$0xff]   ;;  %v11808_v31 = vld [vmem:[#allocation6 + $0xcdc] ss:$144 sps:$4 sm:$0xff]   ;;  %v11806_v10 = vld [vmem:[#allocation6 + $0xcd8] ss:$144 sps:$4 sm:$0xff]  }
 0x4ab   :  { %v7475_v41 = vadd.f32 %v7466_v49, %v7442_v5  ;;  %v7478_v16 = vadd.f32 %v7466_v49, %v7445_v7  ;;  %v7443_v18 = vadd.f32 %v7426_v14, %v7409_v63  ;;  %v7446_v24 = vadd.f32 %v7440_v15, %v7412_v9  ;;  %6942 = vmatprep.subr.bf16.mxu1 %v11784_v61  ;;  %v11803_v8 = vld [vmem:[#allocation6 + $0xcd0] ss:$144 sps:$4 sm:$0xff]  }
 0x4ac   :  { %6857 = vmatpush1.bf16.msra.mxu0 %v11779_v3 }
 0x4ad   :  { %v7481_v32 = vmax.f32 %v7475_v41, 0.0  ;;  %v7484_v27 = vmax.f32 %v7478_v16, 0.0  ;;  %v7476_v28 = vadd.f32 %v7470_v51, %v7443_v18  ;;  %v7479_v33 = vadd.f32 %v7470_v51, %v7446_v24  ;;  %6943 = vmatpush1.bf16.msra.mxu1 %v11782_v12  ;;  %6858 = vmatprep.subr.bf16.mxu0 %v11787_v13  ;;  %v11811_v12 = vld [vmem:[#allocation6 + $0xdf4] ss:$144 sps:$4 sm:$0xff]   ;;  %v11814_v41 = vld [vmem:[#allocation6 + $0xdfc] ss:$144 sps:$4 sm:$0xff]  }
 0x4ae   :  { %6944 = vmatprep.subr.bf16.mxu1 %v11790_v40  ;;  %v11809_v24 = vld [vmem:[#allocation6 + $0xdf0] ss:$144 sps:$4 sm:$0xff]  }
 0x4af   :  { %v7490_v37 = vsel %vm7487_vm9, %v7481_v32, 0.0  ;;  %v7511_v39 = vsel %vm7487_vm9, %v7484_v27, 0.0  ;;  %v7482_v23 = vmax.f32 %v7476_v28, 0.0  ;;  %v7485_v34 = vmax.f32 %v7479_v33, 0.0  ;;  %v11812_v32 = vld [vmem:[#allocation6 + $0xdf8] ss:$144 sps:$4 sm:$0xff]  }
 0x4b0   :  { %v7493_v42 = vrot.slane %v7490_v37, 4  ;;  %v7514_v19 = vrot.slane %v7511_v39, 4  ;;  %6859 = vmatpush1.bf16.msra.mxu0 %v11785_v26  ;;  %v11817_v27 = vld [vmem:[#allocation6 + $0xf14] ss:$144 sps:$4 sm:$0xff]   ;;  %v11820_v28 = vld [vmem:[#allocation6 + $0xf1c] ss:$144 sps:$4 sm:$0xff]  }
 0x4b1   :  { %v7491_v29 = vsel %vm7487_vm9, %v7482_v23, 0.0  ;;  %v7512_v44 = vsel %vm7487_vm9, %v7485_v34, 0.0  ;;  %6945 = vmatpush1.bf16.msra.mxu1 %v11788_v35  ;;  %6860 = vmatprep.subr.bf16.mxu0 %v11793_v36  ;;  %v11823_v23 = vld [vmem:[#allocation6 + $0x1034] ss:$144 sps:$4 sm:$0xff]  }
 0x4b2   :  { %v7494_v49 = vmax.f32 %v7490_v37, %v7493_v42  ;;  %v7515_v50 = vmax.f32 %v7511_v39, %v7514_v19  ;;  %v7499_v51 = vrot.slane %v7491_v29, 4  ;;  %v7520_v6 = vrot.slane %v7512_v44, 4  ;;  %6946 = vmatprep.subr.bf16.mxu1 %v11796_v20  ;;  %v11815_v20 = vld [vmem:[#allocation6 + $0xf10] ss:$144 sps:$4 sm:$0xff]   ;;  %v11818_v39 = vld [vmem:[#allocation6 + $0xf18] ss:$144 sps:$4 sm:$0xff]  }
 0x4b3   :  { %v11826_v42 = vld [vmem:[#allocation6 + $0x103c] ss:$144 sps:$4 sm:$0xff]   ;;  %v11821_v19 = vld [vmem:[#allocation6 + $0x1030] ss:$144 sps:$4 sm:$0xff]  }
 0x4b4   :  { %v7495_v52 = vrot.slane %v7494_v49, 2  ;;  %v7516_v54 = vrot.slane %v7515_v50, 2  ;;  %v7500_v56 = vmax.f32 %v7491_v29, %v7499_v51  ;;  %v7521_v21 = vmax.f32 %v7512_v44, %v7520_v6  ;;  %6861 = vmatpush1.bf16.msra.mxu0 %v11791_v43  ;;  %v11824_v43 = vld [vmem:[#allocation6 + $0x1038] ss:$144 sps:$4 sm:$0xff]   ;;  %v11829_v29 = vld [vmem:[#allocation6 + $0x1154] ss:$144 sps:$4 sm:$0xff]  }
 0x4b5   :  { %6947 = vmatpush1.bf16.msra.mxu1 %v11794_v45  ;;  %6862 = vmatprep.subr.bf16.mxu0 %v11799_v46  ;;  %v11832_v44 = vld [vmem:[#allocation6 + $0x115c] ss:$144 sps:$4 sm:$0xff]   ;;  %v11830_v45 = vld [vmem:[#allocation6 + $0x1158] ss:$144 sps:$4 sm:$0xff]   ;;  %v11835_v46 = vld [vmem:[#allocation6 + $0x1274] ss:$144 sps:$4 sm:$0xff]  }
 0x4b6   :  { %v7496_v4 = vmax.f32 %v7494_v49, %v7495_v52  ;;  %v7517_v61 = vmax.f32 %v7515_v50, %v7516_v54  ;;  %v7501_v63 = vrot.slane %v7500_v56, 2  ;;  %v7522_v9 = vrot.slane %v7521_v21, 2  ;;  %6948 = vmatprep.subr.bf16.mxu1 %v11802_v11  ;;  %v11838_v49 = vld [vmem:[#allocation6 + $0x127c] ss:$144 sps:$4 sm:$0xff]   ;;  %v11836_v50 = vld [vmem:[#allocation6 + $0x1278] ss:$144 sps:$4 sm:$0xff]  }
 0x4b7   :  { %v11841_v51 = vld [vmem:[#allocation6 + $0x1394] ss:$144 sps:$4 sm:$0xff]   ;;  %v11844_v6 = vld [vmem:[#allocation6 + $0x139c] ss:$144 sps:$4 sm:$0xff]   ;;  %v11839_v11 = vld [vmem:[#allocation6 + $0x1390] ss:$144 sps:$4 sm:$0xff]  }
 0x4b8   :  { %v7497_v0 = vrot.slane %v7496_v4, 1  ;;  %v7518_v3 = vrot.slane %v7517_v61, 1  ;;  %v7502_v5 = vmax.f32 %v7500_v56, %v7501_v63  ;;  %v7523_v7 = vmax.f32 %v7521_v21, %v7522_v9  ;;  %6863 = vmatpush1.bf16.msra.mxu0 %v11797_v57  ;;  %v11842_v52 = vld [vmem:[#allocation6 + $0x1398] ss:$144 sps:$4 sm:$0xff]   ;;  %v11847_v54 = vld [vmem:[#allocation6 + $0x14b4] ss:$144 sps:$4 sm:$0xff]  }
 0x4b9   :  { %6949 = vmatpush1.bf16.msra.mxu1 %v11800_v58  ;;  %6864 = vmatprep.subr.bf16.mxu0 %v11805_v59  ;;  %v11850_v56 = vld [vmem:[#allocation6 + $0x14bc] ss:$144 sps:$4 sm:$0xff]   ;;  %v11845_v21 = vld [vmem:[#allocation6 + $0x14b0] ss:$144 sps:$4 sm:$0xff]   ;;  %v11848_v57 = vld [vmem:[#allocation6 + $0x14b8] ss:$144 sps:$4 sm:$0xff]  }
 0x4ba   :  { %v7498_v13 = vmax.f32 %v7496_v4, %v7497_v0  ;;  %v7519_v14 = vmax.f32 %v7517_v61, %v7518_v3  ;;  %v7503_v15 = vrot.slane %v7502_v5, 1  ;;  %v7524_v40 = vrot.slane %v7523_v7, 1  ;;  %6950 = vmatprep.subr.bf16.mxu1 %v11808_v31  ;;  %v11853_v58 = vld [vmem:[#allocation6 + $0x15d4] ss:$144 sps:$4 sm:$0xff]   ;;  %v11856_v59 = vld [vmem:[#allocation6 + $0x15dc] ss:$144 sps:$4 sm:$0xff]  }
 0x4bb   :  { %v11851_v4 = vld [vmem:[#allocation6 + $0x15d0] ss:$144 sps:$4 sm:$0xff]   ;;  %v11854_v61 = vld [vmem:[#allocation6 + $0x15d8] ss:$144 sps:$4 sm:$0xff]   ;;  %v11859_v63 = vld [vmem:[#allocation6 + $0x16f4] ss:$144 sps:$4 sm:$0xff]  }
 0x4bc   :  { %v7504_v16 = vmax.f32 %v7502_v5, %v7503_v15  ;;  %v7525_v18 = vmax.f32 %v7523_v7, %v7524_v40  ;;  %6865 = vmatpush1.bf16.msra.mxu0 %v11803_v8  ;;  %v7532_v26 = vsel %vm7344_vm7, %v7498_v13, %v7519_v14  ;;  %v11862_v9 = vld [vmem:[#allocation6 + $0x16fc] ss:$144 sps:$4 sm:$0xff]   ;;  %v11857_v31 = vld [vmem:[#allocation6 + $0x16f0] ss:$144 sps:$4 sm:$0xff]   ;;  %v11860_v0 = vld [vmem:[#allocation6 + $0x16f8] ss:$144 sps:$4 sm:$0xff]  }
 0x4bd   :  { %6951 = vmatpush1.bf16.msra.mxu1 %v11806_v10  ;;  %6866 = vmatprep.subr.bf16.mxu0 %v11811_v12  ;;  %v7758_v35 = vrot.slane %v7532_v26, 6  ;;  %v11865_v3 = vld [vmem:[#allocation6 + $0x1814] ss:$144 sps:$4 sm:$0xff]   ;;  %v11868_v5 = vld [vmem:[#allocation6 + $0x181c] ss:$144 sps:$4 sm:$0xff]  }
 0x4be   :  { %6952 = vmatprep.subr.bf16.mxu1 %v11814_v41  ;;  %v7533_v33 = vsel %vm7344_vm7, %v7504_v16, %v7525_v18  ;;  %v11863_v7 = vld [vmem:[#allocation6 + $0x1810] ss:$144 sps:$4 sm:$0xff]   ;;  %v11866_v8 = vld [vmem:[#allocation6 + $0x1818] ss:$144 sps:$4 sm:$0xff]   ;;  %v11871_v10 = vld [vmem:[#allocation6 + $0x1934] ss:$144 sps:$4 sm:$0xff]  }
 0x4bf   :  { %v7759_v36 = vrot.slane %v7533_v33, 6  ;;  %v13085_v37 = vsel %vm7773_vm10, %v12967_v22, %v7758_v35  ;;  %v11827_v22 = vld [vmem:[#allocation6 + $0x1150] ss:$144 sps:$4 sm:$0xff]   ;;  %v11874_v12 = vld [vmem:[#allocation6 + $0x193c] ss:$144 sps:$4 sm:$0xff]  }
 0x4c0   :  { %6867 = vmatpush1.bf16.msra.mxu0 %v11809_v24  ;;  %v11869_v13 = vld [vmem:[#allocation6 + $0x1930] ss:$144 sps:$4 sm:$0xff]   ;;  %v11872_v14 = vld [vmem:[#allocation6 + $0x1938] ss:$144 sps:$4 sm:$0xff]   ;;  %v11877_v15 = vld [vmem:[#allocation6 + $0x1a54] ss:$144 sps:$4 sm:$0xff]  }
 0x4c1   :  { %6953 = vmatpush1.bf16.msra.mxu1 %v11812_v32  ;;  %6868 = vmatprep.subr.bf16.mxu0 %v11817_v27  ;;  %v13089_v34 = vsel %vm7773_vm10, %v12970_v60, %v7759_v36  ;;  %v11833_v60 = vld [vmem:[#allocation6 + $0x1270] ss:$144 sps:$4 sm:$0xff]   ;;  %v11880_v40 = vld [vmem:[#allocation6 + $0x1a5c] ss:$144 sps:$4 sm:$0xff]   ;;  %v11878_v16 = vld [vmem:[#allocation6 + $0x1a58] ss:$144 sps:$4 sm:$0xff]  }
 0x4c2   :  { %6954 = vmatprep.subr.bf16.mxu1 %v11820_v28  ;;  %v11875_v41 = vld [vmem:[#allocation6 + $0x1a50] ss:$144 sps:$4 sm:$0xff]   ;;  %v11883_v18 = vld [vmem:[#allocation6 + $0x84] ss:$144 sps:$4 sm:$0xff]   ;;  %v11886_v24 = vld [vmem:[#allocation6 + $0x8c] ss:$144 sps:$4 sm:$0xff]  }
 0x4c3   :  { %v11881_v26 = vld [vmem:[#allocation6 + $0x80] ss:$144 sps:$4 sm:$0xff]   ;;  %v11884_v32 = vld [vmem:[#allocation6 + $0x88] ss:$144 sps:$4 sm:$0xff]   ;;  %v11889_v27 = vld [vmem:[#allocation6 + $0x1a4] ss:$144 sps:$4 sm:$0xff]  }
 0x4c4   :  { %6869 = vmatpush1.bf16.msra.mxu0 %v11815_v20  ;;  %v11892_v28 = vld [vmem:[#allocation6 + $0x1ac] ss:$144 sps:$4 sm:$0xff]   ;;  %v11887_v33 = vld [vmem:[#allocation6 + $0x1a0] ss:$144 sps:$4 sm:$0xff]   ;;  %v11890_v35 = vld [vmem:[#allocation6 + $0x1a8] ss:$144 sps:$4 sm:$0xff]  }
 0x4c5   :  { %6955 = vmatpush1.bf16.msra.mxu1 %v11818_v39  ;;  %6870 = vmatprep.subr.bf16.mxu0 %v11823_v23  ;;  %v11895_v36 = vld [vmem:[#allocation6 + $0x2c4] ss:$144 sps:$4 sm:$0xff]   ;;  %v11898_v20 = vld [vmem:[#allocation6 + $0x2cc] ss:$144 sps:$4 sm:$0xff]   ;;  %v11893_v39 = vld [vmem:[#allocation6 + $0x2c0] ss:$144 sps:$4 sm:$0xff]  }
 0x4c6   :  { %6956 = vmatprep.subr.bf16.mxu1 %v11826_v42  ;;  %v11896_v23 = vld [vmem:[#allocation6 + $0x2c8] ss:$144 sps:$4 sm:$0xff]   ;;  %v11901_v42 = vld [vmem:[#allocation6 + $0x3e4] ss:$144 sps:$4 sm:$0xff]  }
 0x4c8   :  { %6871 = vmatpush1.bf16.msra.mxu0 %v11821_v19  ;;  %v11904_v19 = vld [vmem:[#allocation6 + $0x3ec] ss:$144 sps:$4 sm:$0xff]  }
 0x4c9   :  { %6957 = vmatpush1.bf16.msra.mxu1 %v11824_v43  ;;  %6872 = vmatprep.subr.bf16.mxu0 %v11829_v29  ;;  %v11899_v43 = vld [vmem:[#allocation6 + $0x3e0] ss:$144 sps:$4 sm:$0xff]   ;;  %v11902_v29 = vld [vmem:[#allocation6 + $0x3e8] ss:$144 sps:$4 sm:$0xff]  }
 0x4ca   :  { %6958 = vmatprep.subr.bf16.mxu1 %v11832_v44  ;;  %v11907_v44 = vld [vmem:[#allocation6 + $0x504] ss:$144 sps:$4 sm:$0xff]  }
 0x4cc   :  { %6873 = vmatpush1.bf16.msra.mxu0 %v11827_v22  ;;  %v11910_v22 = vld [vmem:[#allocation6 + $0x50c] ss:$144 sps:$4 sm:$0xff]  }
 0x4cd   :  { %6959 = vmatpush1.bf16.msra.mxu1 %v11830_v45  ;;  %6885 = vmatprep.subr.bf16.mxu0 %v11835_v46  ;;  %v11908_v45 = vld [vmem:[#allocation6 + $0x508] ss:$144 sps:$4 sm:$0xff]   ;;  %v11913_v46 = vld [vmem:[#allocation6 + $0x624] ss:$144 sps:$4 sm:$0xff]  }
 0x4ce   :  { %6971 = vmatprep.subr.bf16.mxu1 %v11838_v49  ;;  %v11916_v49 = vld [vmem:[#allocation6 + $0x62c] ss:$144 sps:$4 sm:$0xff]  }
 0x4cf   :  { %6875 = vmatmul.mubr.bf16.vlgmr.msra.gmra.mrb[32].mxu0 %v12875_v47 }
 0x4d0   :  { %6961 = vmatmul.mubr.bf16.vlgmr.msra.gmra.mrb[32].mxu1 %v12875_v47  ;;  %6886 = vmatpush1.bf16.msra.mxu0 %v11833_v60  ;;  %v11911_v60 = vld [vmem:[#allocation6 + $0x620] ss:$144 sps:$4 sm:$0xff]  }
 0x4d1   :  { %6972 = vmatpush1.bf16.msra.mxu1 %v11836_v50  ;;  %6887 = vmatprep.subr.bf16.mxu0 %v11841_v51  ;;  %v11914_v50 = vld [vmem:[#allocation6 + $0x628] ss:$144 sps:$4 sm:$0xff]   ;;  %v11919_v51 = vld [vmem:[#allocation6 + $0x744] ss:$144 sps:$4 sm:$0xff]  }
 0x4d2   :  { %6973 = vmatprep.subr.bf16.mxu1 %v11844_v6  ;;  %6917 = vmatprep.mubr.bf16.mxu0 %v12613_v1 }
 0x4d3   :  { %7003 = vmatprep.mubr.bf16.mxu1 %v12613_v1 }
 0x4d4   :  { %6888 = vmatpush1.bf16.msra.mxu0 %v11839_v11  ;;  %v13099_v11 = vld [vmem:[#allocation8 + $0x8] sm:$0x7] }
 0x4d5   :  { %6974 = vmatpush1.bf16.msra.mxu1 %v11842_v52  ;;  %6889 = vmatprep.subr.bf16.mxu0 %v11847_v54  ;;  %v7459_v52 = vrot.slane %v13099_v11, %v13048_v17  ;;  %v11922_v54 = vld [vmem:[#allocation6 + $0x74c] ss:$144 sps:$4 sm:$0xff]  }
 0x4d6   :  { %6975 = vmatprep.subr.bf16.mxu1 %v11850_v56 }
 0x4d8   :  { %6890 = vmatpush1.bf16.msra.mxu0 %v11845_v21 }
 0x4d9   :  { %6976 = vmatpush1.bf16.msra.mxu1 %v11848_v57  ;;  %6891 = vmatprep.subr.bf16.mxu0 %v11853_v58 }
 0x4da   :  { %6977 = vmatprep.subr.bf16.mxu1 %v11856_v59  ;;  %v11917_v59 = vld [vmem:[#allocation6 + $0x740] ss:$144 sps:$4 sm:$0xff]  }
 0x4dc   :  { %6892 = vmatpush1.bf16.msra.mxu0 %v11851_v4  ;;  %v11920_v4 = vld [vmem:[#allocation6 + $0x748] ss:$144 sps:$4 sm:$0xff]  }
 0x4dd   :  { %6978 = vmatpush1.bf16.msra.mxu1 %v11854_v61  ;;  %6893 = vmatprep.subr.bf16.mxu0 %v11859_v63 }
 0x4de   :  { %6979 = vmatprep.subr.bf16.mxu1 %v11862_v9 }
 0x4e0   :  { %6894 = vmatpush1.bf16.msra.mxu0 %v11857_v31 }
 0x4e1   :  { %6980 = vmatpush1.bf16.msra.mxu1 %v11860_v0  ;;  %6895 = vmatprep.subr.bf16.mxu0 %v11865_v3  ;;  %v11925_v0 = vld [vmem:[#allocation6 + $0x864] ss:$144 sps:$4 sm:$0xff]   ;;  %v7474_v3 = vrot.slane %v7459_v52, %v13048_v17 }
 0x4e2   :  { %6981 = vmatprep.subr.bf16.mxu1 %v11868_v5 }
 0x4e4   :  { %6896 = vmatpush1.bf16.msra.mxu0 %v11863_v7  ;;  %v11928_v7 = vld [vmem:[#allocation6 + $0x86c] ss:$144 sps:$4 sm:$0xff]  }
 0x4e5   :  { %6982 = vmatpush1.bf16.msra.mxu1 %v11866_v8  ;;  %6897 = vmatprep.subr.bf16.mxu0 %v11871_v10 }
 0x4e6   :  { %6983 = vmatprep.subr.bf16.mxu1 %v11874_v12 }
 0x4e8   :  { %6898 = vmatpush1.bf16.msra.mxu0 %v11869_v13 }
 0x4e9   :  { %6984 = vmatpush1.bf16.msra.mxu1 %v11872_v14  ;;  %6899 = vmatprep.subr.bf16.mxu0 %v11877_v15  ;;  %v11923_v14 = vld [vmem:[#allocation6 + $0x860] ss:$144 sps:$4 sm:$0xff]   ;;  %v11926_v15 = vld [vmem:[#allocation6 + $0x868] ss:$144 sps:$4 sm:$0xff]  }
 0x4ea   :  { %6985 = vmatprep.subr.bf16.mxu1 %v11880_v40  ;;  %v11931_v40 = vld [vmem:[#allocation6 + $0x984] ss:$144 sps:$4 sm:$0xff]  }
 0x4ec   :  { %6900 = vmatpush1.bf16.msra.mxu0 %v11875_v41 }
 0x4ed   :  { %6986 = vmatpush1.bf16.msra.mxu1 %v11878_v16  ;;  %7014 = vmatprep.subr.bf16.mxu0 %v11883_v18  ;;  %v11934_v18 = vld [vmem:[#allocation6 + $0x98c] ss:$144 sps:$4 sm:$0xff]  }
 0x4ee   :  { %7100 = vmatprep.subr.bf16.mxu1 %v11886_v24 }
 0x4ef   :  { %6918 = vmatmul.mubr.bf16.vlgmr.msra.gmra.mrb[32].mxu0 %v12877_v48 }
 0x4f0   :  { %7004 = vmatmul.mubr.bf16.vlgmr.msra.gmra.mrb[32].mxu1 %v12877_v48  ;;  %7015 = vmatpush1.bf16.msra.mxu0 %v11881_v26 }
 0x4f1   :  { %7046 = vmatprep.mubr.bf16.mxu0 %v12879_v53  ;;  %7101 = vmatpush1.bf16.msra.mxu1 %v11884_v32  ;;  %v11929_v32 = vld [vmem:[#allocation6 + $0x980] ss:$144 sps:$4 sm:$0xff]  }
 0x4f2   :  { %7132 = vmatprep.mubr.bf16.mxu1 %v12879_v53  ;;  %7016 = vmatprep.subr.bf16.mxu0 %v11889_v27  ;;  %v11905_v53 = vld [vmem:[#allocation6 + $0x500] ss:$144 sps:$4 sm:$0xff]   ;;  %v11932_v27 = vld [vmem:[#allocation6 + $0x988] ss:$144 sps:$4 sm:$0xff]  }
 0x4f3   :  { %7102 = vmatprep.subr.bf16.mxu1 %v11892_v28 }
 0x4f4   :  { %7017 = vmatpush1.bf16.msra.mxu0 %v11887_v33  ;;  %v11940_v33 = vld [vmem:[#allocation6 + $0xaac] ss:$144 sps:$4 sm:$0xff]  }
 0x4f5   :  { %7103 = vmatpush1.bf16.msra.mxu1 %v11890_v35  ;;  %7018 = vmatprep.subr.bf16.mxu0 %v11895_v36 }
 0x4f6   :  { %7104 = vmatprep.subr.bf16.mxu1 %v11898_v20  ;;  %v11935_v20 = vld [vmem:[#allocation6 + $0xaa0] ss:$144 sps:$4 sm:$0xff]  }
 0x4f8   :  { %7019 = vmatpush1.bf16.msra.mxu0 %v11893_v39 }
 0x4f9   :  { %7105 = vmatpush1.bf16.msra.mxu1 %v11896_v23  ;;  %7020 = vmatprep.subr.bf16.mxu0 %v11901_v42  ;;  %v11938_v42 = vld [vmem:[#allocation6 + $0xaa8] ss:$144 sps:$4 sm:$0xff]  }
 0x4fa   :  { %7106 = vmatprep.subr.bf16.mxu1 %v11904_v19  ;;  %v11943_v19 = vld [vmem:[#allocation6 + $0xbc4] ss:$144 sps:$4 sm:$0xff]  }
 0x4fc   :  { %7021 = vmatpush1.bf16.msra.mxu0 %v11899_v43  ;;  %v11946_v43 = vld [vmem:[#allocation6 + $0xbcc] ss:$144 sps:$4 sm:$0xff]  }
 0x4fd   :  { %7107 = vmatpush1.bf16.msra.mxu1 %v11902_v29  ;;  %7022 = vmatprep.subr.bf16.mxu0 %v11907_v44 }
 0x4fe   :  { %7108 = vmatprep.subr.bf16.mxu1 %v11910_v22  ;;  %v11941_v22 = vld [vmem:[#allocation6 + $0xbc0] ss:$144 sps:$4 sm:$0xff]  }
 0x500   :  { %7023 = vmatpush1.bf16.msra.mxu0 %v11905_v53 }
 0x501   :  { %7109 = vmatpush1.bf16.msra.mxu1 %v11908_v45  ;;  %7024 = vmatprep.subr.bf16.mxu0 %v11913_v46  ;;  %v11944_v46 = vld [vmem:[#allocation6 + $0xbc8] ss:$144 sps:$4 sm:$0xff]  }
 0x502   :  { %v6575_v6 = vpop.f32.mrb[24].mxu0  ;;  %7110 = vmatprep.subr.bf16.mxu1 %v11916_v49  ;;  %v11949_v49 = vld [vmem:[#allocation6 + $0xce4] ss:$144 sps:$4 sm:$0xff]  }
 0x503   :  { %v13103_v56 = vpop.f32.mrb[24].mxu1  ;;  %v13105_v21 = vpop.f32.mrb[25].mxu0  ;;  %v7427_v61 = vrot.slane %v6575_v6, 3  ;;  %v11947_v6 = vld [vmem:[#allocation6 + $0xce0] ss:$144 sps:$4 sm:$0xff]  }
 0x504   :  { %v13107_v57 = vpop.f32.mrb[25].mxu1  ;;  %v6579_v58 = vpop.f32.mrb[26].mxu0  ;;  %7025 = vmatpush1.bf16.msra.mxu0 %v11911_v60  ;;  %v11952_v60 = vld [vmem:[#allocation6 + $0xcec] ss:$144 sps:$4 sm:$0xff]  }
 0x505   :  { %v7428_v63 = vrot.slane %v6579_v58, 3  ;;  %v13109_v9 = vpop.f32.mrb[26].mxu1  ;;  %7111 = vmatpush1.bf16.msra.mxu1 %v11914_v50  ;;  %v13111_v31 = vpop.f32.mrb[27].mxu0  ;;  %7026 = vmatprep.subr.bf16.mxu0 %v11919_v51  ;;  %v11950_v58 = vld [vmem:[#allocation6 + $0xce8] ss:$144 sps:$4 sm:$0xff]  }
 0x506   :  { %v13114_v5 = vpop.f32.mrb[27].mxu1  ;;  %7112 = vmatprep.subr.bf16.mxu1 %v11922_v54 }
 0x507   :  { %v7429_v8 = vsel %vm7420_vm8, %v7427_v61, %v7428_v63  ;;  %v7441_v10 = vsel %vm7420_vm8, %v7428_v63, %v7427_v61  ;;  %v11953_v63 = vld [vmem:[#allocation6 + $0xe00] ss:$144 sps:$4 sm:$0xff]  }
 0x508   :  { %v7444_v12 = vadd.f32 %v7429_v8, %v13065_v30  ;;  %v7447_v13 = vadd.f32 %v7441_v10, %v13068_v38  ;;  %7027 = vmatpush1.bf16.msra.mxu0 %v11917_v59  ;;  %v11937_v30 = vld [vmem:[#allocation6 + $0xaa4] ss:$144 sps:$4 sm:$0xff]   ;;  %v11964_v8 = vld [vmem:[#allocation6 + $0xf2c] ss:$144 sps:$4 sm:$0xff]  }
 0x509   :  { %7113 = vmatpush1.bf16.msra.mxu1 %v11920_v4  ;;  %7028 = vmatprep.subr.bf16.mxu0 %v11925_v0  ;;  %v11955_v59 = vld [vmem:[#allocation6 + $0xe04] ss:$144 sps:$4 sm:$0xff]   ;;  %v11958_v4 = vld [vmem:[#allocation6 + $0xe0c] ss:$144 sps:$4 sm:$0xff]  }
 0x50a   :  { %v7477_v41 = vadd.f32 %v7474_v3, %v7444_v12  ;;  %v7480_v16 = vadd.f32 %v7474_v3, %v7447_v13  ;;  %7114 = vmatprep.subr.bf16.mxu1 %v11928_v7  ;;  %v11956_v3 = vld [vmem:[#allocation6 + $0xe08] ss:$144 sps:$4 sm:$0xff]   ;;  %v11961_v7 = vld [vmem:[#allocation6 + $0xf24] ss:$144 sps:$4 sm:$0xff]   ;;  %v11959_v12 = vld [vmem:[#allocation6 + $0xf20] ss:$144 sps:$4 sm:$0xff]  }
 0x50b   :  { %v11962_v13 = vld [vmem:[#allocation6 + $0xf28] ss:$144 sps:$4 sm:$0xff]  }
 0x50c   :  { %v7483_v24 = vmax.f32 %v7477_v41, 0.0  ;;  %v7486_v26 = vmax.f32 %v7480_v16, 0.0  ;;  %7029 = vmatpush1.bf16.msra.mxu0 %v11923_v14  ;;  %v11967_v14 = vld [vmem:[#allocation6 + $0x1044] ss:$144 sps:$4 sm:$0xff]   ;;  %v11968_v41 = vld [vmem:[#allocation6 + $0x1048] ss:$144 sps:$4 sm:$0xff]  }
 0x50d   :  { %7115 = vmatpush1.bf16.msra.mxu1 %v11926_v15  ;;  %7030 = vmatprep.subr.bf16.mxu0 %v11931_v40  ;;  %v11970_v15 = vld [vmem:[#allocation6 + $0x104c] ss:$144 sps:$4 sm:$0xff]   ;;  %v11965_v40 = vld [vmem:[#allocation6 + $0x1040] ss:$144 sps:$4 sm:$0xff]   ;;  %v11973_v16 = vld [vmem:[#allocation6 + $0x1164] ss:$144 sps:$4 sm:$0xff]  }
 0x50e   :  { %v7492_v38 = vsel %vm7487_vm9, %v7483_v24, 0.0  ;;  %v7513_v28 = vsel %vm7487_vm9, %v7486_v26, 0.0  ;;  %7116 = vmatprep.subr.bf16.mxu1 %v11934_v18  ;;  %v11976_v18 = vld [vmem:[#allocation6 + $0x116c] ss:$144 sps:$4 sm:$0xff]   ;;  %v11971_v24 = vld [vmem:[#allocation6 + $0x1160] ss:$144 sps:$4 sm:$0xff]  }
 0x50f   :  { %v7505_v35 = vrot.slane %v7492_v38, 4  ;;  %v7526_v36 = vrot.slane %v7513_v28, 4  ;;  %v11979_v26 = vld [vmem:[#allocation6 + $0x1284] ss:$144 sps:$4 sm:$0xff]  }
 0x510   :  { %7031 = vmatpush1.bf16.msra.mxu0 %v11929_v32  ;;  %v11982_v32 = vld [vmem:[#allocation6 + $0x128c] ss:$144 sps:$4 sm:$0xff]  }
 0x511   :  { %v7506_v39 = vmax.f32 %v7492_v38, %v7505_v35  ;;  %v7527_v23 = vmax.f32 %v7513_v28, %v7526_v36  ;;  %7117 = vmatpush1.bf16.msra.mxu1 %v11932_v27  ;;  %7032 = vmatprep.subr.bf16.mxu0 %v11937_v30  ;;  %v11977_v27 = vld [vmem:[#allocation6 + $0x1280] ss:$144 sps:$4 sm:$0xff]   ;;  %v11980_v30 = vld [vmem:[#allocation6 + $0x1288] ss:$144 sps:$4 sm:$0xff]   ;;  %v11985_v38 = vld [vmem:[#allocation6 + $0x13a4] ss:$144 sps:$4 sm:$0xff]  }
 0x512   :  { %7118 = vmatprep.subr.bf16.mxu1 %v11940_v33  ;;  %v11988_v28 = vld [vmem:[#allocation6 + $0x13ac] ss:$144 sps:$4 sm:$0xff]   ;;  %v11983_v33 = vld [vmem:[#allocation6 + $0x13a0] ss:$144 sps:$4 sm:$0xff]   ;;  %v11986_v35 = vld [vmem:[#allocation6 + $0x13a8] ss:$144 sps:$4 sm:$0xff]  }
 0x513   :  { %v7507_v29 = vrot.slane %v7506_v39, 2  ;;  %v7528_v44 = vrot.slane %v7527_v23, 2  ;;  %v11991_v36 = vld [vmem:[#allocation6 + $0x14c4] ss:$144 sps:$4 sm:$0xff]  }
 0x514   :  { %7033 = vmatpush1.bf16.msra.mxu0 %v11935_v20  ;;  %v11994_v20 = vld [vmem:[#allocation6 + $0x14cc] ss:$144 sps:$4 sm:$0xff]  }
 0x515   :  { %v7508_v53 = vmax.f32 %v7506_v39, %v7507_v29  ;;  %v7529_v45 = vmax.f32 %v7527_v23, %v7528_v44  ;;  %7119 = vmatpush1.bf16.msra.mxu1 %v11938_v42  ;;  %7034 = vmatprep.subr.bf16.mxu0 %v11943_v19  ;;  %v11989_v39 = vld [vmem:[#allocation6 + $0x14c0] ss:$144 sps:$4 sm:$0xff]   ;;  %v11992_v23 = vld [vmem:[#allocation6 + $0x14c8] ss:$144 sps:$4 sm:$0xff]   ;;  %v11997_v42 = vld [vmem:[#allocation6 + $0x15e4] ss:$144 sps:$4 sm:$0xff]  }
 0x516   :  { %7120 = vmatprep.subr.bf16.mxu1 %v11946_v43  ;;  %v11995_v19 = vld [vmem:[#allocation6 + $0x15e0] ss:$144 sps:$4 sm:$0xff]   ;;  %v11998_v43 = vld [vmem:[#allocation6 + $0x15e8] ss:$144 sps:$4 sm:$0xff]   ;;  %v12003_v29 = vld [vmem:[#allocation6 + $0x1704] ss:$144 sps:$4 sm:$0xff]  }
 0x517   :  { %v7509_v50 = vrot.slane %v7508_v53, 1  ;;  %v7530_v51 = vrot.slane %v7529_v45, 1  ;;  %v12006_v44 = vld [vmem:[#allocation6 + $0x170c] ss:$144 sps:$4 sm:$0xff]  }
 0x518   :  { %7035 = vmatpush1.bf16.msra.mxu0 %v11941_v22  ;;  %v12001_v22 = vld [vmem:[#allocation6 + $0x1700] ss:$144 sps:$4 sm:$0xff]  }
 0x519   :  { %v7510_v52 = vmax.f32 %v7508_v53, %v7509_v50  ;;  %v7531_v54 = vmax.f32 %v7529_v45, %v7530_v51  ;;  %7121 = vmatpush1.bf16.msra.mxu1 %v11944_v46  ;;  %7036 = vmatprep.subr.bf16.mxu0 %v11949_v49  ;;  %v12004_v53 = vld [vmem:[#allocation6 + $0x1708] ss:$144 sps:$4 sm:$0xff]   ;;  %v12009_v45 = vld [vmem:[#allocation6 + $0x1824] ss:$144 sps:$4 sm:$0xff]   ;;  %v12012_v46 = vld [vmem:[#allocation6 + $0x182c] ss:$144 sps:$4 sm:$0xff]  }
 0x51a   :  { %7122 = vmatprep.subr.bf16.mxu1 %v11952_v60  ;;  %v12007_v49 = vld [vmem:[#allocation6 + $0x1820] ss:$144 sps:$4 sm:$0xff]   ;;  %v12010_v60 = vld [vmem:[#allocation6 + $0x1828] ss:$144 sps:$4 sm:$0xff]   ;;  %v12015_v50 = vld [vmem:[#allocation6 + $0x1944] ss:$144 sps:$4 sm:$0xff]  }
 0x51b   :  { %v7534_v61 = vsel %vm7344_vm7, %v7510_v52, %v7531_v54  ;;  %v12018_v51 = vld [vmem:[#allocation6 + $0x194c] ss:$144 sps:$4 sm:$0xff]   ;;  %v12016_v52 = vld [vmem:[#allocation6 + $0x1948] ss:$144 sps:$4 sm:$0xff]   ;;  %v12021_v54 = vld [vmem:[#allocation6 + $0x1a64] ss:$144 sps:$4 sm:$0xff]  }
 0x51c   :  { %7037 = vmatpush1.bf16.msra.mxu0 %v11947_v6  ;;  %v7760_v0 = vrot.slane %v7534_v61, 6  ;;  %v12013_v6 = vld [vmem:[#allocation6 + $0x1940] ss:$144 sps:$4 sm:$0xff]  }
 0x51d   :  { %7123 = vmatpush1.bf16.msra.mxu1 %v11950_v58  ;;  %7038 = vmatprep.subr.bf16.mxu0 %v11955_v59  ;;  %v12024_v58 = vld [vmem:[#allocation6 + $0x1a6c] ss:$144 sps:$4 sm:$0xff]   ;;  %v12019_v59 = vld [vmem:[#allocation6 + $0x1a60] ss:$144 sps:$4 sm:$0xff]  }
 0x51e   :  { %7124 = vmatprep.subr.bf16.mxu1 %v11958_v4  ;;  %v13127_v10 = vsel %vm7773_vm10, %v13003_v25, %v7760_v0  ;;  %v11974_v25 = vld [vmem:[#allocation6 + $0x1168] ss:$144 sps:$4 sm:$0xff]   ;;  %v12027_v61 = vld [vmem:[#allocation9 + $0x4] ss:$16 sps:$4 sm:$0xff]  }
 0x51f   :  { %v12022_v4 = vld [vmem:[#allocation6 + $0x1a68] ss:$144 sps:$4 sm:$0xff]  }
 0x520   :  { %7039 = vmatpush1.bf16.msra.mxu0 %v11953_v63  ;;  %v12025_v63 = vld [vmem:[#allocation9] ss:$16 sps:$4 sm:$0xff]   ;;  %v12030_v0 = vld [vmem:[#allocation9 + $0xc] ss:$16 sps:$4 sm:$0xff]  }
 0x521   :  { %7125 = vmatpush1.bf16.msra.mxu1 %v11956_v3  ;;  %7040 = vmatprep.subr.bf16.mxu0 %v11961_v7  ;;  %v12028_v3 = vld [vmem:[#allocation9 + $0x8] ss:$16 sps:$4 sm:$0xff]   ;;  %v12033_v7 = vld [vmem:[#allocation9 + $0x24] ss:$16 sps:$4 sm:$0xff]  }
 0x522   :  { %7126 = vmatprep.subr.bf16.mxu1 %v11964_v8  ;;  %v12036_v8 = vld [vmem:[#allocation9 + $0x2c] ss:$16 sps:$4 sm:$0xff]  }
 0x524   :  { %7041 = vmatpush1.bf16.msra.mxu0 %v11959_v12  ;;  %v12031_v12 = vld [vmem:[#allocation9 + $0x20] ss:$16 sps:$4 sm:$0xff]  }
 0x525   :  { %7127 = vmatpush1.bf16.msra.mxu1 %v11962_v13  ;;  %7042 = vmatprep.subr.bf16.mxu0 %v11967_v14  ;;  %v12034_v13 = vld [vmem:[#allocation9 + $0x28] ss:$16 sps:$4 sm:$0xff]   ;;  %v12039_v14 = vld [vmem:[#allocation9 + $0x44] ss:$16 sps:$4 sm:$0xff]  }
 0x526   :  { %7128 = vmatprep.subr.bf16.mxu1 %v11970_v15  ;;  %v12042_v15 = vld [vmem:[#allocation9 + $0x4c] ss:$16 sps:$4 sm:$0xff]  }
 0x528   :  { %7043 = vmatpush1.bf16.msra.mxu0 %v11965_v40  ;;  %v12037_v40 = vld [vmem:[#allocation9 + $0x40] ss:$16 sps:$4 sm:$0xff]  }
 0x529   :  { %7129 = vmatpush1.bf16.msra.mxu1 %v11968_v41  ;;  %7044 = vmatprep.subr.bf16.mxu0 %v11973_v16  ;;  %v12040_v41 = vld [vmem:[#allocation9 + $0x48] ss:$16 sps:$4 sm:$0xff]   ;;  %v12045_v16 = vld [vmem:[#allocation9 + $0x64] ss:$16 sps:$4 sm:$0xff]  }
 0x52a   :  { %7130 = vmatprep.subr.bf16.mxu1 %v11976_v18  ;;  %v12048_v18 = vld [vmem:[#allocation9 + $0x6c] ss:$16 sps:$4 sm:$0xff]  }
 0x52c   :  { %7045 = vmatpush1.bf16.msra.mxu0 %v11971_v24  ;;  %v12043_v24 = vld [vmem:[#allocation9 + $0x60] ss:$16 sps:$4 sm:$0xff]  }
 0x52d   :  { %7131 = vmatpush1.bf16.msra.mxu1 %v11974_v25  ;;  %7057 = vmatprep.subr.bf16.mxu0 %v11979_v26  ;;  %v12051_v25 = vld [vmem:[#allocation9 + $0x84] ss:$16 sps:$4 sm:$0xff]   ;;  %v12054_v26 = vld [vmem:[#allocation9 + $0x8c] ss:$16 sps:$4 sm:$0xff]  }
 0x52e   :  { %7143 = vmatprep.subr.bf16.mxu1 %v11982_v32  ;;  %v12049_v32 = vld [vmem:[#allocation9 + $0x80] ss:$16 sps:$4 sm:$0xff]  }
 0x52f   :  { %7047 = vmatmul.mubr.bf16.vlgmr.msra.gmra.mrb[36].mxu0 %v12875_v47 }
 0x530   :  { %7133 = vmatmul.mubr.bf16.vlgmr.msra.gmra.mrb[36].mxu1 %v12875_v47  ;;  %7058 = vmatpush1.bf16.msra.mxu0 %v11977_v27  ;;  %v12000_v47 = vld [vmem:[#allocation6 + $0x15ec] ss:$144 sps:$4 sm:$0xff]   ;;  %v12052_v27 = vld [vmem:[#allocation9 + $0x88] ss:$16 sps:$4 sm:$0xff]  }
 0x531   :  { %7144 = vmatpush1.bf16.msra.mxu1 %v11980_v30  ;;  %7059 = vmatprep.subr.bf16.mxu0 %v11985_v38  ;;  %v12057_v30 = vld [vmem:[#allocation9 + $0xa4] ss:$16 sps:$4 sm:$0xff]   ;;  %v12060_v38 = vld [vmem:[#allocation9 + $0xac] ss:$16 sps:$4 sm:$0xff]  }
 0x532   :  { %7145 = vmatprep.subr.bf16.mxu1 %v11988_v28  ;;  %7089 = vmatprep.mubr.bf16.mxu0 %v12613_v1  ;;  %v12055_v28 = vld [vmem:[#allocation9 + $0xa0] ss:$16 sps:$4 sm:$0xff]  }
 0x533   :  { %7175 = vmatprep.mubr.bf16.mxu1 %v12613_v1 }
 0x534   :  { %7060 = vmatpush1.bf16.msra.mxu0 %v11983_v33  ;;  %v12058_v33 = vld [vmem:[#allocation9 + $0xa8] ss:$16 sps:$4 sm:$0xff]  }
 0x535   :  { %7146 = vmatpush1.bf16.msra.mxu1 %v11986_v35  ;;  %7061 = vmatprep.subr.bf16.mxu0 %v11991_v36  ;;  %v12063_v35 = vld [vmem:[#allocation9 + $0xc4] ss:$16 sps:$4 sm:$0xff]  }
 0x536   :  { %7147 = vmatprep.subr.bf16.mxu1 %v11994_v20  ;;  %v12066_v20 = vld [vmem:[#allocation9 + $0xcc] ss:$16 sps:$4 sm:$0xff]  }
 0x538   :  { %7062 = vmatpush1.bf16.msra.mxu0 %v11989_v39 }
 0x539   :  { %7148 = vmatpush1.bf16.msra.mxu1 %v11992_v23  ;;  %7063 = vmatprep.subr.bf16.mxu0 %v11997_v42 }
 0x53a   :  { %7149 = vmatprep.subr.bf16.mxu1 %v12000_v47 }
 0x53c   :  { %7064 = vmatpush1.bf16.msra.mxu0 %v11995_v19  ;;  %v12061_v19 = vld [vmem:[#allocation9 + $0xc0] ss:$16 sps:$4 sm:$0xff]  }
 0x53d   :  { %7150 = vmatpush1.bf16.msra.mxu1 %v11998_v43  ;;  %7065 = vmatprep.subr.bf16.mxu0 %v12003_v29  ;;  %v12064_v43 = vld [vmem:[#allocation9 + $0xc8] ss:$16 sps:$4 sm:$0xff]  }
 0x53e   :  { %7151 = vmatprep.subr.bf16.mxu1 %v12006_v44 }
 0x540   :  { %7066 = vmatpush1.bf16.msra.mxu0 %v12001_v22 }
 0x541   :  { %7152 = vmatpush1.bf16.msra.mxu1 %v12004_v53  ;;  %7067 = vmatprep.subr.bf16.mxu0 %v12009_v45  ;;  %v12069_v45 = vld [vmem:[#allocation9 + $0xe4] ss:$16 sps:$4 sm:$0xff]  }
 0x542   :  { %7153 = vmatprep.subr.bf16.mxu1 %v12012_v46 }
 0x544   :  { %7068 = vmatpush1.bf16.msra.mxu0 %v12007_v49 }
 0x545   :  { %7154 = vmatpush1.bf16.msra.mxu1 %v12010_v60  ;;  %7069 = vmatprep.subr.bf16.mxu0 %v12015_v50 }
 0x546   :  { %7155 = vmatprep.subr.bf16.mxu1 %v12018_v51 }
 0x548   :  { %7070 = vmatpush1.bf16.msra.mxu0 %v12013_v6 }
 0x549   :  { %7156 = vmatpush1.bf16.msra.mxu1 %v12016_v52  ;;  %7071 = vmatprep.subr.bf16.mxu0 %v12021_v54 }
 0x54a   :  { %7157 = vmatprep.subr.bf16.mxu1 %v12024_v58 }
 0x54c   :  { %7072 = vmatpush1.bf16.msra.mxu0 %v12019_v59  ;;  %v12072_v59 = vld [vmem:[#allocation9 + $0xec] ss:$16 sps:$4 sm:$0xff]  }
 0x54d   :  { %7158 = vmatpush1.bf16.msra.mxu1 %v12022_v4  ;;  %8381 = vmatprep.subr.bf16.mxu0 %v12027_v61 }
 0x54e   :  { %8463 = vmatprep.subr.bf16.mxu1 %v12030_v0 }
 0x54f   :  { %7090 = vmatmul.mubr.bf16.vlgmr.msra.gmra.mrb[36].mxu0 %v12877_v48 }
 0x550   :  { %7176 = vmatmul.mubr.bf16.vlgmr.msra.gmra.mrb[36].mxu1 %v12877_v48  ;;  %8382 = vmatpush1.bf16.msra.mxu0 %v12025_v63  ;;  %v12046_v48 = vld [vmem:[#allocation9 + $0x68] ss:$16 sps:$4 sm:$0xff]  }
 0x551   :  { %8464 = vmatpush1.bf16.msra.mxu1 %v12028_v3  ;;  %8383 = vmatprep.subr.bf16.mxu0 %v12033_v7  ;;  %v12067_v3 = vld [vmem:[#allocation9 + $0xe0] ss:$16 sps:$4 sm:$0xff]  }
 0x552   :  { %8465 = vmatprep.subr.bf16.mxu1 %v12036_v8 }
 0x554   :  { %8384 = vmatpush1.bf16.msra.mxu0 %v12031_v12 }
 0x555   :  { %8466 = vmatpush1.bf16.msra.mxu1 %v12034_v13  ;;  %8385 = vmatprep.subr.bf16.mxu0 %v12039_v14  ;;  %v12075_v14 = vld [vmem:[#allocation9 + $0x104] ss:$16 sps:$4 sm:$0xff]  }
 0x556   :  { %8467 = vmatprep.subr.bf16.mxu1 %v12042_v15 }
 0x558   :  { %8386 = vmatpush1.bf16.msra.mxu0 %v12037_v40 }
 0x559   :  { %8468 = vmatpush1.bf16.msra.mxu1 %v12040_v41  ;;  %8387 = vmatprep.subr.bf16.mxu0 %v12045_v16 }
 0x55a   :  { %8469 = vmatprep.subr.bf16.mxu1 %v12048_v18  ;;  %v12073_v18 = vld [vmem:[#allocation9 + $0x100] ss:$16 sps:$4 sm:$0xff]  }
 0x55c   :  { %8388 = vmatpush1.bf16.msra.mxu0 %v12043_v24  ;;  %v12084_v24 = vld [vmem:[#allocation9 + $0x12c] ss:$16 sps:$4 sm:$0xff]  }
 0x55d   :  { %8470 = vmatpush1.bf16.msra.mxu1 %v12046_v48  ;;  %8389 = vmatprep.subr.bf16.mxu0 %v12051_v25  ;;  %v12079_v48 = vld [vmem:[#allocation9 + $0x120] ss:$16 sps:$4 sm:$0xff]   ;;  %v12082_v25 = vld [vmem:[#allocation9 + $0x128] ss:$16 sps:$4 sm:$0xff]  }
 0x55e   :  { %8471 = vmatprep.subr.bf16.mxu1 %v12054_v26  ;;  %v12087_v26 = vld [vmem:[#allocation9 + $0x144] ss:$16 sps:$4 sm:$0xff]  }
 0x560   :  { %8390 = vmatpush1.bf16.msra.mxu0 %v12049_v32  ;;  %v12090_v32 = vld [vmem:[#allocation9 + $0x14c] ss:$16 sps:$4 sm:$0xff]  }
 0x561   :  { %8472 = vmatpush1.bf16.msra.mxu1 %v12052_v27  ;;  %8391 = vmatprep.subr.bf16.mxu0 %v12057_v30  ;;  %v12085_v27 = vld [vmem:[#allocation9 + $0x140] ss:$16 sps:$4 sm:$0xff]   ;;  %v12088_v30 = vld [vmem:[#allocation9 + $0x148] ss:$16 sps:$4 sm:$0xff]  }
 0x562   :  { %v6747_v36 = vpop.f32.mrb[28].mxu0  ;;  %8473 = vmatprep.subr.bf16.mxu1 %v12060_v38  ;;  %v12093_v38 = vld [vmem:[#allocation9 + $0x164] ss:$16 sps:$4 sm:$0xff]  }
 0x563   :  { %v6833_v39 = vpop.f32.mrb[28].mxu1  ;;  %v6749_v23 = vpop.f32.mrb[29].mxu0  ;;  %v7541_v29 = vrot.slane %v6747_v36, 1  ;;  %v12099_v36 = vld [vmem:[#allocation9 + $0x184] ss:$16 sps:$4 sm:$0xff]  }
 0x564   :  { %v6835_v42 = vpop.f32.mrb[29].mxu1  ;;  %v6751_v47 = vpop.f32.mrb[30].mxu0  ;;  %8392 = vmatpush1.bf16.msra.mxu0 %v12055_v28  ;;  %v7547_v46 = vrot.slane %v6833_v39, 1  ;;  %v7544_v49 = vrot.slane %v6749_v23, 1  ;;  %v12096_v28 = vld [vmem:[#allocation9 + $0x16c] ss:$16 sps:$4 sm:$0xff]  }
 0x565   :  { %v7542_v44 = vrot.slane %v6751_v47, 1  ;;  %v6837_v22 = vpop.f32.mrb[30].mxu1  ;;  %v6753_v53 = vpop.f32.mrb[31].mxu0  ;;  %8474 = vmatpush1.bf16.msra.mxu1 %v12058_v33  ;;  %8393 = vmatprep.subr.bf16.mxu0 %v12063_v35  ;;  %v7574_v6 = vrot.slane %v6835_v42, 2  ;;  %v12091_v33 = vld [vmem:[#allocation9 + $0x160] ss:$16 sps:$4 sm:$0xff]  }
 0x566   :  { %v7548_v60 = vrot.slane %v6837_v22, 1  ;;  %v7545_v50 = vrot.slane %v6753_v53, 1  ;;  %v6839_v51 = vpop.f32.mrb[31].mxu1  ;;  %8475 = vmatprep.subr.bf16.mxu1 %v12066_v20  ;;  %v12094_v35 = vld [vmem:[#allocation9 + $0x168] ss:$16 sps:$4 sm:$0xff]  }
 0x567   :  { %v7543_v52 = vsel %vm7194_vm4, %v7541_v29, %v7542_v44  ;;  %v7559_v54 = vsel %vm7194_vm4, %v7542_v44, %v7541_v29  ;;  %v7575_v58 = vrot.slane %v6839_v51, 2  ;;  %v12102_v20 = vld [vmem:[#allocation9 + $0x18c] ss:$16 sps:$4 sm:$0xff]   ;;  %v12097_v39 = vld [vmem:[#allocation9 + $0x180] ss:$16 sps:$4 sm:$0xff]  }
 0x568   :  { %v7562_v4 = vadd.f32 %v7543_v52, %v13105_v21  ;;  %v7565_v61 = vadd.f32 %v7559_v54, %v13111_v31  ;;  %v7549_v63 = vsel %vm7194_vm4, %v7547_v46, %v7548_v60  ;;  %v7561_v0 = vsel %vm7194_vm4, %v7548_v60, %v7547_v46  ;;  %8394 = vmatpush1.bf16.msra.mxu0 %v12061_v19  ;;  %v12070_v21 = vld [vmem:[#allocation9 + $0xe8] ss:$16 sps:$4 sm:$0xff]   ;;  %v12105_v42 = vld [vmem:[#allocation9 + $0x1a4] ss:$16 sps:$4 sm:$0xff]   ;;  %v12108_v47 = vld [vmem:[#allocation9 + $0x1ac] ss:$16 sps:$4 sm:$0xff]  }
 0x569   :  { %v13142_v7 = vadd.f32 %v7549_v63, %v13107_v57  ;;  %v13145_v8 = vadd.f32 %v7561_v0, %v13114_v5  ;;  %v7546_v12 = vsel %vm7194_vm4, %v7544_v49, %v7545_v50  ;;  %v7560_v13 = vsel %vm7194_vm4, %v7545_v50, %v7544_v49  ;;  %8476 = vmatpush1.bf16.msra.mxu1 %v12064_v43  ;;  %v12078_v5 = vld [vmem:[#allocation9 + $0x10c] ss:$16 sps:$4 sm:$0xff]   ;;  %v12100_v23 = vld [vmem:[#allocation9 + $0x188] ss:$16 sps:$4 sm:$0xff]   ;;  %v12103_v19 = vld [vmem:[#allocation9 + $0x1a0] ss:$16 sps:$4 sm:$0xff]  }
 0x56a   :  { %v13150_v31 = vadd.f32 %v7546_v12, %v13103_v56  ;;  %v13153_v15 = vadd.f32 %v7560_v13, %v13109_v9  ;;  %v7576_v40 = vsel %vm7228_vm5, %v7574_v6, %v7575_v58  ;;  %v7592_v57 = vsel %vm7228_vm5, %v7575_v58, %v7574_v6  ;;  %8395 = vmatprep.subr.bf16.mxu0 %v12069_v45  ;;  %v12076_v56 = vld [vmem:[#allocation9 + $0x108] ss:$16 sps:$4 sm:$0xff]   ;;  %v12081_v9 = vld [vmem:[#allocation9 + $0x124] ss:$16 sps:$4 sm:$0xff]   ;;  %v12114_v44 = vld [vmem:[#allocation9 + $0x1cc] ss:$16 sps:$4 sm:$0xff]  }
 0x56b   :  { %v13157_v41 = vadd.f32 %v7576_v40, %v7562_v4  ;;  %v13159_v16 = vadd.f32 %v7592_v57, %v7565_v61  ;;  %8477 = vmatprep.subr.bf16.mxu1 %v12072_v59  ;;  %v12106_v43 = vld [vmem:[#allocation9 + $0x1a8] ss:$16 sps:$4 sm:$0xff]   ;;  %v12111_v29 = vld [vmem:[#allocation9 + $0x1c4] ss:$16 sps:$4 sm:$0xff]   ;;  %v12109_v22 = vld [vmem:[#allocation9 + $0x1c0] ss:$16 sps:$4 sm:$0xff]  }
 0x56c   :  { %8396 = vmatpush1.bf16.msra.mxu0 %v12067_v3  ;;  %v12112_v53 = vld [vmem:[#allocation9 + $0x1c8] ss:$16 sps:$4 sm:$0xff]   ;;  %v12115_v45 = vld [vmem:[#allocation9 + $0x1e0] ss:$16 sps:$4 sm:$0xff]   ;;  %v12117_v46 = vld [vmem:[#allocation9 + $0x1e4] ss:$16 sps:$4 sm:$0xff]  }
 0x56d   :  { %8478 = vmatpush1.bf16.msra.mxu1 %v12070_v21  ;;  %8397 = vmatprep.subr.bf16.mxu0 %v12075_v14  ;;  %v12118_v49 = vld [vmem:[#allocation9 + $0x1e8] ss:$16 sps:$4 sm:$0xff]   ;;  %v12120_v60 = vld [vmem:[#allocation9 + $0x1ec] ss:$16 sps:$4 sm:$0xff]   ;;  %v12123_v50 = vld [vmem:[#allocation9 + $0x204] ss:$16 sps:$4 sm:$0xff]  }
 0x56e   :  { %8479 = vmatprep.subr.bf16.mxu1 %v12078_v5  ;;  %v12126_v51 = vld [vmem:[#allocation9 + $0x20c] ss:$16 sps:$4 sm:$0xff]  }
 0x570   :  { %8398 = vmatpush1.bf16.msra.mxu0 %v12073_v18 }
 0x571   :  { %8480 = vmatpush1.bf16.msra.mxu1 %v12076_v56  ;;  %8399 = vmatprep.subr.bf16.mxu0 %v12081_v9 }
 0x572   :  { %8481 = vmatprep.subr.bf16.mxu1 %v12084_v24 }
 0x574   :  { %8400 = vmatpush1.bf16.msra.mxu0 %v12079_v48 }
 0x575   :  { %8482 = vmatpush1.bf16.msra.mxu1 %v12082_v25  ;;  %8401 = vmatprep.subr.bf16.mxu0 %v12087_v26 }
 0x576   :  { %8483 = vmatprep.subr.bf16.mxu1 %v12090_v32 }
 0x578   :  { %8402 = vmatpush1.bf16.msra.mxu0 %v12085_v27 }
 0x579   :  { %8484 = vmatpush1.bf16.msra.mxu1 %v12088_v30  ;;  %8403 = vmatprep.subr.bf16.mxu0 %v12093_v38 }
 0x57a   :  { %8485 = vmatprep.subr.bf16.mxu1 %v12096_v28 }
 0x57c   :  { %8404 = vmatpush1.bf16.msra.mxu0 %v12091_v33 }
 0x57d   :  { %8486 = vmatpush1.bf16.msra.mxu1 %v12094_v35  ;;  %8405 = vmatprep.subr.bf16.mxu0 %v12099_v36  ;;  %v7674_v35 = vsub.s32 6, %v12930_v55 }
 0x57e   :  { %8487 = vmatprep.subr.bf16.mxu1 %v12102_v20 }
 0x580   :  { %8406 = vmatpush1.bf16.msra.mxu0 %v12097_v39 }
 0x581   :  { %8488 = vmatpush1.bf16.msra.mxu1 %v12100_v23  ;;  %8407 = vmatprep.subr.bf16.mxu0 %v12105_v42 }
 0x582   :  { %8489 = vmatprep.subr.bf16.mxu1 %v12108_v47 }
 0x584   :  { %8408 = vmatpush1.bf16.msra.mxu0 %v12103_v19 }
 0x585   :  { %8490 = vmatpush1.bf16.msra.mxu1 %v12106_v43  ;;  %8409 = vmatprep.subr.bf16.mxu0 %v12111_v29 }
 0x586   :  { %8491 = vmatprep.subr.bf16.mxu1 %v12114_v44 }
 0x588   :  { %8410 = vmatpush1.bf16.msra.mxu0 %v12109_v22 }
 0x589   :  { %8492 = vmatpush1.bf16.msra.mxu1 %v12112_v53  ;;  %8411 = vmatprep.subr.bf16.mxu0 %v12117_v46 }
 0x58a   :  { %8493 = vmatprep.subr.bf16.mxu1 %v12120_v60 }
 0x58c   :  { %8412 = vmatpush1.bf16.msra.mxu0 %v12115_v45 }
 0x58d   :  { %8494 = vmatpush1.bf16.msra.mxu1 %v12118_v49  ;;  %8422 = vmatprep.subr.bf16.mxu0 %v12123_v50 }
 0x58e   :  { %8504 = vmatprep.subr.bf16.mxu1 %v12126_v51 }
 0x5c2   :  { %v6919_v6 = vpop.f32.mrb[32].mxu0 }
 0x5c3   :  { %v7005_v52 = vpop.f32.mrb[32].mxu1  ;;  %v6921_v54 = vpop.f32.mrb[33].mxu0  ;;  %v7577_v4 = vrot.slane %v6919_v6, 2 }
 0x5c4   :  { %v7007_v58 = vpop.f32.mrb[33].mxu1  ;;  %v6923_v59 = vpop.f32.mrb[34].mxu0  ;;  %v7607_v3 = vrot.slane %v7005_v52, 3  ;;  %v7580_v12 = vrot.slane %v6921_v54, 2 }
 0x5c5   :  { %v7578_v61 = vrot.slane %v6923_v59, 2  ;;  %v7009_v63 = vpop.f32.mrb[34].mxu1  ;;  %v6925_v0 = vpop.f32.mrb[35].mxu0  ;;  %v7610_v40 = vrot.slane %v7007_v58, 3 }
 0x5c6   :  { %v7608_v13 = vrot.slane %v7009_v63, 3  ;;  %v7581_v21 = vrot.slane %v6925_v0, 2  ;;  %v7011_v14 = vpop.f32.mrb[35].mxu1 }
 0x5c7   :  { %v7579_v57 = vsel %vm7228_vm5, %v7577_v4, %v7578_v61  ;;  %v7593_v5 = vsel %vm7228_vm5, %v7578_v61, %v7577_v4  ;;  %v7611_v18 = vrot.slane %v7011_v14, 3 }
 0x5c8   :  { %v7596_v56 = vadd.f32 %v7579_v57, %v13150_v31  ;;  %v7599_v9 = vadd.f32 %v7593_v5, %v13153_v15  ;;  %v7609_v24 = vsel %vm7420_vm8, %v7607_v3, %v7608_v13  ;;  %v7625_v48 = vsel %vm7420_vm8, %v7608_v13, %v7607_v3 }
 0x5c9   :  { %v7628_v25 = vadd.f32 %v7609_v24, %v13157_v41  ;;  %v7631_v26 = vadd.f32 %v7625_v48, %v13159_v16  ;;  %v7582_v32 = vsel %vm7228_vm5, %v7580_v12, %v7581_v21  ;;  %v7594_v27 = vsel %vm7228_vm5, %v7581_v21, %v7580_v12  ;;  %v12291_v16 = vld [vmem:[#allocation8] sm:$0x77] }
 0x5ca   :  { %v7597_v30 = vadd.f32 %v7582_v32, %v13142_v7  ;;  %v7600_v38 = vadd.f32 %v7594_v27, %v13145_v8  ;;  %v7612_v31 = vsel %vm7420_vm8, %v7610_v40, %v7611_v18  ;;  %v7626_v15 = vsel %vm7420_vm8, %v7611_v18, %v7610_v40 }
 0x5cb   :  { %v7629_v28 = vadd.f32 %v7612_v31, %v7596_v56  ;;  %v7632_v33 = vadd.f32 %v7626_v15, %v7599_v9  ;;  %v13177_v41 = vsub.s32 2, %v12930_v55  ;;  %v7675_v36 = vrot.slane %v12291_v16, %v7674_v35 }
 0x5cd   :  { %v7671_v20 = vrot.slane %v12291_v16, %v13177_v41  ;;  %v7679_v7 = vrot.slane %v13099_v11, %v13177_v41  ;;  %v7690_v19 = vrot.slane %v7675_v36, %v13177_v41 }
 0x5cf   :  { %v7686_v53 = vrot.slane %v7671_v20, %v13177_v41  ;;  %v7694_v45 = vrot.slane %v7679_v7, %v13177_v41 }
 0x622   :  { %v7091_v39 = vpop.f32.mrb[36].mxu0 }
 0x623   :  { %v7177_v8 = vpop.f32.mrb[36].mxu1  ;;  %v7093_v23 = vpop.f32.mrb[37].mxu0  ;;  %v7613_v43 = vrot.slane %v7091_v39, 3 }
 0x624   :  { %v7179_v42 = vpop.f32.mrb[37].mxu1  ;;  %v7095_v47 = vpop.f32.mrb[38].mxu0  ;;  %v7644_v46 = vrot.slane %v7177_v8, 4  ;;  %v7641_v49 = vrot.slane %v7093_v23, 4 }
 0x625   :  { %v7614_v29 = vrot.slane %v7095_v47, 3  ;;  %v7181_v44 = vpop.f32.mrb[38].mxu1  ;;  %v7097_v22 = vpop.f32.mrb[39].mxu0  ;;  %v7647_v51 = vrot.slane %v7179_v42, 4 }
 0x626   :  { %v7645_v60 = vrot.slane %v7181_v44, 4  ;;  %v7642_v11 = vrot.slane %v7097_v22, 4  ;;  %v7183_v50 = vpop.f32.mrb[39].mxu1 }
 0x627   :  { %v7615_v6 = vsel %vm7420_vm8, %v7613_v43, %v7614_v29  ;;  %v7627_v52 = vsel %vm7420_vm8, %v7614_v29, %v7613_v43  ;;  %v7648_v54 = vrot.slane %v7183_v50, 4 }
 0x628   :  { %v7630_v58 = vadd.f32 %v7615_v6, %v7597_v30  ;;  %v7633_v59 = vadd.f32 %v7627_v52, %v7600_v38  ;;  %v7646_v4 = vsel %vm7640_vm11, %v7644_v46, %v7645_v60  ;;  %v7660_v61 = vsel %vm7640_vm11, %v7645_v60, %v7644_v46 }
 0x629   :  { %v7663_v63 = vadd.f32 %v7646_v4, %v7629_v28  ;;  %v7666_v0 = vadd.f32 %v7660_v61, %v7632_v33  ;;  %v7643_v3 = vsel %vm7640_vm11, %v7641_v49, %v7642_v11  ;;  %v7659_v12 = vsel %vm7640_vm11, %v7642_v11, %v7641_v49 }
 0x62a   :  { %v7662_v13 = vadd.f32 %v7643_v3, %v7628_v25  ;;  %v7665_v21 = vadd.f32 %v7659_v12, %v7631_v26  ;;  %v7649_v14 = vsel %vm7640_vm11, %v7647_v51, %v7648_v54  ;;  %v7661_v40 = vsel %vm7640_vm11, %v7648_v54, %v7647_v51 }
 0x62b   :  { %v7696_v57 = vadd.f32 %v7690_v19, %v7663_v63  ;;  %v7699_v5 = vadd.f32 %v7690_v19, %v7666_v0  ;;  %v7664_v18 = vadd.f32 %v7649_v14, %v7630_v58  ;;  %v7667_v56 = vadd.f32 %v7661_v40, %v7633_v59 }
 0x62c   :  { %v7695_v9 = vadd.f32 %v7686_v53, %v7662_v13  ;;  %v7698_v24 = vadd.f32 %v7686_v53, %v7665_v21 }
 0x62d   :  { %v7702_v48 = vmax.f32 %v7696_v57, 0.0  ;;  %v7705_v32 = vmax.f32 %v7699_v5, 0.0  ;;  %v7697_v27 = vadd.f32 %v7694_v45, %v7664_v18  ;;  %v7700_v30 = vadd.f32 %v7694_v45, %v7667_v56 }
 0x62e   :  { %v7701_v38 = vmax.f32 %v7695_v9, 0.0  ;;  %v7704_v31 = vmax.f32 %v7698_v24, 0.0 }
 0x62f   :  { %v7711_v25 = vsel %vm7707_vm12, %v7702_v48, 0.0  ;;  %v7732_v26 = vsel %vm7707_vm12, %v7705_v32, 0.0  ;;  %v7703_v15 = vmax.f32 %v7697_v27, 0.0  ;;  %v7706_v28 = vmax.f32 %v7700_v30, 0.0  ;;  %v12121_v30 = vld [vmem:[#allocation9 + $0x200] ss:$16 sps:$4 sm:$0xff]  }
 0x630   :  { %v7719_v33 = vrot.slane %v7711_v25, 4  ;;  %v7740_v35 = vrot.slane %v7732_v26, 4  ;;  %v7710_v16 = vsel %vm7707_vm12, %v7701_v38, 0.0  ;;  %v7731_v36 = vsel %vm7707_vm12, %v7704_v31, 0.0  ;;  %v12124_v38 = vld [vmem:[#allocation9 + $0x208] ss:$16 sps:$4 sm:$0xff]  }
 0x631   :  { %v7713_v20 = vrot.slane %v7710_v16, 4  ;;  %v7734_v7 = vrot.slane %v7731_v36, 4  ;;  %v7712_v39 = vsel %vm7707_vm12, %v7703_v15, 0.0  ;;  %v7733_v8 = vsel %vm7707_vm12, %v7706_v28, 0.0  ;;  %v12132_v15 = vld [vmem:[#allocation9 + $0x22c] ss:$16 sps:$4 sm:$0xff]  }
 0x632   :  { %v7720_v23 = vmax.f32 %v7711_v25, %v7719_v33  ;;  %v7741_v42 = vmax.f32 %v7732_v26, %v7740_v35  ;;  %v7725_v47 = vrot.slane %v7712_v39, 4  ;;  %v7746_v19 = vrot.slane %v7733_v8, 4  ;;  %v12129_v26 = vld [vmem:[#allocation9 + $0x224] ss:$16 sps:$4 sm:$0xff]   ;;  %v12130_v33 = vld [vmem:[#allocation9 + $0x228] ss:$16 sps:$4 sm:$0xff]  }
 0x633   :  { %v7714_v43 = vmax.f32 %v7710_v16, %v7713_v20  ;;  %v7735_v29 = vmax.f32 %v7731_v36, %v7734_v7  ;;  %v12135_v35 = vld [vmem:[#allocation9 + $0x244] ss:$16 sps:$4 sm:$0xff]   ;;  %v12138_v16 = vld [vmem:[#allocation9 + $0x24c] ss:$16 sps:$4 sm:$0xff]   ;;  %v12139_v7 = vld [vmem:[#allocation9 + $0x260] ss:$16 sps:$4 sm:$0xff]  }
 0x634   :  { %v7721_v44 = vrot.slane %v7720_v23, 2  ;;  %v7742_v22 = vrot.slane %v7741_v42, 2  ;;  %v7726_v53 = vmax.f32 %v7712_v39, %v7725_v47  ;;  %v7747_v45 = vmax.f32 %v7733_v8, %v7746_v19  ;;  %v12141_v36 = vld [vmem:[#allocation9 + $0x264] ss:$16 sps:$4 sm:$0xff]   ;;  %v12144_v20 = vld [vmem:[#allocation9 + $0x26c] ss:$16 sps:$4 sm:$0xff]  }
 0x635   :  { %v7715_v46 = vrot.slane %v7714_v43, 2  ;;  %v7736_v49 = vrot.slane %v7735_v29, 2  ;;  %v12142_v39 = vld [vmem:[#allocation9 + $0x268] ss:$16 sps:$4 sm:$0xff]   ;;  %v12147_v8 = vld [vmem:[#allocation9 + $0x284] ss:$16 sps:$4 sm:$0xff]  }
 0x636   :  { %v7722_v60 = vmax.f32 %v7720_v23, %v7721_v44  ;;  %v7743_v11 = vmax.f32 %v7741_v42, %v7742_v22  ;;  %v7727_v50 = vrot.slane %v7726_v53, 2  ;;  %v7748_v51 = vrot.slane %v7747_v45, 2  ;;  %v12150_v23 = vld [vmem:[#allocation9 + $0x28c] ss:$16 sps:$4 sm:$0xff]   ;;  %v12145_v42 = vld [vmem:[#allocation9 + $0x280] ss:$16 sps:$4 sm:$0xff]  }
 0x637   :  { %v7716_v6 = vmax.f32 %v7714_v43, %v7715_v46  ;;  %v7737_v52 = vmax.f32 %v7735_v29, %v7736_v49  ;;  %v12148_v47 = vld [vmem:[#allocation9 + $0x288] ss:$16 sps:$4 sm:$0xff]   ;;  %v12153_v19 = vld [vmem:[#allocation9 + $0x2a4] ss:$16 sps:$4 sm:$0xff]   ;;  %v12156_v43 = vld [vmem:[#allocation9 + $0x2ac] ss:$16 sps:$4 sm:$0xff]  }
 0x638   :  { %v7728_v54 = vmax.f32 %v7726_v53, %v7727_v50  ;;  %v7749_v58 = vmax.f32 %v7747_v45, %v7748_v51  ;;  %v7723_v59 = vrot.slane %v7722_v60, 1  ;;  %v7744_v4 = vrot.slane %v7743_v11, 1  ;;  %v12151_v29 = vld [vmem:[#allocation9 + $0x2a0] ss:$16 sps:$4 sm:$0xff]   ;;  %v12154_v44 = vld [vmem:[#allocation9 + $0x2a8] ss:$16 sps:$4 sm:$0xff]  }
 0x639   :  { %v7717_v61 = vrot.slane %v7716_v6, 1  ;;  %v7738_v63 = vrot.slane %v7737_v52, 1  ;;  %v12159_v22 = vld [vmem:[#allocation9 + $0x2c4] ss:$16 sps:$4 sm:$0xff]   ;;  %v12162_v53 = vld [vmem:[#allocation9 + $0x2cc] ss:$16 sps:$4 sm:$0xff]  }
 0x63a   :  { %v7729_v0 = vrot.slane %v7728_v54, 1  ;;  %v7750_v3 = vrot.slane %v7749_v58, 1  ;;  %v7724_v12 = vmax.f32 %v7722_v60, %v7723_v59  ;;  %v7745_v13 = vmax.f32 %v7743_v11, %v7744_v4  ;;  %v12157_v45 = vld [vmem:[#allocation9 + $0x2c0] ss:$16 sps:$4 sm:$0xff]   ;;  %v12160_v46 = vld [vmem:[#allocation9 + $0x2c8] ss:$16 sps:$4 sm:$0xff]  }
 0x63b   :  { %v7718_v21 = vmax.f32 %v7716_v6, %v7717_v61  ;;  %v7739_v14 = vmax.f32 %v7737_v52, %v7738_v63  ;;  %v12165_v49 = vld [vmem:[#allocation9 + $0x2e4] ss:$16 sps:$4 sm:$0xff]   ;;  %v12168_v60 = vld [vmem:[#allocation9 + $0x2ec] ss:$16 sps:$4 sm:$0xff]   ;;  %v12163_v11 = vld [vmem:[#allocation9 + $0x2e0] ss:$16 sps:$4 sm:$0xff]  }
 0x63c   :  { %v7730_v40 = vmax.f32 %v7728_v54, %v7729_v0  ;;  %v7751_v57 = vmax.f32 %v7749_v58, %v7750_v3  ;;  %v7753_v5 = vsel %vm7344_vm7, %v7724_v12, %v7745_v13  ;;  %v12166_v50 = vld [vmem:[#allocation9 + $0x2e8] ss:$16 sps:$4 sm:$0xff]   ;;  %v13219_v51 = vld [vmem:[#allocation11 + $0x4] ss:$16 sps:$4 sm:$0xff]   ;;  %v13221_v6 = vld [vmem:[#allocation11 + $0xc] ss:$16 sps:$4 sm:$0xff]  }
 0x63d   :  { %v7768_v18 = vrot.slane %v7753_v5, 4  ;;  %v7752_v56 = vsel %vm7344_vm7, %v7718_v21, %v7739_v14  ;;  %v13223_v52 = vld [vmem:[#allocation11] ss:$16 sps:$4 sm:$0xff]   ;;  %v13225_v54 = vld [vmem:[#allocation11 + $0x8] ss:$16 sps:$4 sm:$0xff]  }
 0x63e   :  { %v7767_v9 = vrot.slane %v7752_v56, 4  ;;  %v7754_v24 = vsel %vm7344_vm7, %v7730_v40, %v7751_v57  ;;  %v13231_v59 = vld [vmem:[#allocation11 + $0x24] ss:$16 sps:$4 sm:$0xff]   ;;  %v13233_v4 = vld [vmem:[#allocation11 + $0x2c] ss:$16 sps:$4 sm:$0xff]  }
 0x63f   :  { %v7778_v48 = vsel %vm7640_vm11, %v13089_v34, %v7768_v18  ;;  %v7769_v32 = vrot.slane %v7754_v24, 4  ;;  %v12127_v34 = vld [vmem:[#allocation9 + $0x220] ss:$16 sps:$4 sm:$0xff]   ;;  %v13239_v63 = vld [vmem:[#allocation11 + $0x28] ss:$16 sps:$4 sm:$0xff]  }
 0x640   :  { %v7781_v27 = vpack.c.bf16 %v7778_v48, %v7778_v48  ;;  %v7777_v31 = vsel %vm7640_vm11, %v13085_v37, %v7767_v9  ;;  %v12133_v37 = vld [vmem:[#allocation9 + $0x240] ss:$16 sps:$4 sm:$0xff]   ;;  %v13243_v0 = vld [vmem:[#allocation11 + $0x44] ss:$16 sps:$4 sm:$0xff]   ;;  %v13245_v3 = vld [vmem:[#allocation11 + $0x4c] ss:$16 sps:$4 sm:$0xff]  }
 0x641   :  { %v7780_v25 = vpack.c.bf16 %v7777_v31, %v7777_v31  ;;  %v13215_v28 = vsel %vm7640_vm11, %v13127_v10, %v7769_v32  ;;  %v12136_v10 = vld [vmem:[#allocation9 + $0x248] ss:$16 sps:$4 sm:$0xff]   ;;  %v13237_v61 = vld [vmem:[#allocation11 + $0x20] ss:$16 sps:$4 sm:$0xff]   ;;  %v13257_v21 = vld [vmem:[#allocation11 + $0x64] ss:$16 sps:$4 sm:$0xff]  }
 0x642   :  { %8413 = vmatprep.mubr.bf16.mxu0 %v7781_v27  ;;  %8495 = vmatprep.mubr.bf16.mxu1 %v7781_v27  ;;  %v7782_v58 = vpack.c.bf16 %v13215_v28, %v13215_v28  ;;  %v13251_v12 = vld [vmem:[#allocation11 + $0x40] ss:$16 sps:$4 sm:$0xff]   ;;  %v13253_v13 = vld [vmem:[#allocation11 + $0x48] ss:$16 sps:$4 sm:$0xff]   ;;  %v13259_v14 = vld [vmem:[#allocation11 + $0x6c] ss:$16 sps:$4 sm:$0xff]  }
 0x643   :  { %8414 = vmatmul.mubr.bf16.vlgmr.msra.gmra.mrb[40].mxu0 %v7780_v25  ;;  %8496 = vmatmul.mubr.bf16.vlgmr.msra.gmra.mrb[40].mxu1 %v7780_v25  ;;  %v13263_v40 = vld [vmem:[#allocation11 + $0x60] ss:$16 sps:$4 sm:$0xff]   ;;  %v13265_v57 = vld [vmem:[#allocation11 + $0x68] ss:$16 sps:$4 sm:$0xff]   ;;  %v13269_v5 = vld [vmem:[#allocation11 + $0x84] ss:$16 sps:$4 sm:$0xff]  }
 0x644   :  { %8423 = vmatpush1.bf16.msra.mxu0 %v12121_v30  ;;  %8505 = vmatpush1.bf16.msra.mxu1 %v12124_v38  ;;  %v13271_v18 = vld [vmem:[#allocation11 + $0x8c] ss:$16 sps:$4 sm:$0xff]   ;;  %v13275_v56 = vld [vmem:[#allocation11 + $0x80] ss:$16 sps:$4 sm:$0xff]   ;;  %v13277_v9 = vld [vmem:[#allocation11 + $0x88] ss:$16 sps:$4 sm:$0xff]  }
 0x645   :  { %8424 = vmatprep.subr.bf16.mxu0 %v12129_v26  ;;  %8506 = vmatprep.subr.bf16.mxu1 %v12132_v15  ;;  %v13281_v24 = vld [vmem:[#allocation11 + $0xa4] ss:$16 sps:$4 sm:$0xff]   ;;  %v13283_v48 = vld [vmem:[#allocation11 + $0xac] ss:$16 sps:$4 sm:$0xff]   ;;  %v13287_v32 = vld [vmem:[#allocation11 + $0xa0] ss:$16 sps:$4 sm:$0xff]  }
 0x646   :  { %8454 = vmatprep.mubr.bf16.mxu0 %v12613_v1  ;;  %8536 = vmatprep.mubr.bf16.mxu1 %v12613_v1  ;;  %v13289_v27 = vld [vmem:[#allocation11 + $0xa8] ss:$16 sps:$4 sm:$0xff]   ;;  %v13293_v30 = vld [vmem:[#allocation11 + $0xc4] ss:$16 sps:$4 sm:$0xff]   ;;  %v13295_v38 = vld [vmem:[#allocation11 + $0xcc] ss:$16 sps:$4 sm:$0xff]  }
 0x647   :  { %v13299_v31 = vld [vmem:[#allocation11 + $0xc0] ss:$16 sps:$4 sm:$0xff]   ;;  %v13301_v25 = vld [vmem:[#allocation11 + $0xc8] ss:$16 sps:$4 sm:$0xff]   ;;  %v13305_v26 = vld [vmem:[#allocation11 + $0xe4] ss:$16 sps:$4 sm:$0xff]  }
 0x648   :  { %8425 = vmatpush1.bf16.msra.mxu0 %v12127_v34  ;;  %8507 = vmatpush1.bf16.msra.mxu1 %v12130_v33  ;;  %v13307_v15 = vld [vmem:[#allocation11 + $0xec] ss:$16 sps:$4 sm:$0xff]   ;;  %v13311_v28 = vld [vmem:[#allocation11 + $0xe0] ss:$16 sps:$4 sm:$0xff]   ;;  %v13313_v34 = vld [vmem:[#allocation11 + $0xe8] ss:$16 sps:$4 sm:$0xff]  }
 0x649   :  { %8426 = vmatprep.subr.bf16.mxu0 %v12135_v35  ;;  %8508 = vmatprep.subr.bf16.mxu1 %v12138_v16 }
 0x64c   :  { %8427 = vmatpush1.bf16.msra.mxu0 %v12133_v37  ;;  %8509 = vmatpush1.bf16.msra.mxu1 %v12136_v10 }
 0x64d   :  { %8428 = vmatprep.subr.bf16.mxu0 %v12141_v36  ;;  %8510 = vmatprep.subr.bf16.mxu1 %v12144_v20 }
 0x650   :  { %8429 = vmatpush1.bf16.msra.mxu0 %v12139_v7  ;;  %8511 = vmatpush1.bf16.msra.mxu1 %v12142_v39  ;;  %v7879_v39 = vld [vmem:[#allocation12] sm:$0xf] }
 0x651   :  { %8430 = vmatprep.subr.bf16.mxu0 %v12147_v8  ;;  %8512 = vmatprep.subr.bf16.mxu1 %v12150_v23  ;;  %v7884_v8 = vrot.slane %v7879_v39, %v12933_v62  ;;  %v7888_v23 = vrot.slane %v7879_v39, %v13048_v17 }
 0x654   :  { %8431 = vmatpush1.bf16.msra.mxu0 %v12145_v42  ;;  %8513 = vmatpush1.bf16.msra.mxu1 %v12148_v47  ;;  %v7895_v42 = vsub.s32 3, %v12930_v55 }
 0x655   :  { %8432 = vmatprep.subr.bf16.mxu0 %v12153_v19  ;;  %8514 = vmatprep.subr.bf16.mxu1 %v12156_v43 }
 0x658   :  { %8433 = vmatpush1.bf16.msra.mxu0 %v12151_v29  ;;  %8515 = vmatpush1.bf16.msra.mxu1 %v12154_v44 }
 0x659   :  { %8434 = vmatprep.subr.bf16.mxu0 %v12159_v22  ;;  %8516 = vmatprep.subr.bf16.mxu1 %v12162_v53 }
 0x65c   :  { %8435 = vmatpush1.bf16.msra.mxu0 %v12157_v45  ;;  %8517 = vmatpush1.bf16.msra.mxu1 %v12160_v46  ;;  %v7896_v45 = vrot.slane %v7879_v39, %v7895_v42 }
 0x65d   :  { %8436 = vmatprep.subr.bf16.mxu0 %v12165_v49  ;;  %8518 = vmatprep.subr.bf16.mxu1 %v12168_v60 }
 0x660   :  { %8437 = vmatpush1.bf16.msra.mxu0 %v12163_v11  ;;  %8519 = vmatpush1.bf16.msra.mxu1 %v12166_v50 }
 0x661   :  { %8737 = vmatprep.subr.bf16.mxu0 %v13219_v51  ;;  %8778 = vmatprep.subr.bf16.mxu1 %v13221_v6 }
 0x663   :  { %8455 = vmatmul.mubr.bf16.vlgmr.msra.gmra.mrb[40].mxu0 %v7782_v58  ;;  %8537 = vmatmul.mubr.bf16.vlgmr.msra.gmra.mrb[40].mxu1 %v7782_v58 }
 0x664   :  { %8738 = vmatpush1.bf16.msra.mxu0 %v13223_v52  ;;  %8779 = vmatpush1.bf16.msra.mxu1 %v13225_v54 }
 0x665   :  { %8739 = vmatprep.subr.bf16.mxu0 %v13231_v59  ;;  %8780 = vmatprep.subr.bf16.mxu1 %v13233_v4 }
 0x666   :  { %8769 = vmatprep.mubr.bf16.mxu0 %v12613_v1  ;;  %8810 = vmatprep.mubr.bf16.mxu1 %v12613_v1 }
 0x668   :  { %8740 = vmatpush1.bf16.msra.mxu0 %v13237_v61  ;;  %8781 = vmatpush1.bf16.msra.mxu1 %v13239_v63 }
 0x669   :  { %8741 = vmatprep.subr.bf16.mxu0 %v13243_v0  ;;  %8782 = vmatprep.subr.bf16.mxu1 %v13245_v3 }
 0x66c   :  { %8742 = vmatpush1.bf16.msra.mxu0 %v13251_v12  ;;  %8783 = vmatpush1.bf16.msra.mxu1 %v13253_v13 }
 0x66d   :  { %8743 = vmatprep.subr.bf16.mxu0 %v13257_v21  ;;  %8784 = vmatprep.subr.bf16.mxu1 %v13259_v14 }
 0x670   :  { %8744 = vmatpush1.bf16.msra.mxu0 %v13263_v40  ;;  %8785 = vmatpush1.bf16.msra.mxu1 %v13265_v57 }
 0x671   :  { %8745 = vmatprep.subr.bf16.mxu0 %v13269_v5  ;;  %8786 = vmatprep.subr.bf16.mxu1 %v13271_v18 }
 0x674   :  { %8746 = vmatpush1.bf16.msra.mxu0 %v13275_v56  ;;  %8787 = vmatpush1.bf16.msra.mxu1 %v13277_v9 }
 0x675   :  { %8747 = vmatprep.subr.bf16.mxu0 %v13281_v24  ;;  %8788 = vmatprep.subr.bf16.mxu1 %v13283_v48 }
 0x678   :  { %8748 = vmatpush1.bf16.msra.mxu0 %v13287_v32  ;;  %8789 = vmatpush1.bf16.msra.mxu1 %v13289_v27 }
 0x679   :  { %8749 = vmatprep.subr.bf16.mxu0 %v13293_v30  ;;  %8790 = vmatprep.subr.bf16.mxu1 %v13295_v38 }
 0x67c   :  { %8750 = vmatpush1.bf16.msra.mxu0 %v13299_v31  ;;  %8791 = vmatpush1.bf16.msra.mxu1 %v13301_v25 }
 0x67d   :  { %8751 = vmatprep.subr.bf16.mxu0 %v13305_v26  ;;  %8792 = vmatprep.subr.bf16.mxu1 %v13307_v15 }
 0x680   :  { %8752 = vmatpush1.bf16.msra.mxu0 %v13311_v28  ;;  %8793 = vmatpush1.bf16.msra.mxu1 %v13313_v34 }
 0x681   :  { %8848 = vmatprep.subr.bf16.mxu0 %v13219_v51  ;;  %8889 = vmatprep.subr.bf16.mxu1 %v13221_v6 }
 0x683   :  { %8770 = vmatmul.mubr.bf16.vlgmr.msra.gmra.mrb[44].mxu0 %v12613_v1  ;;  %8811 = vmatmul.mubr.bf16.vlgmr.msra.gmra.mrb[44].mxu1 %v12613_v1 }
 0x684   :  { %8849 = vmatpush1.bf16.msra.mxu0 %v13223_v52  ;;  %8890 = vmatpush1.bf16.msra.mxu1 %v13225_v54 }
 0x685   :  { %8850 = vmatprep.subr.bf16.mxu0 %v13231_v59  ;;  %8891 = vmatprep.subr.bf16.mxu1 %v13233_v4 }
 0x686   :  { %8880 = vmatprep.mubr.bf16.mxu0 %v12613_v1  ;;  %8921 = vmatprep.mubr.bf16.mxu1 %v12613_v1 }
 0x688   :  { %8851 = vmatpush1.bf16.msra.mxu0 %v13237_v61  ;;  %8892 = vmatpush1.bf16.msra.mxu1 %v13239_v63 }
 0x689   :  { %8852 = vmatprep.subr.bf16.mxu0 %v13243_v0  ;;  %8893 = vmatprep.subr.bf16.mxu1 %v13245_v3 }
 0x68c   :  { %8853 = vmatpush1.bf16.msra.mxu0 %v13251_v12  ;;  %8894 = vmatpush1.bf16.msra.mxu1 %v13253_v13 }
 0x68d   :  { %8854 = vmatprep.subr.bf16.mxu0 %v13257_v21  ;;  %8895 = vmatprep.subr.bf16.mxu1 %v13259_v14 }
 0x690   :  { %8855 = vmatpush1.bf16.msra.mxu0 %v13263_v40  ;;  %8896 = vmatpush1.bf16.msra.mxu1 %v13265_v57 }
 0x691   :  { %8856 = vmatprep.subr.bf16.mxu0 %v13269_v5  ;;  %8897 = vmatprep.subr.bf16.mxu1 %v13271_v18 }
 0x694   :  { %8857 = vmatpush1.bf16.msra.mxu0 %v13275_v56  ;;  %8898 = vmatpush1.bf16.msra.mxu1 %v13277_v9 }
 0x695   :  { %8858 = vmatprep.subr.bf16.mxu0 %v13281_v24  ;;  %8899 = vmatprep.subr.bf16.mxu1 %v13283_v48 }
 0x698   :  { %8859 = vmatpush1.bf16.msra.mxu0 %v13287_v32  ;;  %8900 = vmatpush1.bf16.msra.mxu1 %v13289_v27 }
 0x699   :  { %8860 = vmatprep.subr.bf16.mxu0 %v13293_v30  ;;  %8901 = vmatprep.subr.bf16.mxu1 %v13295_v38 }
 0x69c   :  { %8861 = vmatpush1.bf16.msra.mxu0 %v13299_v31  ;;  %8902 = vmatpush1.bf16.msra.mxu1 %v13301_v25 }
 0x69d   :  { %8862 = vmatprep.subr.bf16.mxu0 %v13305_v26  ;;  %8903 = vmatprep.subr.bf16.mxu1 %v13307_v15 }
 0x6a0   :  { %8863 = vmatpush1.bf16.msra.mxu0 %v13311_v28  ;;  %8904 = vmatpush1.bf16.msra.mxu1 %v13313_v34 }
 0x6a1   :  { %8977 = vmatprep.subr.bf16.mxu0 %v13219_v51  ;;  %9018 = vmatprep.subr.bf16.mxu1 %v13221_v6  ;;  %v7892_v51 = vrot.slane %v7879_v39, %v13177_v41 }
 0x736   :  { %v8456_v33 = vpop.f32.mrb[40].mxu0  ;;  %v8538_v35 = vpop.f32.mrb[40].mxu1 }
 0x737   :  { %v8458_v16 = vpop.f32.mrb[41].mxu0  ;;  %v8540_v37 = vpop.f32.mrb[41].mxu1  ;;  %v13360_v47 = vadd.f32 %v8456_v33, %v7884_v8  ;;  %v13370_v58 = vadd.f32 %v8538_v35, %v7892_v51  ;;  %v12219_v51 = vld [vmem:[#allocation14 + $0x10] sm:$0xff]  }
 0x738   :  { %v8460_v10 = vpop.f32.mrb[42].mxu0  ;;  %v8542_v36 = vpop.f32.mrb[42].mxu1  ;;  %v13362_v19 = vadd.f32 %v8458_v16, %v7888_v23  ;;  %v13366_v55 = vadd.f32 %v8540_v37, %v7896_v45 }
 0x739   :  { %v8461_v20 = vpop.f32.mrb[43].mxu0  ;;  %v8543_v7 = vpop.f32.mrb[43].mxu1 }
 0x756   :  { %v8771_v43 = vpop.f32.mrb[44].mxu0  ;;  %v8812_v29 = vpop.f32.mrb[44].mxu1 }
 0x757   :  { %v8819_v44 = vadd.f32 %v13360_v47, %v8771_v43  ;;  %v8773_v22 = vpop.f32.mrb[45].mxu0  ;;  %v8814_v53 = vpop.f32.mrb[45].mxu1  ;;  %v8821_v16 = vadd.f32 %v13370_v58, %v8812_v29 }
 0x758   :  { %v8820_v46 = vadd.f32 %v13362_v19, %v8773_v22  ;;  %v8775_v49 = vpop.f32.mrb[46].mxu0  ;;  %v8816_v60 = vpop.f32.mrb[46].mxu1  ;;  %v8822_v6 = vadd.f32 %v13366_v55, %v8814_v53 }
 0x759   :  { %v10470_v62 = vmul.f32 -1.442695, %v8819_v44  ;;  %v8776_v11 = vpop.f32.mrb[47].mxu0  ;;  %v8817_v17 = vpop.f32.mrb[47].mxu1 }
 0x75a   :  { %v10471_v50 = vmul.f32 -1.442695, %v8820_v46  ;;  %v10472_v33 = vmul.f32 -1.442695, %v8822_v6  ;;  %v12217_v17 = vld [vmem:[#allocation14] sm:$0xff]   ;;  %v12220_v6 = vld [vmem:[#allocation14 + $0x18] sm:$0xff]  }
 0x75b   :  { %12233 = vpow2.f32 %v10470_v62 }
 0x75c   :  { %12235 = vpow2.f32 %v10471_v50  ;;  %v12218_v50 = vld [vmem:[#allocation14 + $0x8] sm:$0xff]  }
 0x75d   :  { %12237 = vpow2.f32 %v10472_v33  ;;  %v12221_v33 = vld [vmem:[#allocation14 + $0x20] sm:$0xff]  }
 0x75e   :  { %12239 = vtanh.f32 %v8821_v16  ;;  %v12222_v16 = vld [vmem:[#allocation14 + $0x28] sm:$0xff]  }
 0x765   :  { %v12234_v10 = vpop.eup %12233 }
 0x766   :  { %v12236_v36 = vpop.eup %12235  ;;  %v8826_v20 = vadd.f32 1.0, %v12234_v10  ;;  %v12223_v10 = vld [vmem:[#allocation14 + $0x30] sm:$0xff]  }
 0x767   :  { %v8832_v7 = vadd.f32 1.0, %v12236_v36  ;;  %v12238_v37 = vpop.eup %12237  ;;  %v12224_v36 = vld [vmem:[#allocation14 + $0x38] sm:$0xff]  }
 0x768   :  { %12241 = vrcp.f32 %v8826_v20  ;;  %v12240_v8 = vpop.eup %12239  ;;  %v8839_v39 = vadd.f32 1.0, %v12238_v37 }
 0x769   :  { %12243 = vrcp.f32 %v8832_v7 }
 0x76a   :  { %12245 = vrcp.f32 %v8839_v39 }
 0x772   :  { %v12242_v23 = vpop.eup %12241 }
 0x773   :  { %v12244_v42 = vpop.eup %12243  ;;  %v8843_v41 = vmul.f32 %v12242_v23, %v12240_v8 }
 0x774   :  { %v8842_v43 = vmul.f32 0.0, %v12244_v42  ;;  %v12246_v29 = vpop.eup %12245 }
 0x776   :  { %v13373_v35 = vadd.f32 %v8843_v41, %v8842_v43 }
 0x778   :  { %12247 = vtanh.f32 %v13373_v35 }
 0x782   :  { %v12248_v44 = vpop.eup %12247 }
 0x783   :  { %v13376_v22 = vmul.f32 %v12248_v44, %v12246_v29 }
 0x785   :  { %v8847_v53 = vpack.c.bf16 %v13376_v22, %v13376_v22 }
 0x787   :  { %8881 = vmatmul.mubr.bf16.vlgmr.msra.gmra.mrb[48].mxu0 %v8847_v53  ;;  %8922 = vmatmul.mubr.bf16.vlgmr.msra.gmra.mrb[48].mxu1 %v8847_v53 }
 0x788   :  { %8978 = vmatpush1.bf16.msra.mxu0 %v13223_v52  ;;  %9019 = vmatpush1.bf16.msra.mxu1 %v13225_v54 }
 0x789   :  { %8979 = vmatprep.subr.bf16.mxu0 %v13231_v59  ;;  %9020 = vmatprep.subr.bf16.mxu1 %v13233_v4 }
 0x78a   :  { %9009 = vmatprep.mubr.bf16.mxu0 %v12613_v1  ;;  %9050 = vmatprep.mubr.bf16.mxu1 %v12613_v1 }
 0x78c   :  { %8980 = vmatpush1.bf16.msra.mxu0 %v13237_v61  ;;  %9021 = vmatpush1.bf16.msra.mxu1 %v13239_v63 }
 0x78d   :  { %8981 = vmatprep.subr.bf16.mxu0 %v13243_v0  ;;  %9022 = vmatprep.subr.bf16.mxu1 %v13245_v3 }
 0x790   :  { %8982 = vmatpush1.bf16.msra.mxu0 %v13251_v12  ;;  %9023 = vmatpush1.bf16.msra.mxu1 %v13253_v13 }
 0x791   :  { %8983 = vmatprep.subr.bf16.mxu0 %v13257_v21  ;;  %9024 = vmatprep.subr.bf16.mxu1 %v13259_v14 }
 0x794   :  { %8984 = vmatpush1.bf16.msra.mxu0 %v13263_v40  ;;  %9025 = vmatpush1.bf16.msra.mxu1 %v13265_v57 }
 0x795   :  { %8985 = vmatprep.subr.bf16.mxu0 %v13269_v5  ;;  %9026 = vmatprep.subr.bf16.mxu1 %v13271_v18 }
 0x798   :  { %8986 = vmatpush1.bf16.msra.mxu0 %v13275_v56  ;;  %9027 = vmatpush1.bf16.msra.mxu1 %v13277_v9 }
 0x799   :  { %8987 = vmatprep.subr.bf16.mxu0 %v13281_v24  ;;  %9028 = vmatprep.subr.bf16.mxu1 %v13283_v48 }
 0x79c   :  { %8988 = vmatpush1.bf16.msra.mxu0 %v13287_v32  ;;  %9029 = vmatpush1.bf16.msra.mxu1 %v13289_v27 }
 0x79d   :  { %8989 = vmatprep.subr.bf16.mxu0 %v13293_v30  ;;  %9030 = vmatprep.subr.bf16.mxu1 %v13295_v38 }
 0x7a0   :  { %8990 = vmatpush1.bf16.msra.mxu0 %v13299_v31  ;;  %9031 = vmatpush1.bf16.msra.mxu1 %v13301_v25  ;;  %v8966_v25 = vrot.slane %v13373_v35, 6 }
 0x7a1   :  { %8991 = vmatprep.subr.bf16.mxu0 %v13305_v26  ;;  %9032 = vmatprep.subr.bf16.mxu1 %v13307_v15 }
 0x7a4   :  { %8992 = vmatpush1.bf16.msra.mxu0 %v13311_v28  ;;  %9033 = vmatpush1.bf16.msra.mxu1 %v13313_v34 }
 0x7a5   :  { %10546 = vmatprep.subr.bf16.mxu0 %v12614_v2  ;;  %10566 = vmatprep.subr.bf16.mxu1 %v12614_v2 }
 0x85a   :  { %v8882_v1 = vpop.f32.mrb[48].mxu0  ;;  %v8923_v52 = vpop.f32.mrb[48].mxu1 }
 0x85b   :  { %v8934_v54 = vrot.slane %v8882_v1, 6  ;;  %v8884_v59 = vpop.f32.mrb[49].mxu0  ;;  %v8925_v4 = vpop.f32.mrb[49].mxu1  ;;  %v8936_v18 = vrot.slane %v8923_v52, 6 }
 0x85c   :  { %v8935_v61 = vrot.slane %v8884_v59, 6  ;;  %v8886_v63 = vpop.f32.mrb[50].mxu0  ;;  %v8927_v0 = vpop.f32.mrb[50].mxu1  ;;  %v8937_v57 = vrot.slane %v8925_v4, 6 }
 0x85d   :  { %v8942_v3 = vadd.f32 %v13360_v47, %v8934_v54  ;;  %v8887_v12 = vpop.f32.mrb[51].mxu0  ;;  %v8928_v13 = vpop.f32.mrb[51].mxu1  ;;  %v8944_v9 = vadd.f32 %v13370_v58, %v8936_v18 }
 0x85e   :  { %v8943_v21 = vadd.f32 %v13362_v19, %v8935_v61  ;;  %v8945_v5 = vadd.f32 %v13366_v55, %v8937_v57 }
 0x85f   :  { %v10473_v14 = vmul.f32 -1.442695, %v8942_v3 }
 0x860   :  { %v10474_v40 = vmul.f32 -1.442695, %v8943_v21  ;;  %v10475_v56 = vmul.f32 -1.442695, %v8945_v5 }
 0x861   :  { %12249 = vpow2.f32 %v10473_v14 }
 0x862   :  { %12251 = vpow2.f32 %v10474_v40 }
 0x863   :  { %12253 = vpow2.f32 %v10475_v56 }
 0x864   :  { %12255 = vtanh.f32 %v8944_v9 }
 0x86b   :  { %v12250_v24 = vpop.eup %12249 }
 0x86c   :  { %v12252_v48 = vpop.eup %12251  ;;  %v8949_v32 = vadd.f32 1.0, %v12250_v24 }
 0x86d   :  { %v8955_v27 = vadd.f32 1.0, %v12252_v48  ;;  %v12254_v30 = vpop.eup %12253 }
 0x86e   :  { %12257 = vrcp.f32 %v8949_v32  ;;  %v12256_v38 = vpop.eup %12255  ;;  %v8962_v28 = vadd.f32 1.0, %v12254_v30  ;;  %v10479_v32 = vld [vmem:[#allocation15] ss:$0 sm:$0xff] }
 0x86f   :  { %12259 = vrcp.f32 %v8955_v27 }
 0x870   :  { %12261 = vrcp.f32 %v8962_v28 }
 0x878   :  { %v12258_v31 = vpop.eup %12257 }
 0x879   :  { %v12260_v26 = vpop.eup %12259  ;;  %v8969_v15 = vmul.f32 %v12258_v31, %v12256_v38 }
 0x87a   :  { %v8968_v34 = vmul.f32 %v12260_v26, %v8966_v25  ;;  %v12262_v46 = vpop.eup %12261  ;;  %v10488_v25 = vld [vmem:[#allocation17] ss:$0 sm:$0xff] }
 0x87c   :  { %v13419_v45 = vadd.f32 %v8969_v15, %v8968_v34 }
 0x87e   :  { %12263 = vtanh.f32 %v13419_v45  ;;  %v9095_v21 = vrot.slane %v13419_v45, 6  ;;  %v12225_v45 = vld [vmem:[#allocation18] sm:$0xff]  }
 0x888   :  { %v12264_v49 = vpop.eup %12263 }
 0x889   :  { %v13422_v60 = vmul.f32 %v12264_v49, %v12262_v46  ;;  %v12226_v46 = vld [vmem:[#allocation18 + $0x8] sm:$0xff]   ;;  %v12227_v49 = vld [vmem:[#allocation18 + $0x10] sm:$0xff]  }
 0x88b   :  { %v8973_v62 = vpack.c.bf16 %v13422_v60, %v13422_v60  ;;  %v9102_v9 = vsel %vm7773_vm10, %v13376_v22, %v13422_v60 }
 0x88d   :  { %v8975_v11 = vrot.slane %v8973_v62, 1  ;;  %v12228_v62 = vld [vmem:[#allocation18 + $0x18] sm:$0xff]  }
 0x88f   :  { %9010 = vmatmul.mubr.bf16.vlgmr.msra.gmra.mrb[52].mxu0 %v8975_v11  ;;  %9051 = vmatmul.mubr.bf16.vlgmr.msra.gmra.mrb[52].mxu1 %v8975_v11  ;;  %v12229_v11 = vld [vmem:[#allocation18 + $0x20] sm:$0xff]  }
 0x890   :  { %10562 = vmatprep.mubr.msk.bf16.mxu0 %vm12615_vm0, %v12614_v2  ;;  %10582 = vmatprep.mubr.msk.bf16.mxu1 %vm12615_vm0, %v12614_v2 }
 0x891   :  { %10547 = vmatpush3.bf16.msra.mxu0 %v12217_v17  ;;  %10567 = vmatpush3.bf16.msra.mxu1 %v12225_v45  ;;  %v10489_v17 = vld [vmem:[#allocation2] ss:$0 sm:$0xff] }
 0x892   :  { %10548 = vmatprep.subr.bf16.mxu0 %v12614_v2  ;;  %10568 = vmatprep.subr.bf16.mxu1 %v12614_v2 }
 0x895   :  { %10549 = vmatpush3.bf16.msra.mxu0 %v12218_v50  ;;  %10569 = vmatpush3.bf16.msra.mxu1 %v12226_v46 }
 0x896   :  { %10550 = vmatprep.subr.bf16.mxu0 %v12614_v2  ;;  %10570 = vmatprep.subr.bf16.mxu1 %v12614_v2 }
 0x899   :  { %10551 = vmatpush3.bf16.msra.mxu0 %v12219_v51  ;;  %10571 = vmatpush3.bf16.msra.mxu1 %v12227_v49 }
 0x89a   :  { %10552 = vmatprep.subr.bf16.mxu0 %v12614_v2  ;;  %10572 = vmatprep.subr.bf16.mxu1 %v12614_v2 }
 0x89d   :  { %10553 = vmatpush3.bf16.msra.mxu0 %v12220_v6  ;;  %10573 = vmatpush3.bf16.msra.mxu1 %v12228_v62 }
 0x89e   :  { %10554 = vmatprep.subr.bf16.mxu0 %v12614_v2  ;;  %10574 = vmatprep.subr.bf16.mxu1 %v12614_v2 }
 0x8a1   :  { %10555 = vmatpush3.bf16.msra.mxu0 %v12221_v33  ;;  %10575 = vmatpush3.bf16.msra.mxu1 %v12229_v11 }
 0x8a2   :  { %10556 = vmatprep.subr.bf16.mxu0 %v12614_v2  ;;  %10576 = vmatprep.subr.bf16.mxu1 %v12614_v2 }
 0x8a5   :  { %10557 = vmatpush3.bf16.msra.mxu0 %v12222_v16 }
 0x8a6   :  { %10558 = vmatprep.subr.bf16.mxu0 %v12614_v2 }
 0x8a9   :  { %10559 = vmatpush3.bf16.msra.mxu0 %v12223_v10 }
 0x8aa   :  { %10560 = vmatprep.subr.bf16.mxu0 %v12614_v2 }
 0x8ad   :  { %10561 = vmatpush3.bf16.msra.mxu0 %v12224_v36 }
 0x962   :  { %v9011_v20 = vpop.f32.mrb[52].mxu0  ;;  %v9052_v7 = vpop.f32.mrb[52].mxu1 }
 0x963   :  { %v9063_v37 = vrot.slane %v9011_v20, 4  ;;  %v9013_v8 = vpop.f32.mrb[53].mxu0  ;;  %v9054_v23 = vpop.f32.mrb[53].mxu1  ;;  %v9065_v59 = vrot.slane %v9052_v7, 4 }
 0x964   :  { %v9064_v42 = vrot.slane %v9013_v8, 4  ;;  %v9015_v41 = vpop.f32.mrb[54].mxu0  ;;  %v9056_v39 = vpop.f32.mrb[54].mxu1  ;;  %v9066_v52 = vrot.slane %v9054_v23, 4 }
 0x965   :  { %v9071_v43 = vadd.f32 %v13360_v47, %v9063_v37  ;;  %v9016_v35 = vpop.f32.mrb[55].mxu0  ;;  %v9057_v29 = vpop.f32.mrb[55].mxu1  ;;  %v9073_v61 = vadd.f32 %v13370_v58, %v9065_v59 }
 0x966   :  { %v9072_v44 = vadd.f32 %v13362_v19, %v9064_v42  ;;  %v9074_v54 = vadd.f32 %v13366_v55, %v9066_v52 }
 0x967   :  { %v10476_v53 = vmul.f32 -1.442695, %v9071_v43 }
 0x968   :  { %v10477_v1 = vmul.f32 -1.442695, %v9072_v44  ;;  %v10478_v4 = vmul.f32 -1.442695, %v9074_v54 }
 0x969   :  { %12265 = vpow2.f32 %v10476_v53 }
 0x96a   :  { %12267 = vpow2.f32 %v10477_v1 }
 0x96b   :  { %12269 = vpow2.f32 %v10478_v4 }
 0x96c   :  { %12271 = vtanh.f32 %v9073_v61 }
 0x973   :  { %v12266_v63 = vpop.eup %12265 }
 0x974   :  { %v12268_v0 = vpop.eup %12267  ;;  %v9078_v3 = vadd.f32 1.0, %v12266_v63  ;;  %v12230_v63 = vld [vmem:[#allocation18 + $0x28] sm:$0xff]  }
 0x975   :  { %v9084_v47 = vadd.f32 1.0, %v12268_v0  ;;  %v12270_v19 = vpop.eup %12269  ;;  %10577 = vmatpush3.bf16.msra.mxu1 %v12230_v63 }
 0x976   :  { %12273 = vrcp.f32 %v9078_v3  ;;  %v12272_v12 = vpop.eup %12271  ;;  %v9091_v55 = vadd.f32 1.0, %v12270_v19  ;;  %10578 = vmatprep.subr.bf16.mxu1 %v12614_v2  ;;  %v12231_v3 = vld [vmem:[#allocation18 + $0x30] sm:$0xff]  }
 0x977   :  { %12275 = vrcp.f32 %v9084_v47  ;;  %v12232_v47 = vld [vmem:[#allocation18 + $0x38] sm:$0xff]  }
 0x978   :  { %12277 = vrcp.f32 %v9091_v55 }
 0x979   :  { %10579 = vmatpush3.bf16.msra.mxu1 %v12231_v3 }
 0x97a   :  { %10580 = vmatprep.subr.bf16.mxu1 %v12614_v2 }
 0x97d   :  { %10581 = vmatpush3.bf16.msra.mxu1 %v12232_v47 }
 0x980   :  { %v12274_v13 = vpop.eup %12273 }
 0x981   :  { %v12276_v14 = vpop.eup %12275  ;;  %v9098_v40 = vmul.f32 %v12274_v13, %v12272_v12 }
 0x982   :  { %v9097_v57 = vmul.f32 %v12276_v14, %v9095_v21  ;;  %v12278_v58 = vpop.eup %12277 }
 0x984   :  { %v9099_v5 = vadd.f32 %v9098_v40, %v9097_v57 }
 0x986   :  { %12279 = vtanh.f32 %v9099_v5 }
 0x990   :  { %v12280_v18 = vpop.eup %12279 }
 0x991   :  { %v13442_v56 = vmul.f32 %v12280_v18, %v12278_v58 }
 0x993   :  { %v9103_v24 = vsel %vm7640_vm11, %v9102_v9, %v13442_v56 }
 0x994   :  { %v9104_v48 = vpack.c.bf16 %v9103_v24, %v9103_v24 }
 0x996   :  { %10563 = vmatmul.mubr.bf16.vlgmr.msra.gmra.mrb[56].mxu0 %v9104_v48 }
 0xa69   :  { %v9210_v27 = vpop.f32.mrb[56].mxu0 }
 0xa6a   :  { %v9211_v30 = vadd.f32 %v10479_v32, %v9210_v27  ;;  %v10564_v38 = vpop.f32.mrb[57].mxu0 }
 0xa6b   :  { %v9213_v31 = vpop.f32.mrb[58].mxu0 }
 0xa6c   :  { %v9216_v26 = vmax.f32 %v9211_v30, 0.0  ;;  %v10565_v15 = vpop.f32.mrb[59].mxu0 }
 0xa6e   :  { %v9224_v28 = vmul.f32 %v10488_v25, %v9216_v26 }
 0xa70   :  { %v9225_v34 = vsel %vm7228_vm5, %v9224_v28, 0.0 }
 0xa71   :  { %9226 = vadd.xlane.f32.xlu1 %v9225_v34 }
 0xafe   :  { %v9227_v50 = vpop.xlane.xlu1 %9226 }
 0xaff   :  { %v9235_v51 = vadd.f32 %v10489_v17, %v9227_v50 }
 0xb01   :  { %v9237_v6 = vrot.slane %v9235_v51, 2  ;;  %v9240_v16 = vrot.slane %v9235_v51, 4 }
 0xb03   :  { %v9239_v33 = vmax.f32 %v9235_v51, %v9237_v6 }
 0xb05   :  { %v9242_v10 = vmax.f32 %v9239_v33, %v9240_v16 }
 0xb07   :  { %v9247_v36 = vrot.slane %v9242_v10, 6  ;;  %v9252_v20 = vrot.slane %v9242_v10, 4  ;;  %v9243_v7 = vsub.f32 %v9235_v51, %v9242_v10 }
 0xb09   :  { %v9249_v37 = vsub.f32 %v9235_v51, %v9247_v36  ;;  %v9254_v8 = vsub.f32 %v9235_v51, %v9252_v20  ;;  %v9244_v41 = vmul.f32 1.442695, %v9243_v7 }
 0xb0b   :  { %v9250_v23 = vmul.f32 1.442695, %v9249_v37  ;;  %v9255_v42 = vmul.f32 1.442695, %v9254_v8 }
 0xb0d   :  { %12281 = vpow2.f32 %v9250_v23 }
 0xb0e   :  { %12283 = vpow2.f32 %v9255_v42 }
 0xb0f   :  { %12285 = vpow2.f32 %v9244_v41 }
 0xb17   :  { %v12282_v39 = vpop.eup %12281 }
 0xb18   :  { %v12284_v43 = vpop.eup %12283  ;;  %v9258_v35 = vrot.slane %v12282_v39, 2 }
 0xb19   :  { %v12286_v29 = vpop.eup %12285  ;;  %v9262_v53 = vrot.slane %v12284_v43, 4 }
 0xb1a   :  { %v9260_v44 = vadd.f32 %v12286_v29, %v9258_v35 }
 0xb1c   :  { %v9264_v1 = vadd.f32 %v9262_v53, %v9260_v44 }
 0xb1e   :  { %12287 = vrcp.f32 %v9264_v1 }
 0xb28   :  { %v12288_v52 = vpop.eup %12287 }
 0xb29   :  { %v9266_v54 = vmul.f32 %v12288_v52, %v12286_v29  ;;  %v9274_v59 = vrot.slane %v12288_v52, 6  ;;  %v9283_v4 = vrot.slane %v12288_v52, 4 }
 0xb2b   :  { %9269 = vperm.xlu0 %10695, %v9266_v54   ;;  %v9276_v61 = vmul.f32 %v12282_v39, %v9274_v59  ;;  %v9285_v0 = vmul.f32 %v12284_v43, %v9283_v4 }
 0xb2d   :  { %9279 = vperm.xlu1 %10696, %v9276_v61  }
 0xb2f   :  { %9288 = vperm.xlu0 %10695, %v9285_v0  }
 0xbaa   :  { %v9270_v19 = vpop.permute.xlu0 %9269 }
 0xbab   :  { %v9272_v14 = vmul.f32 %v9270_v19, %v13376_v22 }
 0xbac   :  { %v9280_v12 = vpop.permute.xlu1 %9279 }
 0xbad   :  { %v9282_v13 = vmul.f32 %v9280_v12, %v13422_v60 }
 0xbae   :  { %v9289_v21 = vpop.permute.xlu0 %9288 }
 0xbaf   :  { %v9293_v40 = vrot.slane %v9282_v13, 2  ;;  %v9291_v55 = vmul.f32 %v9289_v21, %v13442_v56 }
 0xbb1   :  { %v9295_v57 = vadd.f32 %v9293_v40, %v9272_v14  ;;  %v9297_v5 = vrot.slane %v9291_v55, 4 }
 0xbb3   :  { %v9299_v58 = vadd.f32 %v9297_v5, %v9295_v57 }
 0xbb5   :  { %v9300_v18 = vpack.c.bf16 %v9299_v58, %v9299_v58  ;;  %9413 = vst [vmem:[#allocation22] sm:$0x3] %v9299_v58 }
 0xbb7   :  { %10583 = vmatmul.mubr.bf16.vlgmr.msra.gmra.mrb[56].mxu1 %v9300_v18 }
 0xbb8   :  { %12545 = shalt.err (!%p12542_p8)
}
 0xbb9   :  { %s12546_s24 = scalar_lea.hbm %s13498_s14, 32 }
 0xbba   :  { %p12547_p9 = scmp.ne.s32.totalorder %s13498_s14, %s12546_s24  ;;  %p12550_p10 = scmp.lt.u32.totalorder %s12546_s24, %s13498_s14 }
 0xbbc   :  { %p12552_p11 = pnand %p12550_p10, %p12547_p9 }
 0xbbe   :  { %12555 = shalt.err (!%p12552_p11)
}
 0xbbf   :  { %9433 = dma.vmem_to_hbm [thread:$0]  %s9431_s30, 32, %s13498_s14, [#allocation23]   ;;  %v10490_v2 = vld [vmem:[#allocation20] ss:$0 sm:$0xff] }
 0xbc0   :  { %s12618_s28 = smov [#allocation21]  }
 0xbc1   :  { %s9420_s17 = sshll.u32 %s12618_s28, 4  ;;  %s9421_s17 = int_to_ptr.vmem [resolvable:$true] %s9420_s17 }
 0xbc2   :  { %s12556_s6 = scalar_lea.vmem %s9421_s17, 32  ;;  %p12561_p13 = scmp.lt.s32.totalorder %s9421_s17, %s9421_s17 }
 0xbc3   :  { %p12557_p12 = scmp.ne.s32.totalorder %s9421_s17, %s12556_s6  ;;  %p12562_p0 = scmp.lt.s32.totalorder %s12556_s6, %s12556_s6 }
 0xbc5   :  { %p12563_p1 = por %p12562_p0, %p12561_p13 }
 0xbc7   :  { %p12564_p2 = pnand %p12563_p1, %p12557_p12 }
 0xc8a   :  { %v9406_v22 = vpop.f32.mrb[56].mxu1 }
 0xc8b   :  { %v9407_v60 = vadd.f32 %v10490_v2, %v9406_v22  ;;  %v10584_v56 = vpop.f32.mrb[57].mxu1 }
 0xc8c   :  { %v9409_v9 = vpop.f32.mrb[58].mxu1 }
 0xc8d   :  { %9412 = vst [vmem:[#allocation21] sm:$0x3] %v9407_v60  ;;  %v10585_v24 = vpop.f32.mrb[59].mxu1 }
 0xc8e   :  { %12567 = shalt.err (!%p12564_p2)
}
 0xc8f   :  { %s12568_s14 = scalar_lea.hbm %s13497_s13, 32 }
 0xc90   :  { %p12569_p3 = scmp.ne.s32.totalorder %s13497_s13, %s12568_s14  ;;  %p12572_p4 = scmp.lt.u32.totalorder %s12568_s14, %s13497_s13 }
 0xc92   :  { %p12574_p5 = pnand %p12572_p4, %p12569_p3 }
 0xc94   :  { %12577 = shalt.err (!%p12574_p5)
}
 0xc95   :  { %9423 = dma.vmem_to_hbm [thread:$0]  %s9421_s17, 32, %s13497_s13, [#allocation5]  }
 0xc96   :  { %12590 = dma.done.wait [#allocation5], 32  }
 0xc97   :  { %12591 = vsyncadd [#allocation5], 4294967264 }
 0xc98   :  { %12592 = dma.done.wait [#allocation23], 32  }
 0xc99   :  { %12593 = vsyncadd [#allocation23], 4294967264 }
 0xc9a   :  { %9440 = vsyncpa [#allocation4], 1 }
 0xc9b   :  { %9441 = vsyncpa [#allocation7], 1 }
 0xc9c   :  { %9442 = vsyncpa [#allocation10], 1 }
 0xc9d   :  { %9443 = vsyncpa [#allocation13], 1 }
 0xc9e   :  { %9444 = vsyncpa [#allocation16], 1 }
 0xc9f   :  { %9445 = vsyncpa [#allocation19], 1 }
 0xca0   :  { %9446 = vsyncpa [#allocation5], 1 }
 0xca1   :  { %9447 = vsyncpa [#allocation23], 1 }

</bundles_post_ra>
